<compile_context>
chip_gen: v7x
topology: tpu7x:2x2x1
jax: 0.10.0
libtpu: 0.0.40
codegen_flags: <defaults>
</compile_context>

<pallas_src>
import functools
import math

import jax
import jax.numpy as jnp
from jax import lax
from jax.experimental import pallas as pl
from jax.experimental.pallas import tpu as pltpu


def _layernorm(x, gamma, beta, eps=1e-5):
    # f32 elementwise math; matches nn.LayerNorm (biased variance, eps=1e-5).
    mean = jnp.mean(x, axis=-1, keepdims=True)
    var = jnp.mean((x - mean) ** 2, axis=-1, keepdims=True)
    return (x - mean) * lax.rsqrt(var + eps) * gamma + beta


def attention_encoder_kernel(
    x_ref, pos_ref,
    wq_ref, bq_ref, wk_ref, bk_ref, wv_ref, bv_ref,
    wo_ref, bo_ref,
    w1_ref, b1_ref, w2_ref, b2_ref,
    ln1w_ref, ln1b_ref, ln2w_ref, ln2b_ref,
    o_ref,
    *, num_layers, nhead,
):
    S, D = x_ref.shape
    H = nhead
    bf16 = jnp.bfloat16

    # add positional embedding (pos = arange(S) -> the whole (S, D) table)
    x = x_ref[...] + pos_ref[...]                                    # (S, D) f32

    for l in range(num_layers):
        # ---- multi-head self attention, all heads batched in one einsum ----
        xb = jnp.broadcast_to(x.astype(bf16), (H, S, D))             # (H, S, D)
        q = jnp.einsum('hsd,hdk->hsk', xb, wq_ref[l],
                       preferred_element_type=jnp.float32) + bq_ref[l]
        k = jnp.einsum('hsd,hdk->hsk', xb, wk_ref[l],
                       preferred_element_type=jnp.float32) + bk_ref[l]
        v = jnp.einsum('hsd,hdk->hsk', xb, wv_ref[l],
                       preferred_element_type=jnp.float32) + bv_ref[l]

        # scores; 1/sqrt(head_dim) already folded into wq/bq
        s = jnp.einsum('hqd,hkd->hqk', q.astype(bf16), k.astype(bf16),
                       preferred_element_type=jnp.float32)           # (H, S, S)
        s = s - jnp.max(s, axis=-1, keepdims=True)
        p = jnp.exp(s)
        p = p * pl.reciprocal(jnp.sum(p, axis=-1, keepdims=True), approx=True)

        ctx = jnp.einsum('hqk,hkd->hqd', p.astype(bf16), v.astype(bf16),
                         preferred_element_type=jnp.float32)         # (H, S, hd)
        # per-head output projection then sum over heads == concat + (D,D) proj
        attn = jnp.einsum('hqd,hdo->hqo', ctx.astype(bf16), wo_ref[l],
                          preferred_element_type=jnp.float32)        # (H, S, D)
        attn = jnp.sum(attn, axis=0) + bo_ref[l]                     # (S, D)

        x = _layernorm(x + attn, ln1w_ref[l], ln1b_ref[l])

        # ---- feed forward (relu) ----
        h1 = jnp.dot(x.astype(bf16), w1_ref[l],
                     preferred_element_type=jnp.float32) + b1_ref[l]
        h1 = jnp.maximum(h1, 0.0)
        h2 = jnp.dot(h1.astype(bf16), w2_ref[l],
                     preferred_element_type=jnp.float32) + b2_ref[l]

        x = _layernorm(x + h2, ln2w_ref[l], ln2b_ref[l])

    o_ref[...] = x.astype(o_ref.dtype)


def prepare_params(torch_params, *, seq_len, nhead):
    """Re-layout PyTorch-style parameters for the kernel (all done once, in XLA).

    - split packed in_proj into per-head Wq/Wk/Wv: (L, H, D, hd)
    - fold the 1/sqrt(head_dim) attention scale into Wq / bq
    - reshape out_proj to per-head (L, H, hd, D) so no concat is needed in-kernel
    - pre-transpose FFN weights to (in, out) layout
    - cast all matmul weights to bf16; biases / LN params / pos-emb stay f32
    """
    (pos_emb, in_w, in_b, out_w, out_b,
     l1_w, l1_b, l2_w, l2_b,
     ln1_w, ln1_b, ln2_w, ln2_b) = torch_params

    L, _, D = in_w.shape
    H = nhead
    hd = D // H
    scale = 1.0 / math.sqrt(hd)
    bf16 = jnp.bfloat16

    def split_heads_cols(w_t):            # (L, D, D) [y = x @ w_t] -> (L, H, D, hd)
        return w_t.reshape(L, D, H, hd).transpose(0, 2, 1, 3)

    # torch in_proj_weight rows are [q; k; v]; y = x @ W.T
    wq_t = jnp.swapaxes(in_w[:, 0 * D:1 * D, :], 1, 2)       # (L, D, D)
    wk_t = jnp.swapaxes(in_w[:, 1 * D:2 * D, :], 1, 2)
    wv_t = jnp.swapaxes(in_w[:, 2 * D:3 * D, :], 1, 2)

    wq_h = (split_heads_cols(wq_t) * scale).astype(bf16)     # scale folded in
    wk_h = split_heads_cols(wk_t).astype(bf16)
    wv_h = split_heads_cols(wv_t).astype(bf16)

    bq = (in_b[:, 0 * D:1 * D] * scale).reshape(L, H, 1, hd)
    bk = in_b[:, 1 * D:2 * D].reshape(L, H, 1, hd)
    bv = in_b[:, 2 * D:3 * D].reshape(L, H, 1, hd)

    # out_proj: y = concat(heads) @ Wo.T + bo ; rows of Wo.T group by head
    wo_h = jnp.swapaxes(out_w, 1, 2).reshape(L, H, hd, D).astype(bf16)
    bo = out_b.reshape(L, 1, D)

    w1_t = jnp.swapaxes(l1_w, 1, 2).astype(bf16)             # (L, D, 2D)
    b1 = l1_b.reshape(L, 1, -1)
    w2_t = jnp.swapaxes(l2_w, 1, 2).astype(bf16)             # (L, 2D, D)
    b2 = l2_b.reshape(L, 1, D)

    return (pos_emb[:seq_len],
            wq_h, bq, wk_h, bk, wv_h, bv, wo_h, bo,
            w1_t, b1, w2_t, b2,
            ln1_w.reshape(L, 1, D), ln1_b.reshape(L, 1, D),
            ln2_w.reshape(L, 1, D), ln2_b.reshape(L, 1, D))


def attention_encoder(x, torch_params, *, nhead=8, num_layers=2):
    B, S, D = x.shape
    prep = prepare_params(torch_params, seq_len=S, nhead=nhead)

    def const_spec(a):
        nd = a.ndim
        return pl.BlockSpec(a.shape, lambda b, _nd=nd: (0,) * _nd)

    kernel = functools.partial(attention_encoder_kernel,
                               num_layers=num_layers, nhead=nhead)

    in_specs = [pl.BlockSpec((None, S, D), lambda b: (b, 0, 0))]   # x (batch squeezed)
    in_specs += [const_spec(a) for a in prep]

    return pl.pallas_call(
        kernel,
        out_shape=jax.ShapeDtypeStruct((B, S, D), x.dtype),
        grid=(B,),
        in_specs=in_specs,
        out_specs=pl.BlockSpec((None, S, D), lambda b: (b, 0, 0)),
        compiler_params=pltpu.CompilerParams(
            dimension_semantics=("parallel",),          # megacore: one batch per TC
            vmem_limit_bytes=32 * 1024 * 1024),         # safe on v5e/v6e/v7x; kernel uses <<1 MiB
    )(x, *prep)


def init_params(key, h_dim, seq_len, num_layers=2):
    """Deterministic synthetic params in PyTorch layout (same shapes as the nn.Module)."""
    D, L = h_dim, num_layers
    ks = jax.random.split(key, 9)
    s = 0.02
    pos_emb = s * jax.random.normal(ks[0], (seq_len, D), jnp.float32)
    in_w = s * jax.random.normal(ks[1], (L, 3 * D, D), jnp.float32)   # in_proj_weight
    in_b = s * jax.random.normal(ks[2], (L, 3 * D), jnp.float32)      # in_proj_bias
    out_w = s * jax.random.normal(ks[3], (L, D, D), jnp.float32)      # out_proj.weight
    out_b = s * jax.random.normal(ks[4], (L, D), jnp.float32)
    l1_w = s * jax.random.normal(ks[5], (L, 2 * D, D), jnp.float32)   # linear1.weight
    l1_b = s * jax.random.normal(ks[6], (L, 2 * D), jnp.float32)
    l2_w = s * jax.random.normal(ks[7], (L, D, 2 * D), jnp.float32)   # linear2.weight
    l2_b = s * jax.random.normal(ks[8], (L, D), jnp.float32)
    # LayerNorm: PyTorch default init (weight=1, bias=0)
    ln1_w = jnp.ones((L, D), jnp.float32); ln1_b = jnp.zeros((L, D), jnp.float32)
    ln2_w = jnp.ones((L, D), jnp.float32); ln2_b = jnp.zeros((L, D), jnp.float32)
    return (pos_emb, in_w, in_b, out_w, out_b, l1_w, l1_b, l2_w, l2_b,
            ln1_w, ln1_b, ln2_w, ln2_b)


if __name__ == "__main__":
    B, S, D, H = 2, 8, 32, 8   # batch, seq_len, h_dim, nhead

    key = jax.random.PRNGKey(0)
    k_x, k_p = jax.random.split(key)
    x = jax.random.normal(k_x, (B, S, D), jnp.float32)
    params = init_params(k_p, h_dim=D, seq_len=S, num_layers=2)

    out = attention_encoder(x, params, nhead=H, num_layers=2)
    out = jax.block_until_ready(out)
    assert out.shape == (B, S, D), out.shape
    assert bool(jnp.all(jnp.isfinite(out)))
    print("KERNEL_OK")
</pallas_src>

<mosaic_0001>
module attributes {stable_mosaic.version = 11 : i64} {
  func.func @attention_encoder_kernel(%arg0: i32, %arg1: memref<1x8x32xf32, #tpu.memory_space<vmem>>, %arg2: memref<8x32xf32, #tpu.memory_space<vmem>>, %arg3: memref<2x8x32x4xbf16, #tpu.memory_space<vmem>>, %arg4: memref<2x8x1x4xf32, #tpu.memory_space<vmem>>, %arg5: memref<2x8x32x4xbf16, #tpu.memory_space<vmem>>, %arg6: memref<2x8x1x4xf32, #tpu.memory_space<vmem>>, %arg7: memref<2x8x32x4xbf16, #tpu.memory_space<vmem>>, %arg8: memref<2x8x1x4xf32, #tpu.memory_space<vmem>>, %arg9: memref<2x8x4x32xbf16, #tpu.memory_space<vmem>>, %arg10: memref<2x1x32xf32, #tpu.memory_space<vmem>>, %arg11: memref<2x32x64xbf16, #tpu.memory_space<vmem>>, %arg12: memref<2x1x64xf32, #tpu.memory_space<vmem>>, %arg13: memref<2x64x32xbf16, #tpu.memory_space<vmem>>, %arg14: memref<2x1x32xf32, #tpu.memory_space<vmem>>, %arg15: memref<2x1x32xf32, #tpu.memory_space<vmem>>, %arg16: memref<2x1x32xf32, #tpu.memory_space<vmem>>, %arg17: memref<2x1x32xf32, #tpu.memory_space<vmem>>, %arg18: memref<2x1x32xf32, #tpu.memory_space<vmem>>, %arg19: memref<1x8x32xf32, #tpu.memory_space<vmem>>) attributes {dimension_semantics = [#tpu.dimension_semantics<parallel>], iteration_bounds = array<i64: 2>, scalar_prefetch = 0 : i64, scratch_operands = 0 : i64, tpu.core_type = #tpu.core_type<tc>, window_params = [{transform_indices = @transform_0, window_bounds = array<i64: 1, 8, 32>}, {pipeline_mode = #tpu.pipeline_mode<synchronous>, transform_indices = @transform_1, window_bounds = array<i64: 8, 32>}, {pipeline_mode = #tpu.pipeline_mode<synchronous>, transform_indices = @transform_2, window_bounds = array<i64: 2, 8, 32, 4>}, {pipeline_mode = #tpu.pipeline_mode<synchronous>, transform_indices = @transform_3, window_bounds = array<i64: 2, 8, 1, 4>}, {pipeline_mode = #tpu.pipeline_mode<synchronous>, transform_indices = @transform_4, window_bounds = array<i64: 2, 8, 32, 4>}, {pipeline_mode = #tpu.pipeline_mode<synchronous>, transform_indices = @transform_5, window_bounds = array<i64: 2, 8, 1, 4>}, {pipeline_mode = #tpu.pipeline_mode<synchronous>, transform_indices = @transform_6, window_bounds = array<i64: 2, 8, 32, 4>}, {pipeline_mode = #tpu.pipeline_mode<synchronous>, transform_indices = @transform_7, window_bounds = array<i64: 2, 8, 1, 4>}, {pipeline_mode = #tpu.pipeline_mode<synchronous>, transform_indices = @transform_8, window_bounds = array<i64: 2, 8, 4, 32>}, {pipeline_mode = #tpu.pipeline_mode<synchronous>, transform_indices = @transform_9, window_bounds = array<i64: 2, 1, 32>}, {pipeline_mode = #tpu.pipeline_mode<synchronous>, transform_indices = @transform_10, window_bounds = array<i64: 2, 32, 64>}, {pipeline_mode = #tpu.pipeline_mode<synchronous>, transform_indices = @transform_11, window_bounds = array<i64: 2, 1, 64>}, {pipeline_mode = #tpu.pipeline_mode<synchronous>, transform_indices = @transform_12, window_bounds = array<i64: 2, 64, 32>}, {pipeline_mode = #tpu.pipeline_mode<synchronous>, transform_indices = @transform_13, window_bounds = array<i64: 2, 1, 32>}, {pipeline_mode = #tpu.pipeline_mode<synchronous>, transform_indices = @transform_14, window_bounds = array<i64: 2, 1, 32>}, {pipeline_mode = #tpu.pipeline_mode<synchronous>, transform_indices = @transform_15, window_bounds = array<i64: 2, 1, 32>}, {pipeline_mode = #tpu.pipeline_mode<synchronous>, transform_indices = @transform_16, window_bounds = array<i64: 2, 1, 32>}, {pipeline_mode = #tpu.pipeline_mode<synchronous>, transform_indices = @transform_17, window_bounds = array<i64: 2, 1, 32>}, {transform_indices = @transform_18, window_bounds = array<i64: 1, 8, 32>}]} {
    %c0 = arith.constant 0 : index
    %c0_0 = arith.constant 0 : index
    %c0_1 = arith.constant 0 : index
    %0 = vector.load %arg1[%c0, %c0_0, %c0_1] : memref<1x8x32xf32, #tpu.memory_space<vmem>>, vector<1x8x32xf32>
    %1 = vector.shape_cast %0 : vector<1x8x32xf32> to vector<8x32xf32>
    %c0_2 = arith.constant 0 : index
    %c0_3 = arith.constant 0 : index
    %2 = vector.load %arg2[%c0_2, %c0_3] : memref<8x32xf32, #tpu.memory_space<vmem>>, vector<8x32xf32>
    %3 = arith.addf %1, %2 : vector<8x32xf32>
    %4 = arith.truncf %3 : vector<8x32xf32> to vector<8x32xbf16>
    %5 = vector.shape_cast %4 : vector<8x32xbf16> to vector<1x8x32xbf16>
    %6 = vector.broadcast %5 : vector<1x8x32xbf16> to vector<8x8x32xbf16>
    %c0_4 = arith.constant 0 : index
    %c0_5 = arith.constant 0 : index
    %c0_6 = arith.constant 0 : index
    %c0_7 = arith.constant 0 : index
    %7 = vector.load %arg3[%c0_4, %c0_5, %c0_6, %c0_7] : memref<2x8x32x4xbf16, #tpu.memory_space<vmem>>, vector<1x8x32x4xbf16>
    %8 = vector.shape_cast %7 : vector<1x8x32x4xbf16> to vector<8x32x4xbf16>
    "tpu.trace_start"() <{level = 10 : i32, message = "hsd,hdk->hsk"}> : () -> ()
    %cst = arith.constant dense<0.000000e+00> : vector<8x8x4xf32>
    %9 = tpu.matmul %6, %8, %cst {dimension_numbers = #tpu.dot_dimension_numbers<[2], [1], [1], [2], [0, 0, 0, 1, 1, 2], [0], [0]>} : vector<8x8x32xbf16>, vector<8x32x4xbf16>, vector<8x8x4xf32> -> vector<8x8x4xf32>
    "tpu.trace_stop"() : () -> ()
    %c0_8 = arith.constant 0 : index
    %c0_9 = arith.constant 0 : index
    %c0_10 = arith.constant 0 : index
    %c0_11 = arith.constant 0 : index
    %10 = vector.load %arg4[%c0_8, %c0_9, %c0_10, %c0_11] : memref<2x8x1x4xf32, #tpu.memory_space<vmem>>, vector<1x8x1x4xf32>
    %11 = vector.shape_cast %10 : vector<1x8x1x4xf32> to vector<8x1x4xf32>
    %12 = vector.broadcast %11 : vector<8x1x4xf32> to vector<8x8x4xf32>
    %13 = arith.addf %9, %12 : vector<8x8x4xf32>
    %c0_12 = arith.constant 0 : index
    %c0_13 = arith.constant 0 : index
    %c0_14 = arith.constant 0 : index
    %c0_15 = arith.constant 0 : index
    %14 = vector.load %arg5[%c0_12, %c0_13, %c0_14, %c0_15] : memref<2x8x32x4xbf16, #tpu.memory_space<vmem>>, vector<1x8x32x4xbf16>
    %15 = vector.shape_cast %14 : vector<1x8x32x4xbf16> to vector<8x32x4xbf16>
    "tpu.trace_start"() <{level = 10 : i32, message = "hsd,hdk->hsk"}> : () -> ()
    %cst_16 = arith.constant dense<0.000000e+00> : vector<8x8x4xf32>
    %16 = tpu.matmul %6, %15, %cst_16 {dimension_numbers = #tpu.dot_dimension_numbers<[2], [1], [1], [2], [0, 0, 0, 1, 1, 2], [0], [0]>} : vector<8x8x32xbf16>, vector<8x32x4xbf16>, vector<8x8x4xf32> -> vector<8x8x4xf32>
    "tpu.trace_stop"() : () -> ()
    %c0_17 = arith.constant 0 : index
    %c0_18 = arith.constant 0 : index
    %c0_19 = arith.constant 0 : index
    %c0_20 = arith.constant 0 : index
    %17 = vector.load %arg6[%c0_17, %c0_18, %c0_19, %c0_20] : memref<2x8x1x4xf32, #tpu.memory_space<vmem>>, vector<1x8x1x4xf32>
    %18 = vector.shape_cast %17 : vector<1x8x1x4xf32> to vector<8x1x4xf32>
    %19 = vector.broadcast %18 : vector<8x1x4xf32> to vector<8x8x4xf32>
    %20 = arith.addf %16, %19 : vector<8x8x4xf32>
    %c0_21 = arith.constant 0 : index
    %c0_22 = arith.constant 0 : index
    %c0_23 = arith.constant 0 : index
    %c0_24 = arith.constant 0 : index
    %21 = vector.load %arg7[%c0_21, %c0_22, %c0_23, %c0_24] : memref<2x8x32x4xbf16, #tpu.memory_space<vmem>>, vector<1x8x32x4xbf16>
    %22 = vector.shape_cast %21 : vector<1x8x32x4xbf16> to vector<8x32x4xbf16>
    "tpu.trace_start"() <{level = 10 : i32, message = "hsd,hdk->hsk"}> : () -> ()
    %cst_25 = arith.constant dense<0.000000e+00> : vector<8x8x4xf32>
    %23 = tpu.matmul %6, %22, %cst_25 {dimension_numbers = #tpu.dot_dimension_numbers<[2], [1], [1], [2], [0, 0, 0, 1, 1, 2], [0], [0]>} : vector<8x8x32xbf16>, vector<8x32x4xbf16>, vector<8x8x4xf32> -> vector<8x8x4xf32>
    "tpu.trace_stop"() : () -> ()
    %c0_26 = arith.constant 0 : index
    %c0_27 = arith.constant 0 : index
    %c0_28 = arith.constant 0 : index
    %c0_29 = arith.constant 0 : index
    %24 = vector.load %arg8[%c0_26, %c0_27, %c0_28, %c0_29] : memref<2x8x1x4xf32, #tpu.memory_space<vmem>>, vector<1x8x1x4xf32>
    %25 = vector.shape_cast %24 : vector<1x8x1x4xf32> to vector<8x1x4xf32>
    %26 = vector.broadcast %25 : vector<8x1x4xf32> to vector<8x8x4xf32>
    %27 = arith.addf %23, %26 : vector<8x8x4xf32>
    %28 = arith.truncf %13 : vector<8x8x4xf32> to vector<8x8x4xbf16>
    %29 = arith.truncf %20 : vector<8x8x4xf32> to vector<8x8x4xbf16>
    "tpu.trace_start"() <{level = 10 : i32, message = "hqd,hkd->hqk"}> : () -> ()
    %cst_30 = arith.constant dense<0.000000e+00> : vector<8x8x8xf32>
    %30 = tpu.matmul %28, %29, %cst_30 {dimension_numbers = #tpu.dot_dimension_numbers<[2], [2], [1], [1], [0, 0, 0, 1, 1, 1], [0], [0]>} : vector<8x8x4xbf16>, vector<8x8x4xbf16>, vector<8x8x8xf32> -> vector<8x8x8xf32>
    "tpu.trace_stop"() : () -> ()
    %cst_31 = arith.constant dense<0xFF800000> : vector<8x8xf32>
    %31 = vector.multi_reduction <maximumf>, %30, %cst_31 [2] : vector<8x8x8xf32> to vector<8x8xf32>
    %32 = vector.shape_cast %31 : vector<8x8xf32> to vector<8x8x1xf32>
    %33 = vector.broadcast %32 : vector<8x8x1xf32> to vector<8x8x8xf32>
    %34 = arith.subf %30, %33 : vector<8x8x8xf32>
    %35 = math.exp %34 : vector<8x8x8xf32>
    %cst_32 = arith.constant dense<0.000000e+00> : vector<8x8xf32>
    %36 = vector.multi_reduction <add>, %35, %cst_32 [2] : vector<8x8x8xf32> to vector<8x8xf32>
    %37 = vector.shape_cast %36 : vector<8x8xf32> to vector<8x8x1xf32>
    %38 = tpu.reciprocal %37 {approx = true} : vector<8x8x1xf32> -> vector<8x8x1xf32>
    %39 = vector.broadcast %38 : vector<8x8x1xf32> to vector<8x8x8xf32>
    %40 = arith.mulf %35, %39 : vector<8x8x8xf32>
    %41 = arith.truncf %40 : vector<8x8x8xf32> to vector<8x8x8xbf16>
    %42 = arith.truncf %27 : vector<8x8x4xf32> to vector<8x8x4xbf16>
    "tpu.trace_start"() <{level = 10 : i32, message = "hqk,hkd->hqd"}> : () -> ()
    %cst_33 = arith.constant dense<0.000000e+00> : vector<8x8x4xf32>
    %43 = tpu.matmul %41, %42, %cst_33 {dimension_numbers = #tpu.dot_dimension_numbers<[2], [1], [1], [2], [0, 0, 0, 1, 1, 2], [0], [0]>} : vector<8x8x8xbf16>, vector<8x8x4xbf16>, vector<8x8x4xf32> -> vector<8x8x4xf32>
    "tpu.trace_stop"() : () -> ()
    %44 = arith.truncf %43 : vector<8x8x4xf32> to vector<8x8x4xbf16>
    %c0_34 = arith.constant 0 : index
    %c0_35 = arith.constant 0 : index
    %c0_36 = arith.constant 0 : index
    %c0_37 = arith.constant 0 : index
    %45 = vector.load %arg9[%c0_34, %c0_35, %c0_36, %c0_37] : memref<2x8x4x32xbf16, #tpu.memory_space<vmem>>, vector<1x8x4x32xbf16>
    %46 = vector.shape_cast %45 : vector<1x8x4x32xbf16> to vector<8x4x32xbf16>
    "tpu.trace_start"() <{level = 10 : i32, message = "hqd,hdo->hqo"}> : () -> ()
    %cst_38 = arith.constant dense<0.000000e+00> : vector<8x8x32xf32>
    %47 = tpu.matmul %44, %46, %cst_38 {dimension_numbers = #tpu.dot_dimension_numbers<[2], [1], [1], [2], [0, 0, 0, 1, 1, 2], [0], [0]>} : vector<8x8x4xbf16>, vector<8x4x32xbf16>, vector<8x8x32xf32> -> vector<8x8x32xf32>
    "tpu.trace_stop"() : () -> ()
    %cst_39 = arith.constant dense<0.000000e+00> : vector<8x32xf32>
    %48 = vector.multi_reduction <add>, %47, %cst_39 [0] : vector<8x8x32xf32> to vector<8x32xf32>
    %c0_40 = arith.constant 0 : index
    %c0_41 = arith.constant 0 : index
    %c0_42 = arith.constant 0 : index
    %49 = vector.load %arg10[%c0_40, %c0_41, %c0_42] : memref<2x1x32xf32, #tpu.memory_space<vmem>>, vector<1x1x32xf32>
    %50 = vector.shape_cast %49 : vector<1x1x32xf32> to vector<1x32xf32>
    %51 = vector.broadcast %50 : vector<1x32xf32> to vector<8x32xf32>
    %52 = arith.addf %48, %51 : vector<8x32xf32>
    %53 = arith.addf %3, %52 : vector<8x32xf32>
    %c0_43 = arith.constant 0 : index
    %c0_44 = arith.constant 0 : index
    %c0_45 = arith.constant 0 : index
    %54 = vector.load %arg15[%c0_43, %c0_44, %c0_45] : memref<2x1x32xf32, #tpu.memory_space<vmem>>, vector<1x1x32xf32>
    %55 = vector.shape_cast %54 : vector<1x1x32xf32> to vector<1x32xf32>
    %c0_46 = arith.constant 0 : index
    %c0_47 = arith.constant 0 : index
    %c0_48 = arith.constant 0 : index
    %56 = vector.load %arg16[%c0_46, %c0_47, %c0_48] : memref<2x1x32xf32, #tpu.memory_space<vmem>>, vector<1x1x32xf32>
    %57 = vector.shape_cast %56 : vector<1x1x32xf32> to vector<1x32xf32>
    %cst_49 = arith.constant dense<0.000000e+00> : vector<8xf32>
    %58 = vector.multi_reduction <add>, %53, %cst_49 [1] : vector<8x32xf32> to vector<8xf32>
    %59 = vector.shape_cast %58 : vector<8xf32> to vector<8x1xf32>
    %cst_50 = arith.constant 3.200000e+01 : f32
    %60 = vector.broadcast %cst_50 : f32 to vector<8x1xf32>
    %61 = arith.divf %59, %60 : vector<8x1xf32>
    %62 = vector.broadcast %61 : vector<8x1xf32> to vector<8x32xf32>
    %63 = arith.subf %53, %62 : vector<8x32xf32>
    %64 = arith.mulf %63, %63 : vector<8x32xf32>
    %cst_51 = arith.constant dense<0.000000e+00> : vector<8xf32>
    %65 = vector.multi_reduction <add>, %64, %cst_51 [1] : vector<8x32xf32> to vector<8xf32>
    %66 = vector.shape_cast %65 : vector<8xf32> to vector<8x1xf32>
    %cst_52 = arith.constant 3.200000e+01 : f32
    %67 = vector.broadcast %cst_52 : f32 to vector<8x1xf32>
    %68 = arith.divf %66, %67 : vector<8x1xf32>
    %69 = vector.broadcast %61 : vector<8x1xf32> to vector<8x32xf32>
    %70 = arith.subf %53, %69 : vector<8x32xf32>
    %cst_53 = arith.constant 9.99999974E-6 : f32
    %71 = vector.broadcast %cst_53 : f32 to vector<8x1xf32>
    %72 = arith.addf %68, %71 : vector<8x1xf32>
    %73 = math.rsqrt %72 : vector<8x1xf32>
    %74 = vector.broadcast %73 : vector<8x1xf32> to vector<8x32xf32>
    %75 = arith.mulf %70, %74 : vector<8x32xf32>
    %76 = vector.broadcast %55 : vector<1x32xf32> to vector<8x32xf32>
    %77 = arith.mulf %75, %76 : vector<8x32xf32>
    %78 = vector.broadcast %57 : vector<1x32xf32> to vector<8x32xf32>
    %79 = arith.addf %77, %78 : vector<8x32xf32>
    %80 = arith.truncf %79 : vector<8x32xf32> to vector<8x32xbf16>
    %c0_54 = arith.constant 0 : index
    %c0_55 = arith.constant 0 : index
    %c0_56 = arith.constant 0 : index
    %81 = vector.load %arg11[%c0_54, %c0_55, %c0_56] : memref<2x32x64xbf16, #tpu.memory_space<vmem>>, vector<1x32x64xbf16>
    %82 = vector.shape_cast %81 : vector<1x32x64xbf16> to vector<32x64xbf16>
    %cst_57 = arith.constant dense<0.000000e+00> : vector<8x64xf32>
    %83 = tpu.matmul %80, %82, %cst_57 {dimension_numbers = #tpu.dot_dimension_numbers<[1], [0], [0], [1], [0, 0, 1, 1], [], []>} : vector<8x32xbf16>, vector<32x64xbf16>, vector<8x64xf32> -> vector<8x64xf32>
    %c0_58 = arith.constant 0 : index
    %c0_59 = arith.constant 0 : index
    %c0_60 = arith.constant 0 : index
    %84 = vector.load %arg12[%c0_58, %c0_59, %c0_60] : memref<2x1x64xf32, #tpu.memory_space<vmem>>, vector<1x1x64xf32>
    %85 = vector.shape_cast %84 : vector<1x1x64xf32> to vector<1x64xf32>
    %86 = vector.broadcast %85 : vector<1x64xf32> to vector<8x64xf32>
    %87 = arith.addf %83, %86 : vector<8x64xf32>
    %cst_61 = arith.constant 0.000000e+00 : f32
    %88 = vector.broadcast %cst_61 : f32 to vector<8x64xf32>
    %89 = arith.maximumf %87, %88 : vector<8x64xf32>
    %90 = arith.truncf %89 : vector<8x64xf32> to vector<8x64xbf16>
    %c0_62 = arith.constant 0 : index
    %c0_63 = arith.constant 0 : index
    %c0_64 = arith.constant 0 : index
    %91 = vector.load %arg13[%c0_62, %c0_63, %c0_64] : memref<2x64x32xbf16, #tpu.memory_space<vmem>>, vector<1x64x32xbf16>
    %92 = vector.shape_cast %91 : vector<1x64x32xbf16> to vector<64x32xbf16>
    %cst_65 = arith.constant dense<0.000000e+00> : vector<8x32xf32>
    %93 = tpu.matmul %90, %92, %cst_65 {dimension_numbers = #tpu.dot_dimension_numbers<[1], [0], [0], [1], [0, 0, 1, 1], [], []>} : vector<8x64xbf16>, vector<64x32xbf16>, vector<8x32xf32> -> vector<8x32xf32>
    %c0_66 = arith.constant 0 : index
    %c0_67 = arith.constant 0 : index
    %c0_68 = arith.constant 0 : index
    %94 = vector.load %arg14[%c0_66, %c0_67, %c0_68] : memref<2x1x32xf32, #tpu.memory_space<vmem>>, vector<1x1x32xf32>
    %95 = vector.shape_cast %94 : vector<1x1x32xf32> to vector<1x32xf32>
    %96 = vector.broadcast %95 : vector<1x32xf32> to vector<8x32xf32>
    %97 = arith.addf %93, %96 : vector<8x32xf32>
    %98 = arith.addf %79, %97 : vector<8x32xf32>
    %c0_69 = arith.constant 0 : index
    %c0_70 = arith.constant 0 : index
    %c0_71 = arith.constant 0 : index
    %99 = vector.load %arg17[%c0_69, %c0_70, %c0_71] : memref<2x1x32xf32, #tpu.memory_space<vmem>>, vector<1x1x32xf32>
    %100 = vector.shape_cast %99 : vector<1x1x32xf32> to vector<1x32xf32>
    %c0_72 = arith.constant 0 : index
    %c0_73 = arith.constant 0 : index
    %c0_74 = arith.constant 0 : index
    %101 = vector.load %arg18[%c0_72, %c0_73, %c0_74] : memref<2x1x32xf32, #tpu.memory_space<vmem>>, vector<1x1x32xf32>
    %102 = vector.shape_cast %101 : vector<1x1x32xf32> to vector<1x32xf32>
    %cst_75 = arith.constant dense<0.000000e+00> : vector<8xf32>
    %103 = vector.multi_reduction <add>, %98, %cst_75 [1] : vector<8x32xf32> to vector<8xf32>
    %104 = vector.shape_cast %103 : vector<8xf32> to vector<8x1xf32>
    %cst_76 = arith.constant 3.200000e+01 : f32
    %105 = vector.broadcast %cst_76 : f32 to vector<8x1xf32>
    %106 = arith.divf %104, %105 : vector<8x1xf32>
    %107 = vector.broadcast %106 : vector<8x1xf32> to vector<8x32xf32>
    %108 = arith.subf %98, %107 : vector<8x32xf32>
    %109 = arith.mulf %108, %108 : vector<8x32xf32>
    %cst_77 = arith.constant dense<0.000000e+00> : vector<8xf32>
    %110 = vector.multi_reduction <add>, %109, %cst_77 [1] : vector<8x32xf32> to vector<8xf32>
    %111 = vector.shape_cast %110 : vector<8xf32> to vector<8x1xf32>
    %cst_78 = arith.constant 3.200000e+01 : f32
    %112 = vector.broadcast %cst_78 : f32 to vector<8x1xf32>
    %113 = arith.divf %111, %112 : vector<8x1xf32>
    %114 = vector.broadcast %106 : vector<8x1xf32> to vector<8x32xf32>
    %115 = arith.subf %98, %114 : vector<8x32xf32>
    %cst_79 = arith.constant 9.99999974E-6 : f32
    %116 = vector.broadcast %cst_79 : f32 to vector<8x1xf32>
    %117 = arith.addf %113, %116 : vector<8x1xf32>
    %118 = math.rsqrt %117 : vector<8x1xf32>
    %119 = vector.broadcast %118 : vector<8x1xf32> to vector<8x32xf32>
    %120 = arith.mulf %115, %119 : vector<8x32xf32>
    %121 = vector.broadcast %100 : vector<1x32xf32> to vector<8x32xf32>
    %122 = arith.mulf %120, %121 : vector<8x32xf32>
    %123 = vector.broadcast %102 : vector<1x32xf32> to vector<8x32xf32>
    %124 = arith.addf %122, %123 : vector<8x32xf32>
    %125 = arith.truncf %124 : vector<8x32xf32> to vector<8x32xbf16>
    %126 = vector.shape_cast %125 : vector<8x32xbf16> to vector<1x8x32xbf16>
    %127 = vector.broadcast %126 : vector<1x8x32xbf16> to vector<8x8x32xbf16>
    %c1 = arith.constant 1 : index
    %c0_80 = arith.constant 0 : index
    %c0_81 = arith.constant 0 : index
    %c0_82 = arith.constant 0 : index
    %128 = vector.load %arg3[%c1, %c0_80, %c0_81, %c0_82] : memref<2x8x32x4xbf16, #tpu.memory_space<vmem>>, vector<1x8x32x4xbf16>
    %129 = vector.shape_cast %128 : vector<1x8x32x4xbf16> to vector<8x32x4xbf16>
    "tpu.trace_start"() <{level = 10 : i32, message = "hsd,hdk->hsk"}> : () -> ()
    %cst_83 = arith.constant dense<0.000000e+00> : vector<8x8x4xf32>
    %130 = tpu.matmul %127, %129, %cst_83 {dimension_numbers = #tpu.dot_dimension_numbers<[2], [1], [1], [2], [0, 0, 0, 1, 1, 2], [0], [0]>} : vector<8x8x32xbf16>, vector<8x32x4xbf16>, vector<8x8x4xf32> -> vector<8x8x4xf32>
    "tpu.trace_stop"() : () -> ()
    %c1_84 = arith.constant 1 : index
    %c0_85 = arith.constant 0 : index
    %c0_86 = arith.constant 0 : index
    %c0_87 = arith.constant 0 : index
    %131 = vector.load %arg4[%c1_84, %c0_85, %c0_86, %c0_87] : memref<2x8x1x4xf32, #tpu.memory_space<vmem>>, vector<1x8x1x4xf32>
    %132 = vector.shape_cast %131 : vector<1x8x1x4xf32> to vector<8x1x4xf32>
    %133 = vector.broadcast %132 : vector<8x1x4xf32> to vector<8x8x4xf32>
    %134 = arith.addf %130, %133 : vector<8x8x4xf32>
    %c1_88 = arith.constant 1 : index
    %c0_89 = arith.constant 0 : index
    %c0_90 = arith.constant 0 : index
    %c0_91 = arith.constant 0 : index
    %135 = vector.load %arg5[%c1_88, %c0_89, %c0_90, %c0_91] : memref<2x8x32x4xbf16, #tpu.memory_space<vmem>>, vector<1x8x32x4xbf16>
    %136 = vector.shape_cast %135 : vector<1x8x32x4xbf16> to vector<8x32x4xbf16>
    "tpu.trace_start"() <{level = 10 : i32, message = "hsd,hdk->hsk"}> : () -> ()
    %cst_92 = arith.constant dense<0.000000e+00> : vector<8x8x4xf32>
    %137 = tpu.matmul %127, %136, %cst_92 {dimension_numbers = #tpu.dot_dimension_numbers<[2], [1], [1], [2], [0, 0, 0, 1, 1, 2], [0], [0]>} : vector<8x8x32xbf16>, vector<8x32x4xbf16>, vector<8x8x4xf32> -> vector<8x8x4xf32>
    "tpu.trace_stop"() : () -> ()
    %c1_93 = arith.constant 1 : index
    %c0_94 = arith.constant 0 : index
    %c0_95 = arith.constant 0 : index
    %c0_96 = arith.constant 0 : index
    %138 = vector.load %arg6[%c1_93, %c0_94, %c0_95, %c0_96] : memref<2x8x1x4xf32, #tpu.memory_space<vmem>>, vector<1x8x1x4xf32>
    %139 = vector.shape_cast %138 : vector<1x8x1x4xf32> to vector<8x1x4xf32>
    %140 = vector.broadcast %139 : vector<8x1x4xf32> to vector<8x8x4xf32>
    %141 = arith.addf %137, %140 : vector<8x8x4xf32>
    %c1_97 = arith.constant 1 : index
    %c0_98 = arith.constant 0 : index
    %c0_99 = arith.constant 0 : index
    %c0_100 = arith.constant 0 : index
    %142 = vector.load %arg7[%c1_97, %c0_98, %c0_99, %c0_100] : memref<2x8x32x4xbf16, #tpu.memory_space<vmem>>, vector<1x8x32x4xbf16>
    %143 = vector.shape_cast %142 : vector<1x8x32x4xbf16> to vector<8x32x4xbf16>
    "tpu.trace_start"() <{level = 10 : i32, message = "hsd,hdk->hsk"}> : () -> ()
    %cst_101 = arith.constant dense<0.000000e+00> : vector<8x8x4xf32>
    %144 = tpu.matmul %127, %143, %cst_101 {dimension_numbers = #tpu.dot_dimension_numbers<[2], [1], [1], [2], [0, 0, 0, 1, 1, 2], [0], [0]>} : vector<8x8x32xbf16>, vector<8x32x4xbf16>, vector<8x8x4xf32> -> vector<8x8x4xf32>
    "tpu.trace_stop"() : () -> ()
    %c1_102 = arith.constant 1 : index
    %c0_103 = arith.constant 0 : index
    %c0_104 = arith.constant 0 : index
    %c0_105 = arith.constant 0 : index
    %145 = vector.load %arg8[%c1_102, %c0_103, %c0_104, %c0_105] : memref<2x8x1x4xf32, #tpu.memory_space<vmem>>, vector<1x8x1x4xf32>
    %146 = vector.shape_cast %145 : vector<1x8x1x4xf32> to vector<8x1x4xf32>
    %147 = vector.broadcast %146 : vector<8x1x4xf32> to vector<8x8x4xf32>
    %148 = arith.addf %144, %147 : vector<8x8x4xf32>
    %149 = arith.truncf %134 : vector<8x8x4xf32> to vector<8x8x4xbf16>
    %150 = arith.truncf %141 : vector<8x8x4xf32> to vector<8x8x4xbf16>
    "tpu.trace_start"() <{level = 10 : i32, message = "hqd,hkd->hqk"}> : () -> ()
    %cst_106 = arith.constant dense<0.000000e+00> : vector<8x8x8xf32>
    %151 = tpu.matmul %149, %150, %cst_106 {dimension_numbers = #tpu.dot_dimension_numbers<[2], [2], [1], [1], [0, 0, 0, 1, 1, 1], [0], [0]>} : vector<8x8x4xbf16>, vector<8x8x4xbf16>, vector<8x8x8xf32> -> vector<8x8x8xf32>
    "tpu.trace_stop"() : () -> ()
    %cst_107 = arith.constant dense<0xFF800000> : vector<8x8xf32>
    %152 = vector.multi_reduction <maximumf>, %151, %cst_107 [2] : vector<8x8x8xf32> to vector<8x8xf32>
    %153 = vector.shape_cast %152 : vector<8x8xf32> to vector<8x8x1xf32>
    %154 = vector.broadcast %153 : vector<8x8x1xf32> to vector<8x8x8xf32>
    %155 = arith.subf %151, %154 : vector<8x8x8xf32>
    %156 = math.exp %155 : vector<8x8x8xf32>
    %cst_108 = arith.constant dense<0.000000e+00> : vector<8x8xf32>
    %157 = vector.multi_reduction <add>, %156, %cst_108 [2] : vector<8x8x8xf32> to vector<8x8xf32>
    %158 = vector.shape_cast %157 : vector<8x8xf32> to vector<8x8x1xf32>
    %159 = tpu.reciprocal %158 {approx = true} : vector<8x8x1xf32> -> vector<8x8x1xf32>
    %160 = vector.broadcast %159 : vector<8x8x1xf32> to vector<8x8x8xf32>
    %161 = arith.mulf %156, %160 : vector<8x8x8xf32>
    %162 = arith.truncf %161 : vector<8x8x8xf32> to vector<8x8x8xbf16>
    %163 = arith.truncf %148 : vector<8x8x4xf32> to vector<8x8x4xbf16>
    "tpu.trace_start"() <{level = 10 : i32, message = "hqk,hkd->hqd"}> : () -> ()
    %cst_109 = arith.constant dense<0.000000e+00> : vector<8x8x4xf32>
    %164 = tpu.matmul %162, %163, %cst_109 {dimension_numbers = #tpu.dot_dimension_numbers<[2], [1], [1], [2], [0, 0, 0, 1, 1, 2], [0], [0]>} : vector<8x8x8xbf16>, vector<8x8x4xbf16>, vector<8x8x4xf32> -> vector<8x8x4xf32>
    "tpu.trace_stop"() : () -> ()
    %165 = arith.truncf %164 : vector<8x8x4xf32> to vector<8x8x4xbf16>
    %c1_110 = arith.constant 1 : index
    %c0_111 = arith.constant 0 : index
    %c0_112 = arith.constant 0 : index
    %c0_113 = arith.constant 0 : index
    %166 = vector.load %arg9[%c1_110, %c0_111, %c0_112, %c0_113] : memref<2x8x4x32xbf16, #tpu.memory_space<vmem>>, vector<1x8x4x32xbf16>
    %167 = vector.shape_cast %166 : vector<1x8x4x32xbf16> to vector<8x4x32xbf16>
    "tpu.trace_start"() <{level = 10 : i32, message = "hqd,hdo->hqo"}> : () -> ()
    %cst_114 = arith.constant dense<0.000000e+00> : vector<8x8x32xf32>
    %168 = tpu.matmul %165, %167, %cst_114 {dimension_numbers = #tpu.dot_dimension_numbers<[2], [1], [1], [2], [0, 0, 0, 1, 1, 2], [0], [0]>} : vector<8x8x4xbf16>, vector<8x4x32xbf16>, vector<8x8x32xf32> -> vector<8x8x32xf32>
    "tpu.trace_stop"() : () -> ()
    %cst_115 = arith.constant dense<0.000000e+00> : vector<8x32xf32>
    %169 = vector.multi_reduction <add>, %168, %cst_115 [0] : vector<8x8x32xf32> to vector<8x32xf32>
    %c1_116 = arith.constant 1 : index
    %c0_117 = arith.constant 0 : index
    %c0_118 = arith.constant 0 : index
    %170 = vector.load %arg10[%c1_116, %c0_117, %c0_118] : memref<2x1x32xf32, #tpu.memory_space<vmem>>, vector<1x1x32xf32>
    %171 = vector.shape_cast %170 : vector<1x1x32xf32> to vector<1x32xf32>
    %172 = vector.broadcast %171 : vector<1x32xf32> to vector<8x32xf32>
    %173 = arith.addf %169, %172 : vector<8x32xf32>
    %174 = arith.addf %124, %173 : vector<8x32xf32>
    %c1_119 = arith.constant 1 : index
    %c0_120 = arith.constant 0 : index
    %c0_121 = arith.constant 0 : index
    %175 = vector.load %arg15[%c1_119, %c0_120, %c0_121] : memref<2x1x32xf32, #tpu.memory_space<vmem>>, vector<1x1x32xf32>
    %176 = vector.shape_cast %175 : vector<1x1x32xf32> to vector<1x32xf32>
    %c1_122 = arith.constant 1 : index
    %c0_123 = arith.constant 0 : index
    %c0_124 = arith.constant 0 : index
    %177 = vector.load %arg16[%c1_122, %c0_123, %c0_124] : memref<2x1x32xf32, #tpu.memory_space<vmem>>, vector<1x1x32xf32>
    %178 = vector.shape_cast %177 : vector<1x1x32xf32> to vector<1x32xf32>
    %cst_125 = arith.constant dense<0.000000e+00> : vector<8xf32>
    %179 = vector.multi_reduction <add>, %174, %cst_125 [1] : vector<8x32xf32> to vector<8xf32>
    %180 = vector.shape_cast %179 : vector<8xf32> to vector<8x1xf32>
    %cst_126 = arith.constant 3.200000e+01 : f32
    %181 = vector.broadcast %cst_126 : f32 to vector<8x1xf32>
    %182 = arith.divf %180, %181 : vector<8x1xf32>
    %183 = vector.broadcast %182 : vector<8x1xf32> to vector<8x32xf32>
    %184 = arith.subf %174, %183 : vector<8x32xf32>
    %185 = arith.mulf %184, %184 : vector<8x32xf32>
    %cst_127 = arith.constant dense<0.000000e+00> : vector<8xf32>
    %186 = vector.multi_reduction <add>, %185, %cst_127 [1] : vector<8x32xf32> to vector<8xf32>
    %187 = vector.shape_cast %186 : vector<8xf32> to vector<8x1xf32>
    %cst_128 = arith.constant 3.200000e+01 : f32
    %188 = vector.broadcast %cst_128 : f32 to vector<8x1xf32>
    %189 = arith.divf %187, %188 : vector<8x1xf32>
    %190 = vector.broadcast %182 : vector<8x1xf32> to vector<8x32xf32>
    %191 = arith.subf %174, %190 : vector<8x32xf32>
    %cst_129 = arith.constant 9.99999974E-6 : f32
    %192 = vector.broadcast %cst_129 : f32 to vector<8x1xf32>
    %193 = arith.addf %189, %192 : vector<8x1xf32>
    %194 = math.rsqrt %193 : vector<8x1xf32>
    %195 = vector.broadcast %194 : vector<8x1xf32> to vector<8x32xf32>
    %196 = arith.mulf %191, %195 : vector<8x32xf32>
    %197 = vector.broadcast %176 : vector<1x32xf32> to vector<8x32xf32>
    %198 = arith.mulf %196, %197 : vector<8x32xf32>
    %199 = vector.broadcast %178 : vector<1x32xf32> to vector<8x32xf32>
    %200 = arith.addf %198, %199 : vector<8x32xf32>
    %201 = arith.truncf %200 : vector<8x32xf32> to vector<8x32xbf16>
    %c1_130 = arith.constant 1 : index
    %c0_131 = arith.constant 0 : index
    %c0_132 = arith.constant 0 : index
    %202 = vector.load %arg11[%c1_130, %c0_131, %c0_132] : memref<2x32x64xbf16, #tpu.memory_space<vmem>>, vector<1x32x64xbf16>
    %203 = vector.shape_cast %202 : vector<1x32x64xbf16> to vector<32x64xbf16>
    %cst_133 = arith.constant dense<0.000000e+00> : vector<8x64xf32>
    %204 = tpu.matmul %201, %203, %cst_133 {dimension_numbers = #tpu.dot_dimension_numbers<[1], [0], [0], [1], [0, 0, 1, 1], [], []>} : vector<8x32xbf16>, vector<32x64xbf16>, vector<8x64xf32> -> vector<8x64xf32>
    %c1_134 = arith.constant 1 : index
    %c0_135 = arith.constant 0 : index
    %c0_136 = arith.constant 0 : index
    %205 = vector.load %arg12[%c1_134, %c0_135, %c0_136] : memref<2x1x64xf32, #tpu.memory_space<vmem>>, vector<1x1x64xf32>
    %206 = vector.shape_cast %205 : vector<1x1x64xf32> to vector<1x64xf32>
    %207 = vector.broadcast %206 : vector<1x64xf32> to vector<8x64xf32>
    %208 = arith.addf %204, %207 : vector<8x64xf32>
    %cst_137 = arith.constant 0.000000e+00 : f32
    %209 = vector.broadcast %cst_137 : f32 to vector<8x64xf32>
    %210 = arith.maximumf %208, %209 : vector<8x64xf32>
    %211 = arith.truncf %210 : vector<8x64xf32> to vector<8x64xbf16>
    %c1_138 = arith.constant 1 : index
    %c0_139 = arith.constant 0 : index
    %c0_140 = arith.constant 0 : index
    %212 = vector.load %arg13[%c1_138, %c0_139, %c0_140] : memref<2x64x32xbf16, #tpu.memory_space<vmem>>, vector<1x64x32xbf16>
    %213 = vector.shape_cast %212 : vector<1x64x32xbf16> to vector<64x32xbf16>
    %cst_141 = arith.constant dense<0.000000e+00> : vector<8x32xf32>
    %214 = tpu.matmul %211, %213, %cst_141 {dimension_numbers = #tpu.dot_dimension_numbers<[1], [0], [0], [1], [0, 0, 1, 1], [], []>} : vector<8x64xbf16>, vector<64x32xbf16>, vector<8x32xf32> -> vector<8x32xf32>
    %c1_142 = arith.constant 1 : index
    %c0_143 = arith.constant 0 : index
    %c0_144 = arith.constant 0 : index
    %215 = vector.load %arg14[%c1_142, %c0_143, %c0_144] : memref<2x1x32xf32, #tpu.memory_space<vmem>>, vector<1x1x32xf32>
    %216 = vector.shape_cast %215 : vector<1x1x32xf32> to vector<1x32xf32>
    %217 = vector.broadcast %216 : vector<1x32xf32> to vector<8x32xf32>
    %218 = arith.addf %214, %217 : vector<8x32xf32>
    %219 = arith.addf %200, %218 : vector<8x32xf32>
    %c1_145 = arith.constant 1 : index
    %c0_146 = arith.constant 0 : index
    %c0_147 = arith.constant 0 : index
    %220 = vector.load %arg17[%c1_145, %c0_146, %c0_147] : memref<2x1x32xf32, #tpu.memory_space<vmem>>, vector<1x1x32xf32>
    %221 = vector.shape_cast %220 : vector<1x1x32xf32> to vector<1x32xf32>
    %c1_148 = arith.constant 1 : index
    %c0_149 = arith.constant 0 : index
    %c0_150 = arith.constant 0 : index
    %222 = vector.load %arg18[%c1_148, %c0_149, %c0_150] : memref<2x1x32xf32, #tpu.memory_space<vmem>>, vector<1x1x32xf32>
    %223 = vector.shape_cast %222 : vector<1x1x32xf32> to vector<1x32xf32>
    %cst_151 = arith.constant dense<0.000000e+00> : vector<8xf32>
    %224 = vector.multi_reduction <add>, %219, %cst_151 [1] : vector<8x32xf32> to vector<8xf32>
    %225 = vector.shape_cast %224 : vector<8xf32> to vector<8x1xf32>
    %cst_152 = arith.constant 3.200000e+01 : f32
    %226 = vector.broadcast %cst_152 : f32 to vector<8x1xf32>
    %227 = arith.divf %225, %226 : vector<8x1xf32>
    %228 = vector.broadcast %227 : vector<8x1xf32> to vector<8x32xf32>
    %229 = arith.subf %219, %228 : vector<8x32xf32>
    %230 = arith.mulf %229, %229 : vector<8x32xf32>
    %cst_153 = arith.constant dense<0.000000e+00> : vector<8xf32>
    %231 = vector.multi_reduction <add>, %230, %cst_153 [1] : vector<8x32xf32> to vector<8xf32>
    %232 = vector.shape_cast %231 : vector<8xf32> to vector<8x1xf32>
    %cst_154 = arith.constant 3.200000e+01 : f32
    %233 = vector.broadcast %cst_154 : f32 to vector<8x1xf32>
    %234 = arith.divf %232, %233 : vector<8x1xf32>
    %235 = vector.broadcast %227 : vector<8x1xf32> to vector<8x32xf32>
    %236 = arith.subf %219, %235 : vector<8x32xf32>
    %cst_155 = arith.constant 9.99999974E-6 : f32
    %237 = vector.broadcast %cst_155 : f32 to vector<8x1xf32>
    %238 = arith.addf %234, %237 : vector<8x1xf32>
    %239 = math.rsqrt %238 : vector<8x1xf32>
    %240 = vector.broadcast %239 : vector<8x1xf32> to vector<8x32xf32>
    %241 = arith.mulf %236, %240 : vector<8x32xf32>
    %242 = vector.broadcast %221 : vector<1x32xf32> to vector<8x32xf32>
    %243 = arith.mulf %241, %242 : vector<8x32xf32>
    %244 = vector.broadcast %223 : vector<1x32xf32> to vector<8x32xf32>
    %245 = arith.addf %243, %244 : vector<8x32xf32>
    %c0_156 = arith.constant 0 : index
    %c0_157 = arith.constant 0 : index
    %c0_158 = arith.constant 0 : index
    %246 = vector.load %arg19[%c0_156, %c0_157, %c0_158] : memref<1x8x32xf32, #tpu.memory_space<vmem>>, vector<1x8x32xf32>
    %247 = vector.shape_cast %246 : vector<1x8x32xf32> to vector<8x32xf32>
    %248 = vector.shape_cast %245 : vector<8x32xf32> to vector<1x8x32xf32>
    tpu.vector_store %arg19[%c0_156, %c0_157, %c0_158], %248 {strides = array<i32>} : memref<1x8x32xf32, #tpu.memory_space<vmem>>, vector<1x8x32xf32>,
    return
  }
  func.func @transform_0(%arg0: i32) -> (i32, i32, i32) {
    %c0_i32 = arith.constant 0 : i32
    %c0_i32_0 = arith.constant 0 : i32
    %c0_i32_1 = arith.constant 0 : i32
    return %arg0, %c0_i32, %c0_i32_0 : i32, i32, i32
  }
  func.func @transform_1(%arg0: i32) -> (i32, i32) {
    %c0_i32 = arith.constant 0 : i32
    %c0_i32_0 = arith.constant 0 : i32
    %c0_i32_1 = arith.constant 0 : i32
    return %c0_i32, %c0_i32_0 : i32, i32
  }
  func.func @transform_2(%arg0: i32) -> (i32, i32, i32, i32) {
    %c0_i32 = arith.constant 0 : i32
    %c0_i32_0 = arith.constant 0 : i32
    %c0_i32_1 = arith.constant 0 : i32
    %c0_i32_2 = arith.constant 0 : i32
    %c0_i32_3 = arith.constant 0 : i32
    return %c0_i32, %c0_i32_0, %c0_i32_1, %c0_i32_2 : i32, i32, i32, i32
  }
  func.func @transform_3(%arg0: i32) -> (i32, i32, i32, i32) {
    %c0_i32 = arith.constant 0 : i32
    %c0_i32_0 = arith.constant 0 : i32
    %c0_i32_1 = arith.constant 0 : i32
    %c0_i32_2 = arith.constant 0 : i32
    %c0_i32_3 = arith.constant 0 : i32
    return %c0_i32, %c0_i32_0, %c0_i32_1, %c0_i32_2 : i32, i32, i32, i32
  }
  func.func @transform_4(%arg0: i32) -> (i32, i32, i32, i32) {
    %c0_i32 = arith.constant 0 : i32
    %c0_i32_0 = arith.constant 0 : i32
    %c0_i32_1 = arith.constant 0 : i32
    %c0_i32_2 = arith.constant 0 : i32
    %c0_i32_3 = arith.constant 0 : i32
    return %c0_i32, %c0_i32_0, %c0_i32_1, %c0_i32_2 : i32, i32, i32, i32
  }
  func.func @transform_5(%arg0: i32) -> (i32, i32, i32, i32) {
    %c0_i32 = arith.constant 0 : i32
    %c0_i32_0 = arith.constant 0 : i32
    %c0_i32_1 = arith.constant 0 : i32
    %c0_i32_2 = arith.constant 0 : i32
    %c0_i32_3 = arith.constant 0 : i32
    return %c0_i32, %c0_i32_0, %c0_i32_1, %c0_i32_2 : i32, i32, i32, i32
  }
  func.func @transform_6(%arg0: i32) -> (i32, i32, i32, i32) {
    %c0_i32 = arith.constant 0 : i32
    %c0_i32_0 = arith.constant 0 : i32
    %c0_i32_1 = arith.constant 0 : i32
    %c0_i32_2 = arith.constant 0 : i32
    %c0_i32_3 = arith.constant 0 : i32
    return %c0_i32, %c0_i32_0, %c0_i32_1, %c0_i32_2 : i32, i32, i32, i32
  }
  func.func @transform_7(%arg0: i32) -> (i32, i32, i32, i32) {
    %c0_i32 = arith.constant 0 : i32
    %c0_i32_0 = arith.constant 0 : i32
    %c0_i32_1 = arith.constant 0 : i32
    %c0_i32_2 = arith.constant 0 : i32
    %c0_i32_3 = arith.constant 0 : i32
    return %c0_i32, %c0_i32_0, %c0_i32_1, %c0_i32_2 : i32, i32, i32, i32
  }
  func.func @transform_8(%arg0: i32) -> (i32, i32, i32, i32) {
    %c0_i32 = arith.constant 0 : i32
    %c0_i32_0 = arith.constant 0 : i32
    %c0_i32_1 = arith.constant 0 : i32
    %c0_i32_2 = arith.constant 0 : i32
    %c0_i32_3 = arith.constant 0 : i32
    return %c0_i32, %c0_i32_0, %c0_i32_1, %c0_i32_2 : i32, i32, i32, i32
  }
  func.func @transform_9(%arg0: i32) -> (i32, i32, i32) {
    %c0_i32 = arith.constant 0 : i32
    %c0_i32_0 = arith.constant 0 : i32
    %c0_i32_1 = arith.constant 0 : i32
    %c0_i32_2 = arith.constant 0 : i32
    return %c0_i32, %c0_i32_0, %c0_i32_1 : i32, i32, i32
  }
  func.func @transform_10(%arg0: i32) -> (i32, i32, i32) {
    %c0_i32 = arith.constant 0 : i32
    %c0_i32_0 = arith.constant 0 : i32
    %c0_i32_1 = arith.constant 0 : i32
    %c0_i32_2 = arith.constant 0 : i32
    return %c0_i32, %c0_i32_0, %c0_i32_1 : i32, i32, i32
  }
  func.func @transform_11(%arg0: i32) -> (i32, i32, i32) {
    %c0_i32 = arith.constant 0 : i32
    %c0_i32_0 = arith.constant 0 : i32
    %c0_i32_1 = arith.constant 0 : i32
    %c0_i32_2 = arith.constant 0 : i32
    return %c0_i32, %c0_i32_0, %c0_i32_1 : i32, i32, i32
  }
  func.func @transform_12(%arg0: i32) -> (i32, i32, i32) {
    %c0_i32 = arith.constant 0 : i32
    %c0_i32_0 = arith.constant 0 : i32
    %c0_i32_1 = arith.constant 0 : i32
    %c0_i32_2 = arith.constant 0 : i32
    return %c0_i32, %c0_i32_0, %c0_i32_1 : i32, i32, i32
  }
  func.func @transform_13(%arg0: i32) -> (i32, i32, i32) {
    %c0_i32 = arith.constant 0 : i32
    %c0_i32_0 = arith.constant 0 : i32
    %c0_i32_1 = arith.constant 0 : i32
    %c0_i32_2 = arith.constant 0 : i32
    return %c0_i32, %c0_i32_0, %c0_i32_1 : i32, i32, i32
  }
  func.func @transform_14(%arg0: i32) -> (i32, i32, i32) {
    %c0_i32 = arith.constant 0 : i32
    %c0_i32_0 = arith.constant 0 : i32
    %c0_i32_1 = arith.constant 0 : i32
    %c0_i32_2 = arith.constant 0 : i32
    return %c0_i32, %c0_i32_0, %c0_i32_1 : i32, i32, i32
  }
  func.func @transform_15(%arg0: i32) -> (i32, i32, i32) {
    %c0_i32 = arith.constant 0 : i32
    %c0_i32_0 = arith.constant 0 : i32
    %c0_i32_1 = arith.constant 0 : i32
    %c0_i32_2 = arith.constant 0 : i32
    return %c0_i32, %c0_i32_0, %c0_i32_1 : i32, i32, i32
  }
  func.func @transform_16(%arg0: i32) -> (i32, i32, i32) {
    %c0_i32 = arith.constant 0 : i32
    %c0_i32_0 = arith.constant 0 : i32
    %c0_i32_1 = arith.constant 0 : i32
    %c0_i32_2 = arith.constant 0 : i32
    return %c0_i32, %c0_i32_0, %c0_i32_1 : i32, i32, i32
  }
  func.func @transform_17(%arg0: i32) -> (i32, i32, i32) {
    %c0_i32 = arith.constant 0 : i32
    %c0_i32_0 = arith.constant 0 : i32
    %c0_i32_1 = arith.constant 0 : i32
    %c0_i32_2 = arith.constant 0 : i32
    return %c0_i32, %c0_i32_0, %c0_i32_1 : i32, i32, i32
  }
  func.func @transform_18(%arg0: i32) -> (i32, i32, i32) {
    %c0_i32 = arith.constant 0 : i32
    %c0_i32_0 = arith.constant 0 : i32
    %c0_i32_1 = arith.constant 0 : i32
    return %arg0, %c0_i32, %c0_i32_0 : i32, i32, i32
  }
}

</mosaic_0001>

<bundles_post_ra>
// kernel: tpu_custom_call.1
= control target key start
LH: loop header
LB: loop body
LE: loop exit
PB: predicated region body
PF: predicated region fallthrough
CT: control target
= control target key end

     0   :  { %s9834_s0 = inlined_call_operand.vmem [shape: f32[2,8,32], index: 0, kind: input, shape index: {}]   ;;  %s9835_s1 = inlined_call_operand.vmem [shape: f32[8,32], index: 1, kind: input, shape index: {}]   ;;  %s9836_s2 = inlined_call_operand.vmem [shape: bf16[2,8,32,4], index: 2, kind: input, shape index: {}]   ;;  %s9837_s3 = inlined_call_operand.vmem [shape: f32[2,8,1,4], index: 3, kind: input, shape index: {}]   ;;  %s9838_s4 = inlined_call_operand.vmem [shape: bf16[2,8,32,4], index: 4, kind: input, shape index: {}]   ;;  %s9839_s5 = inlined_call_operand.vmem [shape: f32[2,8,1,4], index: 5, kind: input, shape index: {}]   ;;  %s9840_s6 = inlined_call_operand.vmem [shape: bf16[2,8,32,4], index: 6, kind: input, shape index: {}]   ;;  %s9841_s7 = inlined_call_operand.vmem [shape: f32[2,8,1,4], index: 7, kind: input, shape index: {}]   ;;  %s9842_s8 = inlined_call_operand.vmem [shape: bf16[2,8,4,32], index: 8, kind: input, shape index: {}]   ;;  %s9843_s9 = inlined_call_operand.vmem [shape: f32[2,1,32], index: 9, kind: input, shape index: {}]   ;;  %s9844_s10 = inlined_call_operand.vmem [shape: bf16[2,32,64], index: 10, kind: input, shape index: {}]   ;;  %s9845_s11 = inlined_call_operand.vmem [shape: f32[2,1,64], index: 11, kind: input, shape index: {}]   ;;  %s9846_s12 = inlined_call_operand.vmem [shape: bf16[2,64,32], index: 12, kind: input, shape index: {}]   ;;  %s9847_s13 = inlined_call_operand.vmem [shape: f32[2,1,32], index: 13, kind: input, shape index: {}]   ;;  %s9848_s14 = inlined_call_operand.vmem [shape: f32[2,1,32], index: 14, kind: input, shape index: {}]   ;;  %s9849_s15 = inlined_call_operand.vmem [shape: f32[2,1,32], index: 15, kind: input, shape index: {}]   ;;  %s9850_s16 = inlined_call_operand.vmem [shape: f32[2,1,32], index: 16, kind: input, shape index: {}]   ;;  %s9851_s17 = inlined_call_operand.vmem [shape: f32[2,1,32], index: 17, kind: input, shape index: {}]   ;;  %s9852_s18 = inlined_call_operand.hbm [shape: f32[2,8,32], index: 18, kind: output, shape index: {}]  }
   0x1   :  { %9860 = sst [smem:[#allocation11_spill]] %s9834_s0 }
   0x2   :  { %9861 = sst [smem:[#allocation12_spill]] %s9835_s1 }
   0x3   :  { %9862 = sst [smem:[#allocation13_spill]] %s9836_s2 }
   0x4   :  { %9863 = sst [smem:[#allocation14_spill]] %s9837_s3 }
   0x5   :  { %23 = vsyncpa [#allocation3], 0 }
   0x6   :  { %25 = vsyncpa [#allocation3 + $0x1], 0  ;;  %s8430_s27 = smov 0   ;;  %s8432_s28 = smov 0  }
   0x7   :  { %s8434_s29 = smov 0   ;;  %s8436_s30 = smov 0  }
   0x8 LB: > { %9864 = sst [smem:[#allocation5_spill]] %s8318_s27  ;;  %s8451_s0 = sadd.s32 4294967295, %s8330_s30   ;;  %s8330_s30 = sphi %s8436_s30, %s9879_s30   ;;  %s8326_s29 = sphi %s8434_s29, %s9881_s29   ;;  %s8322_s28 = sphi %s8432_s28, %s9883_s28   ;;  %s8318_s27 = sphi %s8430_s27, %s9882_s27  }
   0x9   : > { %9865 = sst [smem:[#allocation6_spill]] %s8326_s29  ;;  %s6652_s19 = sadd.s32 4294967294, %s8330_s30  }
   0xa   : > { %9866 = sst [smem:[#allocation7_spill]] %s8330_s30  ;;  %s8455_s1 = sadd.s32 1, %s8330_s30  }
   0xb   : > { %9867 = sst [smem:[#allocation8_spill]] %s8455_s1  ;;  %s421_s20 = sadd.s32 1, %s8326_s29 }
   0xc   : > { %s418_s21 = ssub.s32 %s8330_s30, %s8455_s1  ;;  %p431_p0 = scmp.ne.s32.totalorder %s8326_s29, %s8322_s28 }
   0xd   : > { %p419_p1 = scmp.eq.s32.totalorder %s418_s21, 0  ;;  %p432_p2 = scmp.eq.s32.totalorder %s8451_s0, 1 }
   0xe   : > { %p437_p3 = scmp.ne.s32.totalorder %s8322_s28, %s8318_s27  ;;  %p438_p4 = scmp.eq.s32.totalorder %s6652_s19, 1 }
   0xf   : > { %s8466_s22 = scalar_select %p419_p1, %s8326_s29, %s421_s20  }
  0x10   : > { %p8468_p5 = por %p432_p2, %p431_p0  ;;  %p8472_p6 = por %p438_p4, %p437_p3 }
  0x11   : > { %9868 = sst [smem:[#allocation9_spill]] %s8466_s22  ;;  %p6655_p7 = scmp.ge.s32.totalorder %s8330_s30, 1 }
  0x12   : > { %s9870_s23 = scalar_select %p8472_p6, 1, 0 }
  0x13   : > { %p514_p8 = scmp.lt.s32.totalorder %s8330_s30, 3 }
  0x14   : > { %9871 = sst [smem:[#allocation10_spill]] %s9870_s23 }
  0x15   : > { %p515_p9 = pnand %p6655_p7, %p514_p8 }
  0x16   : > { %s9872_s26 = sld [smem:[#allocation13_spill]] (!%p515_p9)  ;;  %v8332_v1 = vmov (!%p515_p9), 0.0   ;;  %vm8333_vm0 = vmmov (!%p515_p9), 0   ;;  %p567_p10 = scmp.lt.s32.totalorder (!%p515_p9), %s8451_s0, 1  ;;  %vm676_vm1 = vcmask (!%p515_p9), 261120   ;;  %v8101_v18 = vld [vmem:[%s9838_s4] sm:$0xff] (!%p515_p9)  }
  0x17   : > { %518 = sbr.rel (%p515_p9) target bundleno = 4678 (0x1246), region = 92  ;;  %7335 = vmatprep.subr.bf16.mxu1 (!%p515_p9), %v8332_v1  ;;  %7351 = vmatprep.subr.bf16.mxu0 (!%p515_p9), %v8332_v1  ;;  %s9873_s29 = sld [smem:[#allocation12_spill]] (!%p515_p9)  ;;  %v8103_v20 = vld [vmem:[%s9838_s4 + $0x8] sm:$0xff] (!%p515_p9)   ;;  %v8105_v22 = vld [vmem:[%s9838_s4 + $0x20] sm:$0xff] (!%p515_p9)   ;;  %v8108_v25 = vld [vmem:[%s9838_s4 + $0x10] sm:$0xff] (!%p515_p9)   ;;  %vm2108_vm2 = vcmask (!%p515_p9), 31744  }
  0x18   : > { %7339 = vmatprep.mubr.msk.bf16.mxu1 (!%p515_p9), %vm8333_vm0, %v8332_v1  ;;  %7355 = vmatprep.mubr.msk.bf16.mxu0 (!%p515_p9), %vm8333_vm0, %v8332_v1  ;;  %s9874_s27 = sld [smem:[#allocation11_spill]] (!%p515_p9)  ;;  %v8107_v24 = vld [vmem:[%s9838_s4 + $0x28] sm:$0xff] (!%p515_p9)   ;;  %v8109_v26 = vld [vmem:[%s9838_s4 + $0x40] sm:$0xff] (!%p515_p9)   ;;  %v8110_v27 = vld [vmem:[%s9838_s4 + $0x18] sm:$0xff] (!%p515_p9)   ;;  %s9875_s3 = sld [smem:[#allocation14_spill]] (!%p515_p9)  ;;  %vm2585_vm3 = vcmask (!%p515_p9), 1043456  }
  0x19   : > { %v8111_v28 = vld [vmem:[%s9838_s4 + $0x48] sm:$0xff] (!%p515_p9)   ;;  %v8112_v29 = vld [vmem:[%s9838_s4 + $0x30] sm:$0xff] (!%p515_p9)   ;;  %v8113_v30 = vld [vmem:[%s9838_s4 + $0x60] sm:$0xff] (!%p515_p9)   ;;  %vm2477_vm4 = vcmask (!%p515_p9), 64512   ;;  %vm2970_vm5 = vcmask (!%p515_p9), 1041408   ;;  %vm3498_vm6 = vcmask (!%p515_p9), 523264  }
  0x1a   : > { %v8114_v31 = vld [vmem:[%s9838_s4 + $0x38] sm:$0xff] (!%p515_p9)   ;;  %v8115_v32 = vld [vmem:[%s9838_s4 + $0x68] sm:$0xff] (!%p515_p9)   ;;  %v8116_v33 = vld [vmem:[%s9838_s4 + $0x50] sm:$0xff] (!%p515_p9)   ;;  %s564_s23 = sand.u32 (!%p515_p9), 1, %s8322_s28   ;;  %s7076_s20 = sshll.u32 (!%p515_p9), %s8451_s0, 7 }
  0x1b   : > { %v8120_v34 = vld [vmem:[%s9840_s6] sm:$0xff] (!%p515_p9)   ;;  %v8117_v35 = vld [vmem:[%s9838_s4 + $0x58] sm:$0xff] (!%p515_p9)   ;;  %v8121_v36 = vld [vmem:[%s9840_s6 + $0x8] sm:$0xff] (!%p515_p9)   ;;  %s6580_s21 = scalar_lea.sflag (!%p515_p9), [#allocation3], %s564_s23 }
  0x1c   : > { %v8088_v0 = vld [vmem:[%s9872_s26] sm:$0xff] (!%p515_p9)   ;;  %v8090_v3 = vld [vmem:[%s9872_s26 + $0x8] sm:$0xff] (!%p515_p9)   ;;  %v8092_v8 = vld [vmem:[%s9872_s26 + $0x10] sm:$0xff] (!%p515_p9)  }
  0x1d   : > { %v8089_v2 = vld [vmem:[%s9872_s26 + $0x20] sm:$0xff] (!%p515_p9)   ;;  %7336 = vmatpush3.bf16.msra.mxu1 (!%p515_p9), %v8088_v0  ;;  %v8091_v4 = vld [vmem:[%s9872_s26 + $0x28] sm:$0xff] (!%p515_p9)   ;;  %v8094_v11 = vld [vmem:[%s9872_s26 + $0x18] sm:$0xff] (!%p515_p9)  }
  0x1e   : > { %7352 = vmatpush3.bf16.msra.mxu0 %v8089_v2  ;;  %7337 = vmatprep.subr.bf16.mxu1 %v8332_v1  ;;  %s568_s19 = scalar_select %p567_p10, %s8451_s0, 1  ;;  %v573_v5 = vld [vmem:[%s9873_s29] sm:$0xff]  ;;  %v8095_v12 = vld [vmem:[%s9872_s26 + $0x48] sm:$0xff]   ;;  %v8096_v13 = vld [vmem:[%s9872_s26 + $0x30] sm:$0xff]  }
  0x1f   : > { %7353 = vmatprep.subr.bf16.mxu0 %v8332_v1  ;;  %v8093_v9 = vld [vmem:[%s9872_s26 + $0x40] sm:$0xff]   ;;  %v8098_v15 = vld [vmem:[%s9872_s26 + $0x38] sm:$0xff]   ;;  %v8099_v16 = vld [vmem:[%s9872_s26 + $0x68] sm:$0xff]   ;;  %s8334_s0 = smov [#allocation2]  }
  0x20   : > { %s6657_s22 = sshll.u32 %s568_s19, 3  ;;  %v8097_v14 = vld [vmem:[%s9872_s26 + $0x60] sm:$0xff]   ;;  %v8100_v17 = vld [vmem:[%s9872_s26 + $0x50] sm:$0xff]   ;;  %v8102_v19 = vld [vmem:[%s9872_s26 + $0x58] sm:$0xff]  }
  0x21   : > { %7338 = vmatpush3.bf16.msra.mxu1 %v8090_v3  ;;  %s570_s30 = scalar_lea.vmem %s9874_s27, %s6657_s22  ;;  %v8104_v21 = vld [vmem:[%s9872_s26 + $0x70] sm:$0xff]   ;;  %v8106_v23 = vld [vmem:[%s9872_s26 + $0x78] sm:$0xff]   ;;  %v8122_v39 = vld [vmem:[%s9840_s6 + $0x20] sm:$0xff]   ;;  %s6656_s22 = sshll.u32 %s564_s23, 3 }
  0x22   : > { %7354 = vmatpush3.bf16.msra.mxu0 %v8091_v4  ;;  %7343 = vmatprep.subr.bf16.mxu1 %v8332_v1  ;;  %v572_v6 = vld [vmem:[%s570_s30] sm:$0xff]  ;;  %v8118_v37 = vld [vmem:[%s9838_s4 + $0x70] sm:$0xff]   ;;  %v8119_v38 = vld [vmem:[%s9838_s4 + $0x78] sm:$0xff]   ;;  %s566_s27 = scalar_lea.vmem [#allocation2], %s6656_s22  ;;  %s8272_s22 = sshll.u32 %s8334_s0, 4  ;;  %s8273_s22 = int_to_ptr.vmem [resolvable:$false] %s8272_s22 }
  0x23   : > { %7367 = vmatprep.subr.bf16.mxu0 %v8332_v1  ;;  %v8508_v7 = vadd.f32 %v573_v5, %v572_v6  ;;  %v8123_v40 = vld [vmem:[%s9840_s6 + $0x28] sm:$0xff]   ;;  %v8124_v41 = vld [vmem:[%s9840_s6 + $0x10] sm:$0xff]   ;;  %v8125_v42 = vld [vmem:[%s9840_s6 + $0x40] sm:$0xff]   ;;  %s6593_s29 = sshll.u32 %s566_s27, 4  ;;  %s8274_s25 = scalar_lea.vmem %s8273_s22, 256  ;;  %s9793_s29 = int_to_ptr.vmem [resolvable:$true] %s6593_s29 }
  0x24   : > { %v8126_v43 = vld [vmem:[%s9840_s6 + $0x18] sm:$0xff]   ;;  %v8127_v44 = vld [vmem:[%s9840_s6 + $0x48] sm:$0xff]   ;;  %v8128_v45 = vld [vmem:[%s9840_s6 + $0x30] sm:$0xff]   ;;  %s8268_s24 = scalar_lea.vmem %s9793_s29, 128  ;;  %p8275_p0 = scmp.lt.s32.totalorder %s9793_s29, %s8273_s22 }
  0x25   : > { %v8518_v10 = vpack.c.bf16 %v8508_v7, %v8508_v7  ;;  %v8129_v46 = vld [vmem:[%s9840_s6 + $0x60] sm:$0xff]   ;;  %v8130_v47 = vld [vmem:[%s9840_s6 + $0x38] sm:$0xff]   ;;  %v8131_v48 = vld [vmem:[%s9840_s6 + $0x68] sm:$0xff]   ;;  %p8269_p11 = scmp.ne.s32.totalorder %s9793_s29, %s8268_s24  ;;  %p8276_p1 = scmp.lt.s32.totalorder %s8274_s25, %s8268_s24 }
  0x26   : > { %v8132_v49 = vld [vmem:[%s9840_s6 + $0x50] sm:$0xff]   ;;  %v8133_v50 = vld [vmem:[%s9840_s6 + $0x58] sm:$0xff]  }
  0x27   : > { %7340 = vmatmul.mubr.msk.bf16.vlgmr.msra.gmra.mrb[0].mxu1 %vm676_vm1, %v8518_v10  ;;  %7356 = vmatmul.mubr.msk.bf16.vlgmr.msra.gmra.mrb[0].mxu0 %vm676_vm1, %v8518_v10  ;;  %v8134_v51 = vld [vmem:[%s9840_s6 + $0x70] sm:$0xff]   ;;  %v8135_v52 = vld [vmem:[%s9840_s6 + $0x78] sm:$0xff]   ;;  %p8270_p12 = pnand %p8269_p11, %p8468_p5  ;;  %p8277_p2 = por %p8276_p1, %p8275_p0 }
  0x28   : > { %7344 = vmatpush3.bf16.msra.mxu1 %v8092_v8  ;;  %7368 = vmatpush3.bf16.msra.mxu0 %v8093_v9 }
  0x29   : > { %7345 = vmatprep.subr.bf16.mxu1 %v8332_v1  ;;  %7369 = vmatprep.subr.bf16.mxu0 %v8332_v1  ;;  %p8271_p13 = pneg %p8270_p12 }
  0x2a   : > { %7347 = vmatprep.mubr.msk.bf16.mxu1 %vm8333_vm0, %v8332_v1  ;;  %7371 = vmatprep.mubr.msk.bf16.mxu0 %vm8333_vm0, %v8332_v1 }
  0x2b   : > { %p8278_p3 = pnand %p8277_p2, %p8271_p13 }
  0x2c   : > { %7346 = vmatpush3.bf16.msra.mxu1 %v8094_v11  ;;  %7370 = vmatpush3.bf16.msra.mxu0 %v8095_v12 }
  0x2d   : > { %7359 = vmatprep.subr.bf16.mxu1 %v8332_v1  ;;  %7383 = vmatprep.subr.bf16.mxu0 %v8332_v1 }
  0x2f   : > { %7348 = vmatmul.mubr.msk.bf16.vlgmr.msra.gmra.mrb[4].mxu1 %vm676_vm1, %v8518_v10  ;;  %7372 = vmatmul.mubr.msk.bf16.vlgmr.msra.gmra.mrb[4].mxu0 %vm676_vm1, %v8518_v10 }
  0x30   : > { %7360 = vmatpush3.bf16.msra.mxu1 %v8096_v13  ;;  %7384 = vmatpush3.bf16.msra.mxu0 %v8097_v14 }
  0x31   : > { %7361 = vmatprep.subr.bf16.mxu1 %v8332_v1  ;;  %7385 = vmatprep.subr.bf16.mxu0 %v8332_v1 }
  0x32   : > { %7363 = vmatprep.mubr.msk.bf16.mxu1 %vm8333_vm0, %v8332_v1  ;;  %7387 = vmatprep.mubr.msk.bf16.mxu0 %vm8333_vm0, %v8332_v1 }
  0x34   : > { %7362 = vmatpush3.bf16.msra.mxu1 %v8098_v15  ;;  %7386 = vmatpush3.bf16.msra.mxu0 %v8099_v16  ;;  %v6690_v15 = vld [vmem:[%s9839_s5] ss:$0 sm:$0xff] }
  0x35   : > { %7375 = vmatprep.subr.bf16.mxu1 %v8332_v1  ;;  %7399 = vmatprep.subr.bf16.mxu0 %v8332_v1 }
  0x37   : > { %7364 = vmatmul.mubr.msk.bf16.vlgmr.msra.gmra.mrb[8].mxu1 %vm676_vm1, %v8518_v10  ;;  %7388 = vmatmul.mubr.msk.bf16.vlgmr.msra.gmra.mrb[8].mxu0 %vm676_vm1, %v8518_v10 }
  0x38   : > { %7376 = vmatpush3.bf16.msra.mxu1 %v8100_v17  ;;  %7400 = vmatpush3.bf16.msra.mxu0 %v8101_v18 }
  0x39   : > { %7377 = vmatprep.subr.bf16.mxu1 %v8332_v1  ;;  %7401 = vmatprep.subr.bf16.mxu0 %v8332_v1 }
  0x3a   : > { %7379 = vmatprep.mubr.msk.bf16.mxu1 %vm8333_vm0, %v8332_v1  ;;  %7403 = vmatprep.mubr.msk.bf16.mxu0 %vm8333_vm0, %v8332_v1 }
  0x3c   : > { %7378 = vmatpush3.bf16.msra.mxu1 %v8102_v19  ;;  %7402 = vmatpush3.bf16.msra.mxu0 %v8103_v20 }
  0x3d   : > { %7391 = vmatprep.subr.bf16.mxu1 %v8332_v1  ;;  %7415 = vmatprep.subr.bf16.mxu0 %v8332_v1 }
  0x3f   : > { %7380 = vmatmul.mubr.msk.bf16.vlgmr.msra.gmra.mrb[12].mxu1 %vm676_vm1, %v8518_v10  ;;  %7404 = vmatmul.mubr.msk.bf16.vlgmr.msra.gmra.mrb[12].mxu0 %vm676_vm1, %v8518_v10 }
  0x40   : > { %7392 = vmatpush3.bf16.msra.mxu1 %v8104_v21  ;;  %7416 = vmatpush3.bf16.msra.mxu0 %v8105_v22 }
  0x41   : > { %7393 = vmatprep.subr.bf16.mxu1 %v8332_v1  ;;  %7417 = vmatprep.subr.bf16.mxu0 %v8332_v1 }
  0x42   : > { %7395 = vmatprep.mubr.msk.bf16.mxu1 %vm8333_vm0, %v8332_v1  ;;  %7419 = vmatprep.mubr.msk.bf16.mxu0 %vm8333_vm0, %v8332_v1 }
  0x44   : > { %7394 = vmatpush3.bf16.msra.mxu1 %v8106_v23  ;;  %7418 = vmatpush3.bf16.msra.mxu0 %v8107_v24 }
  0x45   : > { %7407 = vmatprep.subr.bf16.mxu1 %v8332_v1  ;;  %7431 = vmatprep.subr.bf16.mxu0 %v8332_v1 }
  0x47   : > { %7396 = vmatmul.mubr.msk.bf16.vlgmr.msra.gmra.mrb[16].mxu1 %vm676_vm1, %v8518_v10  ;;  %7420 = vmatmul.mubr.msk.bf16.vlgmr.msra.gmra.mrb[16].mxu0 %vm676_vm1, %v8518_v10 }
  0x48   : > { %7408 = vmatpush3.bf16.msra.mxu1 %v8108_v25  ;;  %7432 = vmatpush3.bf16.msra.mxu0 %v8109_v26  ;;  %v6658_v26 = vld [vmem:[%s9875_s3] ss:$0 sm:$0xff] }
  0x49   : > { %7409 = vmatprep.subr.bf16.mxu1 %v8332_v1  ;;  %7433 = vmatprep.subr.bf16.mxu0 %v8332_v1 }
  0x4a   : > { %7411 = vmatprep.mubr.msk.bf16.mxu1 %vm8333_vm0, %v8332_v1  ;;  %7435 = vmatprep.mubr.msk.bf16.mxu0 %vm8333_vm0, %v8332_v1 }
  0x4c   : > { %7410 = vmatpush3.bf16.msra.mxu1 %v8110_v27  ;;  %7434 = vmatpush3.bf16.msra.mxu0 %v8111_v28  ;;  %v6692_v28 = vld [vmem:[%s9839_s5 + $0x2] ss:$0 sm:$0xff] }
  0x4d   : > { %7423 = vmatprep.subr.bf16.mxu1 %v8332_v1  ;;  %7447 = vmatprep.subr.bf16.mxu0 %v8332_v1 }
  0x4f   : > { %7412 = vmatmul.mubr.msk.bf16.vlgmr.msra.gmra.mrb[20].mxu1 %vm676_vm1, %v8518_v10  ;;  %7436 = vmatmul.mubr.msk.bf16.vlgmr.msra.gmra.mrb[20].mxu0 %vm676_vm1, %v8518_v10 }
  0x50   : > { %7424 = vmatpush3.bf16.msra.mxu1 %v8112_v29  ;;  %7448 = vmatpush3.bf16.msra.mxu0 %v8113_v30 }
  0x51   : > { %7425 = vmatprep.subr.bf16.mxu1 %v8332_v1  ;;  %7449 = vmatprep.subr.bf16.mxu0 %v8332_v1 }
  0x52   : > { %7427 = vmatprep.mubr.msk.bf16.mxu1 %vm8333_vm0, %v8332_v1  ;;  %7451 = vmatprep.mubr.msk.bf16.mxu0 %vm8333_vm0, %v8332_v1 }
  0x54   : > { %7426 = vmatpush3.bf16.msra.mxu1 %v8114_v31  ;;  %7450 = vmatpush3.bf16.msra.mxu0 %v8115_v32 }
  0x55   : > { %7439 = vmatprep.subr.bf16.mxu1 %v8332_v1  ;;  %7463 = vmatprep.subr.bf16.mxu0 %v8332_v1 }
  0x57   : > { %7428 = vmatmul.mubr.msk.bf16.vlgmr.msra.gmra.mrb[24].mxu1 %vm676_vm1, %v8518_v10  ;;  %7452 = vmatmul.mubr.msk.bf16.vlgmr.msra.gmra.mrb[24].mxu0 %vm676_vm1, %v8518_v10 }
  0x58   : > { %7440 = vmatpush3.bf16.msra.mxu1 %v8116_v33  ;;  %7443 = vmatprep.mubr.msk.bf16.mxu1 %vm8333_vm0, %v8332_v1 }
  0x59   : > { %7441 = vmatprep.subr.bf16.mxu1 %v8332_v1  ;;  %7464 = vmatpush3.bf16.msra.mxu0 %v8120_v34 }
  0x5a   : > { %7465 = vmatprep.subr.bf16.mxu0 %v8332_v1  ;;  %7467 = vmatprep.mubr.msk.bf16.mxu0 %vm8333_vm0, %v8332_v1 }
  0x5c   : > { %7442 = vmatpush3.bf16.msra.mxu1 %v8117_v35 }
  0x5d   : > { %7455 = vmatprep.subr.bf16.mxu1 %v8332_v1  ;;  %7466 = vmatpush3.bf16.msra.mxu0 %v8121_v36 }
  0x5e   : > { %7479 = vmatprep.subr.bf16.mxu0 %v8332_v1 }
  0x5f   : > { %7444 = vmatmul.mubr.msk.bf16.vlgmr.msra.gmra.mrb[28].mxu1 %vm676_vm1, %v8518_v10 }
  0x60   : > { %7456 = vmatpush3.bf16.msra.mxu1 %v8118_v37  ;;  %7459 = vmatprep.mubr.msk.bf16.mxu1 %vm8333_vm0, %v8332_v1 }
  0x61   : > { %7457 = vmatprep.subr.bf16.mxu1 %v8332_v1  ;;  %7468 = vmatmul.mubr.msk.bf16.vlgmr.msra.gmra.mrb[28].mxu0 %vm676_vm1, %v8518_v10 }
  0x62   : > { %7483 = vmatprep.mubr.msk.bf16.mxu0 %vm8333_vm0, %v8332_v1  ;;  %7480 = vmatpush3.bf16.msra.mxu0 %v8122_v39 }
  0x63   : > { %7481 = vmatprep.subr.bf16.mxu0 %v8332_v1 }
  0x64   : > { %7458 = vmatpush3.bf16.msra.mxu1 %v8119_v38 }
  0x65   : > { %7471 = vmatprep.subr.bf16.mxu1 %v8332_v1 }
  0x66   : > { %7482 = vmatpush3.bf16.msra.mxu0 %v8123_v40 }
  0x67   : > { %7460 = vmatmul.mubr.msk.bf16.vlgmr.msra.gmra.mrb[32].mxu1 %vm676_vm1, %v8518_v10  ;;  %7495 = vmatprep.subr.bf16.mxu0 %v8332_v1 }
  0x68   : > { %7475 = vmatprep.mubr.msk.bf16.mxu1 %vm8333_vm0, %v8332_v1  ;;  %7472 = vmatpush3.bf16.msra.mxu1 %v8124_v41  ;;  %v6660_v41 = vld [vmem:[%s9875_s3 + $0x2] ss:$0 sm:$0xff] }
  0x69   : > { %7473 = vmatprep.subr.bf16.mxu1 %v8332_v1  ;;  %7484 = vmatmul.mubr.msk.bf16.vlgmr.msra.gmra.mrb[32].mxu0 %vm676_vm1, %v8518_v10 }
  0x6a   : > { %7496 = vmatpush3.bf16.msra.mxu0 %v8125_v42  ;;  %7499 = vmatprep.mubr.msk.bf16.mxu0 %vm8333_vm0, %v8332_v1 }
  0x6b   : > { %7497 = vmatprep.subr.bf16.mxu0 %v8332_v1 }
  0x6c   : > { %7474 = vmatpush3.bf16.msra.mxu1 %v8126_v43  ;;  %v6691_v43 = vld [vmem:[%s9839_s5 + $0x1] ss:$0 sm:$0xff] }
  0x6d   : > { %7487 = vmatprep.subr.bf16.mxu1 %v8332_v1 }
  0x6e   : > { %7498 = vmatpush3.bf16.msra.mxu0 %v8127_v44  ;;  %v6694_v44 = vld [vmem:[%s9839_s5 + $0x4] ss:$0 sm:$0xff] }
  0x6f   : > { %7476 = vmatmul.mubr.msk.bf16.vlgmr.msra.gmra.mrb[36].mxu1 %vm676_vm1, %v8518_v10  ;;  %7511 = vmatprep.subr.bf16.mxu0 %v8332_v1 }
  0x70   : > { %7488 = vmatpush3.bf16.msra.mxu1 %v8128_v45  ;;  %7491 = vmatprep.mubr.msk.bf16.mxu1 %vm8333_vm0, %v8332_v1 }
  0x71   : > { %7500 = vmatmul.mubr.msk.bf16.vlgmr.msra.gmra.mrb[36].mxu0 %vm676_vm1, %v8518_v10  ;;  %7489 = vmatprep.subr.bf16.mxu1 %v8332_v1 }
  0x72   : > { %7512 = vmatpush3.bf16.msra.mxu0 %v8129_v46  ;;  %7515 = vmatprep.mubr.msk.bf16.mxu0 %vm8333_vm0, %v8332_v1 }
  0x73   : > { %7513 = vmatprep.subr.bf16.mxu0 %v8332_v1 }
  0x74   : > { %7490 = vmatpush3.bf16.msra.mxu1 %v8130_v47 }
  0x75   : > { %7503 = vmatprep.subr.bf16.mxu1 %v8332_v1 }
  0x76   : > { %7514 = vmatpush3.bf16.msra.mxu0 %v8131_v48 }
  0x77   : > { %7492 = vmatmul.mubr.msk.bf16.vlgmr.msra.gmra.mrb[40].mxu1 %vm676_vm1, %v8518_v10  ;;  %7527 = vmatprep.subr.bf16.mxu0 %v8332_v1 }
  0x78   : > { %7504 = vmatpush3.bf16.msra.mxu1 %v8132_v49  ;;  %7507 = vmatprep.mubr.msk.bf16.mxu1 %vm8333_vm0, %v8332_v1 }
  0x79   : > { %7505 = vmatprep.subr.bf16.mxu1 %v8332_v1  ;;  %7516 = vmatmul.mubr.msk.bf16.vlgmr.msra.gmra.mrb[40].mxu0 %vm676_vm1, %v8518_v10 }
  0x7a   : > { %7529 = vmatprep.mubr.msk.bf16.mxu0 %vm8333_vm0, %v8332_v1 }
  0x7c   : > { %7506 = vmatpush3.bf16.msra.mxu1 %v8133_v50 }
  0x7d   : > { %7519 = vmatprep.subr.bf16.mxu1 %v8332_v1 }
  0x7f   : > { %7508 = vmatmul.mubr.msk.bf16.vlgmr.msra.gmra.mrb[44].mxu1 %vm676_vm1, %v8518_v10 }
  0x80   : > { %7523 = vmatprep.mubr.msk.bf16.mxu1 %vm8333_vm0, %v8332_v1  ;;  %7520 = vmatpush3.bf16.msra.mxu1 %v8134_v51 }
  0x81   : > { %7521 = vmatprep.subr.bf16.mxu1 %v8332_v1 }
  0x84   : > { %7522 = vmatpush3.bf16.msra.mxu1 %v8135_v52 }
  0x85   : > { %7533 = vmatprep.subr.bf16.mxu1 %v8332_v1 }
  0x87   : > { %7524 = vmatmul.mubr.msk.bf16.vlgmr.msra.gmra.mrb[48].mxu1 %vm676_vm1, %v8518_v10 }
  0x88   : > { %7535 = vmatprep.mubr.msk.bf16.mxu1 %vm8333_vm0, %v8332_v1 }
  0xfa   : > { %v714_v53 = vpop.f32.mrb[0].mxu1  ;;  %v818_v54 = vpop.f32.mrb[0].mxu0 }
  0xfb   : > { %v7341_v55 = vpop.f32.mrb[1].mxu1  ;;  %v7357_v56 = vpop.f32.mrb[1].mxu0  ;;  %v715_v29 = vadd.f32 %v6658_v26, %v714_v53  ;;  %v819_v45 = vadd.f32 %v6660_v41, %v818_v54  ;;  %v6662_v54 = vld [vmem:[%s9875_s3 + $0x4] ss:$0 sm:$0xff]  ;;  %v6695_v26 = vld [vmem:[%s9839_s5 + $0x5] ss:$0 sm:$0xff] }
  0xfc   : > { %v717_v57 = vpop.f32.mrb[2].mxu1  ;;  %v821_v58 = vpop.f32.mrb[2].mxu0 }
  0xfd   : > { %v7342_v59 = vpop.f32.mrb[3].mxu1  ;;  %v7358_v60 = vpop.f32.mrb[3].mxu0  ;;  %v2092_v37 = vpack.c.bf16 %v715_v29, %v715_v29  ;;  %v2094_v55 = vpack.c.bf16 %v819_v45, %v819_v45  ;;  %v6697_v45 = vld [vmem:[%s9839_s5 + $0x7] ss:$0 sm:$0xff] }
  0xfe   : > { %v6659_v60 = vld [vmem:[%s9875_s3 + $0x1] ss:$0 sm:$0xff] }
 0x102   : > { %v8786_v61 = vpop.f32.mrb[4].mxu1  ;;  %v8788_v62 = vpop.f32.mrb[4].mxu0 }
 0x103   : > { %v7349_v63 = vpop.f32.mrb[5].mxu1  ;;  %v7373_v0 = vpop.f32.mrb[5].mxu0 }
 0x104   : > { %v769_v2 = vpop.f32.mrb[6].mxu1  ;;  %v925_v3 = vpop.f32.mrb[6].mxu0 }
 0x105   : > { %v7350_v4 = vpop.f32.mrb[7].mxu1  ;;  %v7374_v5 = vpop.f32.mrb[7].mxu0  ;;  %v6693_v2 = vld [vmem:[%s9839_s5 + $0x3] ss:$0 sm:$0xff]  ;;  %v6696_v3 = vld [vmem:[%s9839_s5 + $0x6] ss:$0 sm:$0xff] }
 0x106   : > { %v767_v4 = vadd.f32 %v6659_v60, %v8786_v61  ;;  %v923_v5 = vadd.f32 %v6662_v54, %v8788_v62 }
 0x10a   : > { %v8790_v6 = vpop.f32.mrb[8].mxu1  ;;  %v8792_v8 = vpop.f32.mrb[8].mxu0 }
 0x10b   : > { %v7365_v9 = vpop.f32.mrb[9].mxu1  ;;  %v7389_v10 = vpop.f32.mrb[9].mxu0 }
 0x10c   : > { %v873_v11 = vpop.f32.mrb[10].mxu1  ;;  %v1029_v12 = vpop.f32.mrb[10].mxu0 }
 0x10d   : > { %v7366_v13 = vpop.f32.mrb[11].mxu1  ;;  %v7390_v14 = vpop.f32.mrb[11].mxu0 }
 0x112   : > { %v8797_v16 = vpop.f32.mrb[12].mxu1  ;;  %v1218_v17 = vpop.f32.mrb[12].mxu0 }
 0x113   : > { %v1219_v18 = vadd.f32 %v6690_v15, %v1218_v17  ;;  %v7381_v19 = vpop.f32.mrb[13].mxu1  ;;  %v7405_v20 = vpop.f32.mrb[13].mxu0 }
 0x114   : > { %v977_v21 = vpop.f32.mrb[14].mxu1  ;;  %v1221_v22 = vpop.f32.mrb[14].mxu0  ;;  %v2096_v19 = vpack.c.bf16 %v923_v5, %v923_v5 }
 0x115   : > { %v2100_v23 = vpack.c.bf16 %v1219_v18, %v1219_v18  ;;  %v7382_v24 = vpop.f32.mrb[15].mxu1  ;;  %v7406_v25 = vpop.f32.mrb[15].mxu0  ;;  %v2093_v18 = vpack.c.bf16 %v767_v4, %v767_v4  ;;  %v6661_v22 = vld [vmem:[%s9875_s3 + $0x3] ss:$0 sm:$0xff] }
 0x117   : > { %v2113_v27 = vsel %vm2108_vm2, %v2100_v23, 0  ;;  %v6664_v23 = vld [vmem:[%s9875_s3 + $0x6] ss:$0 sm:$0xff] }
 0x118   : > { %7528 = vmatpush3.bf16.xpose.msra.mxu0 %v2113_v27  ;;  %v871_v27 = vadd.f32 %v6661_v22, %v8790_v6 }
 0x119   : > { %7539 = vmatprep.subr.bf16.mxu0 %v8332_v1 }
 0x11a   : > { %v8807_v30 = vpop.f32.mrb[16].mxu1  ;;  %v1322_v31 = vpop.f32.mrb[16].mxu0 }
 0x11b   : > { %v1323_v32 = vadd.f32 %v6692_v28, %v1322_v31  ;;  %v7397_v33 = vpop.f32.mrb[17].mxu1  ;;  %v7421_v34 = vpop.f32.mrb[17].mxu0  ;;  %v1027_v28 = vadd.f32 %v6664_v23, %v8792_v8  ;;  %v6722_v31 = vld [vmem:[%s9841_s7] ss:$0 sm:$0xff]  ;;  %v2095_v8 = vpack.c.bf16 %v871_v27, %v871_v27 }
 0x11c   : > { %v1081_v35 = vpop.f32.mrb[18].mxu1  ;;  %v1325_v36 = vpop.f32.mrb[18].mxu0 }
 0x11d   : > { %v2102_v38 = vpack.c.bf16 %v1323_v32, %v1323_v32  ;;  %v7398_v39 = vpop.f32.mrb[19].mxu1  ;;  %v7422_v40 = vpop.f32.mrb[19].mxu0  ;;  %v2098_v35 = vpack.c.bf16 %v1027_v28, %v1027_v28 }
 0x11e   : > { %v6663_v40 = vld [vmem:[%s9875_s3 + $0x5] ss:$0 sm:$0xff] }
 0x11f   : > { %v2205_v42 = vsel %vm2108_vm2, %v2102_v38, 0  ;;  %7530 = vmatmul.mubr.msk.bf16.vlgmr.msra.gmra.mrb[44].mxu0 %vm2108_vm2, %v2092_v37 }
 0x120   : > { %7540 = vmatpush3.bf16.xpose.msra.mxu0 %v2205_v42  ;;  %7541 = vmatprep.mubr.msk.bf16.mxu0 %vm8333_vm0, %v8332_v1 }
 0x121   : > { %7551 = vmatprep.subr.bf16.mxu0 %v8332_v1 }
 0x122   : > { %v1270_v46 = vpop.f32.mrb[20].mxu1  ;;  %v1426_v47 = vpop.f32.mrb[20].mxu0 }
 0x123   : > { %v1271_v48 = vadd.f32 %v6691_v43, %v1270_v46  ;;  %v1427_v49 = vadd.f32 %v6694_v44, %v1426_v47  ;;  %v7413_v50 = vpop.f32.mrb[21].mxu1  ;;  %v7437_v51 = vpop.f32.mrb[21].mxu0  ;;  %v975_v46 = vadd.f32 %v6663_v40, %v8797_v16  ;;  %v6665_v16 = vld [vmem:[%s9875_s3 + $0x7] ss:$0 sm:$0xff] }
 0x124   : > { %v1273_v52 = vpop.f32.mrb[22].mxu1  ;;  %v1429_v53 = vpop.f32.mrb[22].mxu0 }
 0x125   : > { %v2101_v56 = vpack.c.bf16 %v1271_v48, %v1271_v48  ;;  %v2104_v57 = vpack.c.bf16 %v1427_v49, %v1427_v49  ;;  %v7414_v58 = vpop.f32.mrb[23].mxu1  ;;  %v7438_v59 = vpop.f32.mrb[23].mxu0  ;;  %v2097_v52 = vpack.c.bf16 %v975_v46, %v975_v46 }
 0x127   : > { %v2159_v63 = vsel %vm2108_vm2, %v2101_v56, 0  ;;  %v2297_v0 = vsel %vm2108_vm2, %v2104_v57, 0  ;;  %7542 = vmatmul.mubr.msk.bf16.vlgmr.msra.gmra.mrb[48].mxu0 %vm2108_vm2, %v2094_v55  ;;  %v1079_v57 = vadd.f32 %v6665_v16, %v8807_v30 }
 0x128   : > { %7534 = vmatpush3.bf16.xpose.msra.mxu1 %v2159_v63  ;;  %7552 = vmatpush3.bf16.xpose.msra.mxu0 %v2297_v0  ;;  %v6723_v0 = vld [vmem:[%s9841_s7 + $0x1] ss:$0 sm:$0xff] }
 0x129   : > { %7553 = vmatprep.mubr.msk.bf16.mxu0 %vm8333_vm0, %v8332_v1  ;;  %7545 = vmatprep.subr.bf16.mxu1 %v8332_v1  ;;  %v2099_v58 = vpack.c.bf16 %v1079_v57, %v1079_v57 }
 0x12a   : > { %v1374_v9 = vpop.f32.mrb[24].mxu1  ;;  %v1530_v10 = vpop.f32.mrb[24].mxu0  ;;  %7563 = vmatprep.subr.bf16.mxu0 %v8332_v1 }
 0x12b   : > { %v1375_v11 = vadd.f32 %v6693_v2, %v1374_v9  ;;  %v1531_v12 = vadd.f32 %v6696_v3, %v1530_v10  ;;  %v7429_v13 = vpop.f32.mrb[25].mxu1  ;;  %v7453_v14 = vpop.f32.mrb[25].mxu0 }
 0x12c   : > { %v1377_v15 = vpop.f32.mrb[26].mxu1  ;;  %v1533_v17 = vpop.f32.mrb[26].mxu0 }
 0x12d   : > { %v2103_v61 = vpack.c.bf16 %v1375_v11, %v1375_v11  ;;  %v2106_v20 = vpack.c.bf16 %v1531_v12, %v1531_v12  ;;  %v7430_v62 = vpop.f32.mrb[27].mxu1  ;;  %v7454_v21 = vpop.f32.mrb[27].mxu0 }
 0x12f   : > { %v2251_v24 = vsel %vm2108_vm2, %v2103_v61, 0  ;;  %v2389_v25 = vsel %vm2108_vm2, %v2106_v20, 0  ;;  %7536 = vmatmul.mubr.msk.bf16.vlgmr.msra.gmra.mrb[52].mxu1 %vm2108_vm2, %v2093_v18  ;;  %7554 = vmatmul.mubr.msk.bf16.vlgmr.msra.gmra.mrb[52].mxu0 %vm2108_vm2, %v2096_v19 }
 0x130   : > { %7546 = vmatpush3.bf16.xpose.msra.mxu1 %v2251_v24  ;;  %7564 = vmatpush3.bf16.xpose.msra.mxu0 %v2389_v25 }
 0x131   : > { %7547 = vmatprep.mubr.msk.bf16.mxu1 %vm8333_vm0, %v8332_v1  ;;  %7565 = vmatprep.mubr.msk.bf16.mxu0 %vm8333_vm0, %v8332_v1 }
 0x132   : > { %v1478_v29 = vpop.f32.mrb[28].mxu1  ;;  %7557 = vmatprep.subr.bf16.mxu1 %v8332_v1  ;;  %7575 = vmatprep.subr.bf16.mxu0 %v8332_v1 }
 0x133   : > { %v1479_v32 = vadd.f32 %v6695_v26, %v1478_v29  ;;  %v7445_v33 = vpop.f32.mrb[29].mxu1 }
 0x134   : > { %v1481_v6 = vpop.f32.mrb[30].mxu1  ;;  %v1722_v34 = vpop.f32.mrb[28].mxu0 }
 0x135   : > { %v2105_v36 = vpack.c.bf16 %v1479_v32, %v1479_v32  ;;  %v7446_v37 = vpop.f32.mrb[31].mxu1  ;;  %v1723_v38 = vadd.f32 %v6722_v31, %v1722_v34  ;;  %v7469_v39 = vpop.f32.mrb[29].mxu0 }
 0x136   : > { %v1725_v41 = vpop.f32.mrb[30].mxu0 }
 0x137   : > { %v2343_v42 = vsel %vm2108_vm2, %v2105_v36, 0  ;;  %7548 = vmatmul.mubr.msk.bf16.vlgmr.msra.gmra.mrb[56].mxu1 %vm2108_vm2, %v2095_v8  ;;  %7566 = vmatmul.mubr.msk.bf16.vlgmr.msra.gmra.mrb[56].mxu0 %vm2108_vm2, %v2098_v35  ;;  %v2574_v43 = vpack.c.bf16 %v1723_v38, %v1723_v38  ;;  %v7470_v44 = vpop.f32.mrb[31].mxu0 }
 0x138   : > { %7558 = vmatpush3.bf16.xpose.msra.mxu1 %v2343_v42  ;;  %7559 = vmatprep.mubr.msk.bf16.mxu1 %vm8333_vm0, %v8332_v1 }
 0x139   : > { %7569 = vmatprep.subr.bf16.mxu1 %v8332_v1  ;;  %v2587_v47 = vsel %vm2585_vm3, %v2574_v43, 0  ;;  %7577 = vmatprep.mubr.msk.bf16.mxu0 %vm8333_vm0, %v8332_v1 }
 0x13a   : > { %v1582_v48 = vpop.f32.mrb[32].mxu1  ;;  %7576 = vmatpush3.bf16.msra.mxu0 %v2587_v47 }
 0x13b   : > { %v1583_v49 = vadd.f32 %v6697_v45, %v1582_v48  ;;  %v7461_v50 = vpop.f32.mrb[33].mxu1  ;;  %7587 = vmatprep.subr.bf16.mxu0 %v8332_v1 }
 0x13c   : > { %v1585_v51 = vpop.f32.mrb[34].mxu1  ;;  %v8897_v59 = vpop.f32.mrb[32].mxu0 }
 0x13d   : > { %v2107_v53 = vpack.c.bf16 %v1583_v49, %v1583_v49  ;;  %v7462_v55 = vpop.f32.mrb[35].mxu1  ;;  %v7485_v60 = vpop.f32.mrb[33].mxu0 }
 0x13e   : > { %v1829_v54 = vpop.f32.mrb[34].mxu0 }
 0x13f   : > { %v2435_v56 = vsel %vm2108_vm2, %v2107_v53, 0  ;;  %7560 = vmatmul.mubr.msk.bf16.vlgmr.msra.gmra.mrb[60].mxu1 %vm2108_vm2, %v2097_v52  ;;  %v7486_v63 = vpop.f32.mrb[35].mxu0 }
 0x140   : > { %7570 = vmatpush3.bf16.xpose.msra.mxu1 %v2435_v56  ;;  %7571 = vmatprep.mubr.msk.bf16.mxu1 %vm8333_vm0, %v8332_v1 }
 0x141   : > { %7581 = vmatprep.subr.bf16.mxu1 %v8332_v1 }
 0x142   : > { %v1774_v2 = vpop.f32.mrb[36].mxu1 }
 0x143   : > { %v1775_v3 = vadd.f32 %v6723_v0, %v1774_v2  ;;  %v7477_v30 = vpop.f32.mrb[37].mxu1 }
 0x144   : > { %v1777_v4 = vpop.f32.mrb[38].mxu1  ;;  %v8902_v5 = vpop.f32.mrb[36].mxu0 }
 0x145   : > { %v2575_v9 = vpack.c.bf16 %v1775_v3, %v1775_v3  ;;  %v7478_v10 = vpop.f32.mrb[39].mxu1  ;;  %v7501_v11 = vpop.f32.mrb[37].mxu0 }
 0x146   : > { %v1933_v12 = vpop.f32.mrb[38].mxu0 }
 0x147   : > { %7572 = vmatmul.mubr.msk.bf16.vlgmr.msra.gmra.mrb[64].mxu1 %vm2108_vm2, %v2099_v58  ;;  %v2633_v13 = vsel %vm2585_vm3, %v2575_v9, 0  ;;  %v7502_v14 = vpop.f32.mrb[39].mxu0 }
 0x148   : > { %7583 = vmatprep.mubr.msk.bf16.mxu1 %vm8333_vm0, %v8332_v1  ;;  %7582 = vmatpush3.bf16.msra.mxu1 %v2633_v13 }
 0x149   : > { %7593 = vmatprep.subr.bf16.mxu1 %v8332_v1 }
 0x14a   : > { %v8906_v15 = vpop.f32.mrb[40].mxu1 }
 0x14b   : > { %v7493_v17 = vpop.f32.mrb[41].mxu1 }
 0x14c   : > { %v1881_v18 = vpop.f32.mrb[42].mxu1  ;;  %v8908_v19 = vpop.f32.mrb[40].mxu0 }
 0x14d   : > { %v7494_v61 = vpop.f32.mrb[43].mxu1  ;;  %v7517_v20 = vpop.f32.mrb[41].mxu0 }
 0x14e   : > { %v2037_v62 = vpop.f32.mrb[42].mxu0 }
 0x14f   : > { %v7518_v21 = vpop.f32.mrb[43].mxu0 }
 0x152   : > { %v8910_v22 = vpop.f32.mrb[44].mxu1 }
 0x153   : > { %v7509_v23 = vpop.f32.mrb[45].mxu1 }
 0x154   : > { %v1985_v24 = vpop.f32.mrb[46].mxu1 }
 0x155   : > { %v7510_v25 = vpop.f32.mrb[47].mxu1 }
 0x15a   : > { %v8912_v26 = vpop.f32.mrb[48].mxu1 }
 0x15b   : > { %v7525_v27 = vpop.f32.mrb[49].mxu1 }
 0x15c   : > { %v2089_v28 = vpop.f32.mrb[50].mxu1 }
 0x15d   : > { %v7526_v29 = vpop.f32.mrb[51].mxu1 }
 0x1f2   : > { %v2149_v31 = vpop.f32.mrb[44].mxu0 }
 0x1f3   : > { %v7531_v32 = vpop.f32.mrb[45].mxu0  ;;  %v2478_v33 = vsel %vm2477_vm4, %v2149_v31, -inf }
 0x1f4   : > { %2479 = vmax.xlane.f32.xlu0 %v2478_v33  ;;  %v2152_v6 = vpop.f32.mrb[46].mxu0 }
 0x1f5   : > { %v7532_v34 = vpop.f32.mrb[47].mxu0 }
 0x1fa   : > { %v2241_v8 = vpop.f32.mrb[48].mxu0 }
 0x1fb   : > { %v7543_v35 = vpop.f32.mrb[49].mxu0  ;;  %v2484_v36 = vsel %vm2477_vm4, %v2241_v8, -inf }
 0x1fc   : > { %2485 = vmax.xlane.f32.xlu1 %v2484_v36  ;;  %v2244_v37 = vpop.f32.mrb[50].mxu0 }
 0x1fd   : > { %v7544_v38 = vpop.f32.mrb[51].mxu0 }
 0x202   : > { %v2195_v39 = vpop.f32.mrb[52].mxu1  ;;  %v2333_v40 = vpop.f32.mrb[52].mxu0 }
 0x203   : > { %v7537_v41 = vpop.f32.mrb[53].mxu1  ;;  %v7555_v42 = vpop.f32.mrb[53].mxu0  ;;  %v2481_v43 = vsel %vm2477_vm4, %v2195_v39, -inf  ;;  %v2490_v48 = vsel %vm2477_vm4, %v2333_v40, -inf }
 0x204   : > { %v2336_v44 = vpop.f32.mrb[54].mxu0  ;;  %2482 = vmax.xlane.f32.xlu0 %v2481_v43  ;;  %v2198_v45 = vpop.f32.mrb[54].mxu1 }
 0x205   : > { %v7538_v46 = vpop.f32.mrb[55].mxu1  ;;  %v7556_v47 = vpop.f32.mrb[55].mxu0 }
 0x208   : > { %2491 = vmax.xlane.f32.xlu0 %v2490_v48 }
 0x20a   : > { %v2287_v49 = vpop.f32.mrb[56].mxu1  ;;  %v2425_v50 = vpop.f32.mrb[56].mxu0 }
 0x20b   : > { %v7549_v51 = vpop.f32.mrb[57].mxu1  ;;  %v7567_v52 = vpop.f32.mrb[57].mxu0  ;;  %v2496_v53 = vsel %vm2477_vm4, %v2425_v50, -inf  ;;  %v2487_v55 = vsel %vm2477_vm4, %v2287_v49, -inf }
 0x20c   : > { %v2428_v16 = vpop.f32.mrb[58].mxu0  ;;  %2497 = vmax.xlane.f32.xlu0 %v2496_v53  ;;  %2488 = vmax.xlane.f32.xlu1 %v2487_v55  ;;  %v2290_v56 = vpop.f32.mrb[58].mxu1  ;;  %v6724_v55 = vld [vmem:[%s9841_s7 + $0x2] ss:$0 sm:$0xff] }
 0x20d   : > { %v7550_v57 = vpop.f32.mrb[59].mxu1  ;;  %v7568_v58 = vpop.f32.mrb[59].mxu0  ;;  %v1827_v16 = vadd.f32 %v6724_v55, %v8897_v59 }
 0x20f   : > { %v2576_v58 = vpack.c.bf16 %v1827_v16, %v1827_v16 }
 0x212   : > { %v2379_v60 = vpop.f32.mrb[60].mxu1 }
 0x213   : > { %v7561_v54 = vpop.f32.mrb[61].mxu1  ;;  %v2493_v63 = vsel %vm2477_vm4, %v2379_v60, -inf }
 0x214   : > { %2494 = vmax.xlane.f32.xlu1 %v2493_v63  ;;  %v2382_v0 = vpop.f32.mrb[62].mxu1  ;;  %v6726_v54 = vld [vmem:[%s9841_s7 + $0x4] ss:$0 sm:$0xff] }
 0x215   : > { %v7562_v2 = vpop.f32.mrb[63].mxu1  ;;  %v2679_v0 = vsel %vm2585_vm3, %v2576_v58, 0  ;;  %v2963_v58 = vld [vmem:[%s9842_s8 + $0x8] sm:$0x3] }
 0x216   : > { %v1931_v2 = vadd.f32 %v6726_v54, %v8902_v5 }
 0x21a   : > { %v2471_v3 = vpop.f32.mrb[64].mxu1 }
 0x21b   : > { %v7573_v30 = vpop.f32.mrb[65].mxu1  ;;  %v2499_v4 = vsel %vm2477_vm4, %v2471_v3, -inf }
 0x21c   : > { %2500 = vmax.xlane.f32.xlu1 %v2499_v4  ;;  %v2474_v9 = vpop.f32.mrb[66].mxu1  ;;  %v2578_v30 = vpack.c.bf16 %v1931_v2, %v1931_v2 }
 0x21d   : > { %v7574_v10 = vpop.f32.mrb[67].mxu1 }
 0x21e   : > { %v6725_v10 = vld [vmem:[%s9841_s7 + $0x3] ss:$0 sm:$0xff] }
 0x281   : > { %v2480_v11 = vpop.xlane.xlu0 %2479 }
 0x282   : > { %v2502_v12 = vsub.f32 %v2149_v31, %v2480_v11  ;;  %v1879_v11 = vadd.f32 %v6725_v10, %v8906_v15 }
 0x284   : > { %v2510_v13 = vmul.f32 1.442695, %v2502_v12  ;;  %v2771_v12 = vsel %vm2585_vm3, %v2578_v30, 0  ;;  %v2577_v15 = vpack.c.bf16 %v1879_v11, %v1879_v11  ;;  %v2965_v11 = vld [vmem:[%s9842_s8 + $0xc] sm:$0x3] }
 0x286   : > { %8196 = vpow2.f32 %v2510_v13 }
 0x289   : > { %v2486_v14 = vpop.xlane.xlu1 %2485 }
 0x28a   : > { %v2504_v17 = vsub.f32 %v2241_v8, %v2486_v14  ;;  %v6728_v14 = vld [vmem:[%s9841_s7 + $0x6] ss:$0 sm:$0xff] }
 0x28c   : > { %v2514_v18 = vmul.f32 1.442695, %v2504_v17 }
 0x28e   : > { %8198 = vpow2.f32 %v2514_v18 }
 0x290   : > { %v8197_v61 = vpop.eup %8196 }
 0x291   : > { %v2483_v20 = vpop.xlane.xlu0 %2482  ;;  %v2526_v62 = vsel %vm2477_vm4, %v8197_v61, 0.0 }
 0x292   : > { %v2503_v21 = vsub.f32 %v2195_v39, %v2483_v20  ;;  %2527 = vadd.xlane.f32.xlu0 %v2526_v62  ;;  %v6727_v62 = vld [vmem:[%s9841_s7 + $0x5] ss:$0 sm:$0xff] }
 0x294   : > { %v2512_v23 = vmul.f32 1.442695, %v2503_v21 }
 0x295   : > { %v2492_v24 = vpop.xlane.xlu0 %2491 }
 0x296   : > { %8200 = vpow2.f32 %v2512_v23  ;;  %v2506_v25 = vsub.f32 %v2333_v40, %v2492_v24  ;;  %v2725_v24 = vsel %vm2585_vm3, %v2577_v15, 0 }
 0x298   : > { %v8199_v27 = vpop.eup %8198  ;;  %v2518_v28 = vmul.f32 1.442695, %v2506_v25 }
 0x299   : > { %v2498_v29 = vpop.xlane.xlu0 %2497  ;;  %v2489_v31 = vpop.xlane.xlu1 %2488  ;;  %v2532_v32 = vsel %vm2477_vm4, %v8199_v27, 0.0 }
 0x29a   : > { %8202 = vpow2.f32 %v2518_v28  ;;  %v2508_v33 = vsub.f32 %v2425_v50, %v2498_v29  ;;  %v2505_v6 = vsub.f32 %v2287_v49, %v2489_v31  ;;  %2533 = vadd.xlane.f32.xlu0 %v2532_v32  ;;  %v1983_v29 = vadd.f32 %v6727_v62, %v8910_v22  ;;  %v6729_v22 = vld [vmem:[%s9841_s7 + $0x7] ss:$0 sm:$0xff] }
 0x29c   : > { %v2522_v34 = vmul.f32 1.442695, %v2508_v33  ;;  %v2516_v8 = vmul.f32 1.442695, %v2505_v6  ;;  %v2579_v6 = vpack.c.bf16 %v1983_v29, %v1983_v29 }
 0x29e   : > { %8204 = vpow2.f32 %v2522_v34 }
 0x29f   : > { %8206 = vpow2.f32 %v2516_v8 }
 0x2a0   : > { %v8924_v35 = vpop.eup %8200 }
 0x2a1   : > { %v2495_v36 = vpop.xlane.xlu1 %2494  ;;  %v2529_v37 = vsel %vm2477_vm4, %v8924_v35, 0.0 }
 0x2a2   : > { %v2507_v38 = vsub.f32 %v2379_v60, %v2495_v36  ;;  %2530 = vadd.xlane.f32.xlu1 %v2529_v37  ;;  %v2817_v37 = vsel %vm2585_vm3, %v2579_v6, 0 }
 0x2a4   : > { %v8928_v39 = vpop.eup %8202  ;;  %v2520_v40 = vmul.f32 1.442695, %v2507_v38  ;;  %v2087_v38 = vadd.f32 %v6729_v22, %v8912_v26 }
 0x2a5   : > { %v2538_v41 = vsel %vm2477_vm4, %v8928_v39, 0.0 }
 0x2a6   : > { %8208 = vpow2.f32 %v2520_v40  ;;  %2539 = vadd.xlane.f32.xlu0 %v2538_v41 }
 0x2a8   : > { %v8932_v42 = vpop.eup %8204 }
 0x2a9   : > { %v8934_v43 = vpop.eup %8206  ;;  %v2501_v44 = vpop.xlane.xlu1 %2500  ;;  %v2544_v45 = vsel %vm2477_vm4, %v8932_v42, 0.0 }
 0x2aa   : > { %v2509_v46 = vsub.f32 %v2471_v3, %v2501_v44  ;;  %2545 = vadd.xlane.f32.xlu0 %v2544_v45  ;;  %v2535_v47 = vsel %vm2477_vm4, %v8934_v43, 0.0 }
 0x2ab   : > { %2536 = vadd.xlane.f32.xlu1 %v2535_v47  ;;  %v2959_v47 = vld [vmem:[%s9842_s8] sm:$0x3] }
 0x2ac   : > { %v2524_v48 = vmul.f32 1.442695, %v2509_v46 }
 0x2ae   : > { %8210 = vpow2.f32 %v2524_v48  ;;  %v2972_v48 = vsel %vm2970_vm5, %v2959_v47, 0 }
 0x2b0   : > { %v8940_v49 = vpop.eup %8208 }
 0x2b1   : > { %v2541_v50 = vsel %vm2477_vm4, %v8940_v49, 0.0 }
 0x2b2   : > { %2542 = vadd.xlane.f32.xlu1 %v2541_v50 }
 0x2b8   : > { %v8944_v51 = vpop.eup %8210 }
 0x2b9   : > { %v2547_v52 = vsel %vm2477_vm4, %v8944_v51, 0.0 }
 0x2ba   : > { %2548 = vadd.xlane.f32.xlu1 %v2547_v52 }
 0x31f   : > { %v2528_v53 = vpop.xlane.xlu0 %2527 }
 0x320   : > { %8212 = vrcp.f32 %v2528_v53 }
 0x327   : > { %v2534_v56 = vpop.xlane.xlu0 %2533 }
 0x328   : > { %8214 = vrcp.f32 %v2534_v56 }
 0x32a   : > { %v8213_v57 = vpop.eup %8212 }
 0x32b   : > { %v2558_v60 = vmul.f32 %v8213_v57, %v8197_v61  ;;  %v2035_v61 = vadd.f32 %v6728_v14, %v8908_v19 }
 0x32d   : > { %v2566_v63 = vpack.c.bf16 %v2558_v60, %v2558_v60  ;;  %v2580_v25 = vpack.c.bf16 %v2035_v61, %v2035_v61 }
 0x32f   : > { %7578 = vmatmul.mubr.msk.bf16.vlgmr.msra.gmra.mrb[60].mxu0 %vm2477_vm4, %v2566_v63  ;;  %v2531_v3 = vpop.xlane.xlu1 %2530  ;;  %v2863_v33 = vsel %vm2585_vm3, %v2580_v25, 0 }
 0x330   : > { %7588 = vmatpush3.bf16.msra.mxu0 %v2679_v0  ;;  %8216 = vrcp.f32 %v2531_v3  ;;  %7589 = vmatprep.mubr.msk.bf16.mxu0 %vm8333_vm0, %v8332_v1  ;;  %v3156_v0 = vsel %vm2970_vm5, %v2963_v58, 0 }
 0x331   : > { %7599 = vmatprep.subr.bf16.mxu0 %v8332_v1 }
 0x332   : > { %v8215_v59 = vpop.eup %8214 }
 0x333   : > { %v2560_v4 = vmul.f32 %v8215_v59, %v8199_v27  ;;  %v2540_v9 = vpop.xlane.xlu0 %2539  ;;  %v2962_v59 = vld [vmem:[%s9842_s8 + $0x6] sm:$0x3] }
 0x334   : > { %8218 = vrcp.f32 %v2540_v9  ;;  %v3110_v10 = vsel %vm2970_vm5, %v2962_v59, 0 }
 0x335   : > { %v2568_v5 = vpack.c.bf16 %v2560_v4, %v2560_v4 }
 0x337   : > { %7590 = vmatmul.mubr.msk.bf16.vlgmr.msra.gmra.mrb[64].mxu0 %vm2477_vm4, %v2568_v5  ;;  %v2546_v13 = vpop.xlane.xlu0 %2545 }
 0x338   : > { %7600 = vmatpush3.bf16.msra.mxu0 %v2771_v12  ;;  %8220 = vrcp.f32 %v2546_v13  ;;  %v2537_v17 = vpop.xlane.xlu1 %2536  ;;  %7601 = vmatprep.mubr.msk.bf16.mxu0 %vm8333_vm0, %v8332_v1 }
 0x339   : > { %8222 = vrcp.f32 %v2537_v17  ;;  %7611 = vmatprep.subr.bf16.mxu0 %v8332_v1 }
 0x33a   : > { %v8217_v18 = vpop.eup %8216 }
 0x33b   : > { %v2559_v20 = vmul.f32 %v8217_v18, %v8924_v35  ;;  %v3248_v18 = vsel %vm2970_vm5, %v2965_v11, 0 }
 0x33d   : > { %v2567_v21 = vpack.c.bf16 %v2559_v20, %v2559_v20  ;;  %v2964_v20 = vld [vmem:[%s9842_s8 + $0xa] sm:$0x3] }
 0x33e   : > { %v8219_v23 = vpop.eup %8218 }
 0x33f   : > { %v2562_v27 = vmul.f32 %v8219_v23, %v8928_v39  ;;  %7584 = vmatmul.mubr.msk.bf16.vlgmr.msra.gmra.mrb[68].mxu1 %vm2477_vm4, %v2567_v21  ;;  %v2543_v28 = vpop.xlane.xlu1 %2542 }
 0x340   : > { %7594 = vmatpush3.bf16.msra.mxu1 %v2725_v24  ;;  %8224 = vrcp.f32 %v2543_v28  ;;  %7595 = vmatprep.mubr.msk.bf16.mxu1 %vm8333_vm0, %v8332_v1  ;;  %v3202_v24 = vsel %vm2970_vm5, %v2964_v20, 0 }
 0x341   : > { %v2570_v19 = vpack.c.bf16 %v2562_v27, %v2562_v27  ;;  %7605 = vmatprep.subr.bf16.mxu1 %v8332_v1 }
 0x342   : > { %v8221_v31 = vpop.eup %8220 }
 0x343   : > { %v8223_v32 = vpop.eup %8222  ;;  %7602 = vmatmul.mubr.msk.bf16.vlgmr.msra.gmra.mrb[68].mxu0 %vm2477_vm4, %v2570_v19  ;;  %v2564_v8 = vmul.f32 %v8221_v31, %v8932_v42  ;;  %v2581_v42 = vpack.c.bf16 %v2087_v38, %v2087_v38 }
 0x344   : > { %v2561_v34 = vmul.f32 %v8223_v32, %v8934_v43  ;;  %7612 = vmatpush3.bf16.msra.mxu0 %v2863_v33  ;;  %7613 = vmatprep.mubr.msk.bf16.mxu0 %vm8333_vm0, %v8332_v1  ;;  %v2966_v33 = vld [vmem:[%s9842_s8 + $0xe] sm:$0x3] }
 0x345   : > { %7623 = vmatprep.subr.bf16.mxu0 %v8332_v1  ;;  %v2572_v39 = vpack.c.bf16 %v2564_v8, %v2564_v8  ;;  %v2909_v43 = vsel %vm2585_vm3, %v2581_v42, 0  ;;  %v3294_v8 = vsel %vm2970_vm5, %v2966_v33, 0 }
 0x346   : > { %v2569_v35 = vpack.c.bf16 %v2561_v34, %v2561_v34 }
 0x347   : > { %v2549_v36 = vpop.xlane.xlu1 %2548 }
 0x348   : > { %7596 = vmatmul.mubr.msk.bf16.vlgmr.msra.gmra.mrb[72].mxu1 %vm2477_vm4, %v2569_v35  ;;  %8226 = vrcp.f32 %v2549_v36 }
 0x349   : > { %7606 = vmatpush3.bf16.msra.mxu1 %v2817_v37  ;;  %7607 = vmatprep.mubr.msk.bf16.mxu1 %vm8333_vm0, %v8332_v1 }
 0x34a   : > { %v8225_v40 = vpop.eup %8224  ;;  %7617 = vmatprep.subr.bf16.mxu1 %v8332_v1 }
 0x34b   : > { %v2563_v41 = vmul.f32 %v8225_v40, %v8940_v49  ;;  %7614 = vmatmul.mubr.msk.bf16.vlgmr.msra.gmra.mrb[72].mxu0 %vm2477_vm4, %v2572_v39  ;;  %v2960_v49 = vld [vmem:[%s9842_s8 + $0x2] sm:$0x3] }
 0x34c   : > { %7625 = vmatprep.mubr.msk.bf16.mxu0 %vm8333_vm0, %v8332_v1  ;;  %7624 = vmatpush3.bf16.msra.mxu0 %v2972_v48  ;;  %v3018_v50 = vsel %vm2970_vm5, %v2960_v49, 0 }
 0x34d   : > { %v2571_v26 = vpack.c.bf16 %v2563_v41, %v2563_v41  ;;  %7635 = vmatprep.subr.bf16.mxu0 %v8332_v1 }
 0x350   : > { %7608 = vmatmul.mubr.msk.bf16.vlgmr.msra.gmra.mrb[76].mxu1 %vm2477_vm4, %v2571_v26 }
 0x351   : > { %7618 = vmatpush3.bf16.msra.mxu1 %v2909_v43  ;;  %7619 = vmatprep.mubr.msk.bf16.mxu1 %vm8333_vm0, %v8332_v1 }
 0x352   : > { %v8227_v44 = vpop.eup %8226  ;;  %7629 = vmatprep.subr.bf16.mxu1 %v8332_v1 }
 0x353   : > { %v2565_v45 = vmul.f32 %v8227_v44, %v8944_v51  ;;  %v2961_v51 = vld [vmem:[%s9842_s8 + $0x4] sm:$0x3] }
 0x354   : > { %v3064_v16 = vsel %vm2970_vm5, %v2961_v51, 0 }
 0x355   : > { %v2573_v46 = vpack.c.bf16 %v2565_v45, %v2565_v45 }
 0x358   : > { %7620 = vmatmul.mubr.msk.bf16.vlgmr.msra.gmra.mrb[80].mxu1 %vm2477_vm4, %v2573_v46 }
 0x359   : > { %7631 = vmatprep.mubr.msk.bf16.mxu1 %vm8333_vm0, %v8332_v1  ;;  %7630 = vmatpush3.bf16.msra.mxu1 %v3018_v50 }
 0x35a   : > { %7641 = vmatprep.subr.bf16.mxu1 %v8332_v1 }
 0x402   : > { %v2623_v52 = vpop.f32.mrb[60].mxu0 }
 0x403   : > { %v2951_v53 = vpack.c.bf16 %v2623_v52, %v2623_v52  ;;  %v7579_v55 = vpop.f32.mrb[61].mxu0 }
 0x404   : > { %v2626_v56 = vpop.f32.mrb[62].mxu0 }
 0x405   : > { %v7580_v57 = vpop.f32.mrb[63].mxu0  ;;  %7626 = vmatmul.mubr.msk.bf16.vlgmr.msra.gmra.mrb[76].mxu0 %vm2108_vm2, %v2951_v53 }
 0x406   : > { %7636 = vmatpush3.bf16.msra.mxu0 %v3064_v16  ;;  %7637 = vmatprep.mubr.msk.bf16.mxu0 %vm8333_vm0, %v8332_v1 }
 0x407   : > { %7647 = vmatprep.subr.bf16.mxu0 %v8332_v1 }
 0x40a   : > { %v2715_v60 = vpop.f32.mrb[64].mxu0 }
 0x40b   : > { %v2953_v54 = vpack.c.bf16 %v2715_v60, %v2715_v60  ;;  %v7591_v63 = vpop.f32.mrb[65].mxu0 }
 0x40c   : > { %v2718_v2 = vpop.f32.mrb[66].mxu0 }
 0x40d   : > { %v7592_v3 = vpop.f32.mrb[67].mxu0  ;;  %7638 = vmatmul.mubr.msk.bf16.vlgmr.msra.gmra.mrb[80].mxu0 %vm2108_vm2, %v2953_v54 }
 0x40e   : > { %7648 = vmatpush3.bf16.msra.mxu0 %v3156_v0  ;;  %7649 = vmatprep.mubr.msk.bf16.mxu0 %vm8333_vm0, %v8332_v1 }
 0x40f   : > { %7659 = vmatprep.subr.bf16.mxu0 %v8332_v1 }
 0x412   : > { %v2669_v30 = vpop.f32.mrb[68].mxu1 }
 0x413   : > { %v2952_v4 = vpack.c.bf16 %v2669_v30, %v2669_v30  ;;  %v7585_v9 = vpop.f32.mrb[69].mxu1 }
 0x414   : > { %v2672_v5 = vpop.f32.mrb[70].mxu1 }
 0x415   : > { %v7586_v12 = vpop.f32.mrb[71].mxu1  ;;  %7632 = vmatmul.mubr.msk.bf16.vlgmr.msra.gmra.mrb[84].mxu1 %vm2108_vm2, %v2952_v4 }
 0x416   : > { %v2807_v13 = vpop.f32.mrb[68].mxu0  ;;  %7642 = vmatpush3.bf16.msra.mxu1 %v3110_v10  ;;  %7643 = vmatprep.mubr.msk.bf16.mxu1 %vm8333_vm0, %v8332_v1 }
 0x417   : > { %v2955_v14 = vpack.c.bf16 %v2807_v13, %v2807_v13  ;;  %v7603_v17 = vpop.f32.mrb[69].mxu0  ;;  %7653 = vmatprep.subr.bf16.mxu1 %v8332_v1 }
 0x418   : > { %v2810_v15 = vpop.f32.mrb[70].mxu0 }
 0x419   : > { %v7604_v61 = vpop.f32.mrb[71].mxu0  ;;  %7650 = vmatmul.mubr.msk.bf16.vlgmr.msra.gmra.mrb[84].mxu0 %vm2108_vm2, %v2955_v14 }
 0x41a   : > { %7660 = vmatpush3.bf16.msra.mxu0 %v3248_v18  ;;  %7661 = vmatprep.mubr.msk.bf16.mxu0 %vm8333_vm0, %v8332_v1 }
 0x41b   : > { %v2761_v62 = vpop.f32.mrb[72].mxu1  ;;  %7671 = vmatprep.subr.bf16.mxu0 %v8332_v1 }
 0x41c   : > { %v2954_v21 = vpack.c.bf16 %v2761_v62, %v2761_v62  ;;  %v7597_v23 = vpop.f32.mrb[73].mxu1 }
 0x41d   : > { %v2764_v25 = vpop.f32.mrb[74].mxu1 }
 0x41e   : > { %v7598_v27 = vpop.f32.mrb[75].mxu1  ;;  %7644 = vmatmul.mubr.msk.bf16.vlgmr.msra.gmra.mrb[88].mxu1 %vm2108_vm2, %v2954_v21  ;;  %v2899_v28 = vpop.f32.mrb[72].mxu0  ;;  %v6778_v25 = vld [vmem:[%s9843_s9] ss:$0 sm:$0xff] }
 0x41f   : > { %v2957_v29 = vpack.c.bf16 %v2899_v28, %v2899_v28  ;;  %7654 = vmatpush3.bf16.msra.mxu1 %v3202_v24  ;;  %v7615_v19 = vpop.f32.mrb[73].mxu0  ;;  %7655 = vmatprep.mubr.msk.bf16.mxu1 %vm8333_vm0, %v8332_v1 }
 0x420   : > { %v2902_v31 = vpop.f32.mrb[74].mxu0  ;;  %7665 = vmatprep.subr.bf16.mxu1 %v8332_v1 }
 0x421   : > { %v7616_v32 = vpop.f32.mrb[75].mxu0  ;;  %7662 = vmatmul.mubr.msk.bf16.vlgmr.msra.gmra.mrb[88].mxu0 %vm2108_vm2, %v2957_v29 }
 0x422   : > { %7675 = vmatprep.mubr.msk.bf16.mxu0 %vm8333_vm0, %v8332_v1 }
 0x423   : > { %v2853_v6 = vpop.f32.mrb[76].mxu1 }
 0x424   : > { %v2956_v34 = vpack.c.bf16 %v2853_v6, %v2853_v6  ;;  %v7609_v22 = vpop.f32.mrb[77].mxu1 }
 0x425   : > { %v2856_v35 = vpop.f32.mrb[78].mxu1 }
 0x426   : > { %v7610_v36 = vpop.f32.mrb[79].mxu1  ;;  %7656 = vmatmul.mubr.msk.bf16.vlgmr.msra.gmra.mrb[92].mxu1 %vm2108_vm2, %v2956_v34 }
 0x427   : > { %7666 = vmatpush3.bf16.msra.mxu1 %v3294_v8  ;;  %7667 = vmatprep.mubr.msk.bf16.mxu1 %vm8333_vm0, %v8332_v1  ;;  %v8136_v36 = vld [vmem:[%s9844_s10] sm:$0xff]  }
 0x428   : > { %7679 = vmatprep.subr.bf16.mxu1 %v8332_v1  ;;  %7672 = vmatpush3.bf16.msra.mxu0 %v8136_v36  ;;  %v8158_v36 = vld [vmem:[%s9872_s26 + $0xf0] sm:$0xff]  }
 0x429   : > { %7673 = vmatprep.subr.bf16.mxu0 %v8332_v1 }
 0x42b   : > { %v2945_v37 = vpop.f32.mrb[80].mxu1 }
 0x42c   : > { %v2958_v38 = vpack.c.bf16 %v2945_v37, %v2945_v37  ;;  %v7621_v39 = vpop.f32.mrb[81].mxu1  ;;  %v8137_v37 = vld [vmem:[%s9844_s10 + $0x8] sm:$0xff]  }
 0x42d   : > { %v2948_v40 = vpop.f32.mrb[82].mxu1  ;;  %7674 = vmatpush3.bf16.msra.mxu0 %v8137_v37  ;;  %v8159_v37 = vld [vmem:[%s9838_s4 + $0xa0] sm:$0xff]  }
 0x42e   : > { %v7622_v41 = vpop.f32.mrb[83].mxu1  ;;  %7668 = vmatmul.mubr.msk.bf16.vlgmr.msra.gmra.mrb[96].mxu1 %vm2108_vm2, %v2958_v38  ;;  %7691 = vmatprep.subr.bf16.mxu0 %v8332_v1  ;;  %v8139_v38 = vld [vmem:[%s9846_s12 + $0x8] sm:$0xff]  }
 0x42f   : > { %7687 = vmatprep.mubr.msk.bf16.mxu1 %vm8333_vm0, %v8332_v1 }
 0x4d8   : > { %v3008_v42 = vpop.f32.mrb[76].mxu0 }
 0x4d9   : > { %v7627_v26 = vpop.f32.mrb[77].mxu0  ;;  %v3336_v50 = vsel %vm676_vm1, %v3008_v42, 0.0 }
 0x4da   : > { %v3011_v43 = vpop.f32.mrb[78].mxu0  ;;  %v6779_v26 = vld [vmem:[%s9848_s14] ss:$0 sm:$0xff] }
 0x4db   : > { %v7628_v44 = vpop.f32.mrb[79].mxu0 }
 0x4dc   : > { %v6780_v44 = vld [vmem:[%s9849_s15] ss:$0 sm:$0xff] }
 0x4e0   : > { %v3100_v45 = vpop.f32.mrb[80].mxu0 }
 0x4e1   : > { %v7639_v46 = vpop.f32.mrb[81].mxu0  ;;  %v3339_v16 = vsel %vm676_vm1, %v3100_v45, 0.0 }
 0x4e2   : > { %v3103_v47 = vpop.f32.mrb[82].mxu0 }
 0x4e3   : > { %v7640_v48 = vpop.f32.mrb[83].mxu0 }
 0x4e4   : > { %v8140_v48 = vld [vmem:[%s9846_s12 + $0x10] sm:$0xff]  }
 0x4e8   : > { %v3054_v49 = vpop.f32.mrb[84].mxu1 }
 0x4e9   : > { %v3337_v51 = vsel %vm676_vm1, %v3054_v49, 0.0  ;;  %v7633_v52 = vpop.f32.mrb[85].mxu1  ;;  %v8141_v49 = vld [vmem:[%s9846_s12 + $0x18] sm:$0xff]  }
 0x4ea   : > { %v3338_v53 = vadd.f32 %v3337_v51, %v3336_v50  ;;  %v3057_v55 = vpop.f32.mrb[86].mxu1  ;;  %v6781_v50 = vld [vmem:[%s9845_s11] ss:$0 sm:$0xff] }
 0x4eb   : > { %v7634_v56 = vpop.f32.mrb[87].mxu1 }
 0x4ec   : > { %v3192_v57 = vpop.f32.mrb[84].mxu0  ;;  %v3340_v58 = vadd.f32 %v3339_v16, %v3338_v53 }
 0x4ed   : > { %v7651_v60 = vpop.f32.mrb[85].mxu0  ;;  %v3343_v4 = vsel %vm676_vm1, %v3192_v57, 0.0 }
 0x4ee   : > { %v3195_v54 = vpop.f32.mrb[86].mxu0 }
 0x4ef   : > { %v7652_v63 = vpop.f32.mrb[87].mxu0 }
 0x4f1   : > { %v3146_v0 = vpop.f32.mrb[88].mxu1 }
 0x4f2   : > { %v3341_v2 = vsel %vm676_vm1, %v3146_v0, 0.0  ;;  %v7645_v3 = vpop.f32.mrb[89].mxu1 }
 0x4f3   : > { %v3342_v59 = vadd.f32 %v3341_v2, %v3340_v58  ;;  %v3149_v30 = vpop.f32.mrb[90].mxu1  ;;  %v6785_v58 = vld [vmem:[%s9847_s13] ss:$0 sm:$0xff] }
 0x4f4   : > { %v7646_v9 = vpop.f32.mrb[91].mxu1  ;;  %v3284_v10 = vpop.f32.mrb[88].mxu0 }
 0x4f5   : > { %v7663_v5 = vpop.f32.mrb[89].mxu0  ;;  %v3344_v11 = vadd.f32 %v3343_v4, %v3342_v59  ;;  %v3347_v20 = vsel %vm676_vm1, %v3284_v10, 0.0 }
 0x4f6   : > { %v3287_v12 = vpop.f32.mrb[90].mxu0 }
 0x4f7   : > { %v7664_v13 = vpop.f32.mrb[91].mxu0  ;;  %v8143_v12 = vld [vmem:[%s9872_s26 + $0xa0] sm:$0xff]  }
 0x4f8   : > { %v8144_v13 = vld [vmem:[%s9872_s26 + $0x88] sm:$0xff]  }
 0x4f9   : > { %v3238_v14 = vpop.f32.mrb[92].mxu1 }
 0x4fa   : > { %v3345_v17 = vsel %vm676_vm1, %v3238_v14, 0.0  ;;  %v7657_v18 = vpop.f32.mrb[93].mxu1  ;;  %v8145_v14 = vld [vmem:[%s9872_s26 + $0xa8] sm:$0xff]  }
 0x4fb   : > { %v3346_v15 = vadd.f32 %v3345_v17, %v3344_v11  ;;  %v3241_v61 = vpop.f32.mrb[94].mxu1  ;;  %v8142_v11 = vld [vmem:[%s9872_s26 + $0x80] sm:$0xff]  }
 0x4fc   : > { %v7658_v62 = vpop.f32.mrb[95].mxu1 }
 0x4fd   : > { %v3348_v21 = vadd.f32 %v3347_v20, %v3346_v15  ;;  %v6791_v20 = vld [vmem:[%s9850_s16] ss:$0 sm:$0xff] }
 0x501   : > { %v3330_v23 = vpop.f32.mrb[96].mxu1 }
 0x502   : > { %v3349_v24 = vsel %vm676_vm1, %v3330_v23, 0.0  ;;  %v7669_v27 = vpop.f32.mrb[97].mxu1 }
 0x503   : > { %v3350_v28 = vadd.f32 %v3349_v24, %v3348_v21  ;;  %v3333_v29 = vpop.f32.mrb[98].mxu1  ;;  %v6792_v21 = vld [vmem:[%s9851_s17] ss:$0 sm:$0xff] }
 0x504   : > { %v7670_v19 = vpop.f32.mrb[99].mxu1  ;;  %v8147_v27 = vld [vmem:[%s9872_s26 + $0xc0] sm:$0xff]   ;;  %v8148_v29 = vld [vmem:[%s9872_s26 + $0x98] sm:$0xff]  }
 0x505   : > { %v3358_v31 = vadd.f32 %v6778_v25, %v3350_v28  ;;  %v8146_v25 = vld [vmem:[%s9872_s26 + $0x90] sm:$0xff]   ;;  %v8149_v19 = vld [vmem:[%s9872_s26 + $0xc8] sm:$0xff]  }
 0x507   : > { %v3359_v32 = vadd.f32 %v3358_v31, %v8508_v7  ;;  %v8138_v7 = vld [vmem:[%s9846_s12] sm:$0xff]   ;;  %v8150_v31 = vld [vmem:[%s9872_s26 + $0xb0] sm:$0xff]  }
 0x508   : > { %7680 = vmatpush3.bf16.msra.mxu1 %v8138_v7  ;;  %v8160_v7 = vld [vmem:[%s9872_s26 + $0xf8] sm:$0xff]  }
 0x509   : > { %v3362_v33 = vsel %vm676_vm1, %v3359_v32, 0.0  ;;  %7681 = vmatprep.subr.bf16.mxu1 %v8332_v1 }
 0x50a   : > { %3363 = vadd.xlane.f32.xlu0 %v3362_v33  ;;  %v8152_v33 = vld [vmem:[%s9872_s26 + $0xb8] sm:$0xff]  }
 0x50c   : > { %7682 = vmatpush3.bf16.msra.mxu1 %v8139_v38  ;;  %v8161_v38 = vld [vmem:[%s9838_s4 + $0xa8] sm:$0xff]  }
 0x50d   : > { %7683 = vmatprep.subr.bf16.mxu1 %v8332_v1 }
 0x510   : > { %7684 = vmatpush3.bf16.msra.mxu1 %v8140_v48  ;;  %v8172_v48 = vld [vmem:[%s9838_s4 + $0xd8] sm:$0xff]  }
 0x511   : > { %7685 = vmatprep.subr.bf16.mxu1 %v8332_v1 }
 0x514   : > { %7686 = vmatpush3.bf16.msra.mxu1 %v8141_v49  ;;  %v8173_v49 = vld [vmem:[%s9840_s6 + $0x88] sm:$0xff]  }
 0x515   : > { %7707 = vmatprep.subr.bf16.mxu1 %v8332_v1 }
 0x597   : > { %v3364_v6 = vpop.xlane.xlu0 %3363 }
 0x598   : > { %v3366_v34 = vmul.f32 0.03125, %v3364_v6  ;;  %v8153_v6 = vld [vmem:[%s9872_s26 + $0xe8] sm:$0xff]  }
 0x59a   : > { %v3367_v22 = vsub.f32 %v3359_v32, %v3366_v34  ;;  %v8151_v32 = vld [vmem:[%s9872_s26 + $0xe0] sm:$0xff]   ;;  %v8154_v34 = vld [vmem:[%s9872_s26 + $0xd0] sm:$0xff]  }
 0x59c   : > { %v3368_v8 = vmul.f32 %v3367_v22, %v3367_v22 }
 0x59e   : > { %v3369_v35 = vsel %vm676_vm1, %v3368_v8, 0.0  ;;  %v8156_v8 = vld [vmem:[%s9872_s26 + $0xd8] sm:$0xff]  }
 0x59f   : > { %3370 = vadd.xlane.f32.xlu1 %v3369_v35  ;;  %v8157_v35 = vld [vmem:[%s9838_s4 + $0x88] sm:$0xff]  }
 0x62c   : > { %v3371_v39 = vpop.xlane.xlu1 %3370 }
 0x62d   : > { %v3372_v40 = vmul.f32 0.03125, %v3371_v39  ;;  %v8162_v39 = vld [vmem:[%s9838_s4 + $0x90] sm:$0xff]  }
 0x62f   : > { %v3373_v41 = vadd.f32 1e-05, %v3372_v40  ;;  %v8163_v40 = vld [vmem:[%s9838_s4 + $0xc0] sm:$0xff]  }
 0x631   : > { %8228 = vrsqrt.f32 %v3373_v41  ;;  %v8164_v41 = vld [vmem:[%s9838_s4 + $0x98] sm:$0xff]  }
 0x63b   : > { %v8229_v42 = vpop.eup %8228 }
 0x63c   : > { %v3375_v43 = vmul.f32 %v8229_v42, %v3367_v22  ;;  %v8155_v22 = vld [vmem:[%s9838_s4 + $0x80] sm:$0xff]   ;;  %v8165_v42 = vld [vmem:[%s9838_s4 + $0xc8] sm:$0xff]  }
 0x63e   : > { %v3382_v45 = vmul.f32 %v6779_v26, %v3375_v43  ;;  %v8166_v26 = vld [vmem:[%s9838_s4 + $0xb0] sm:$0xff]   ;;  %v8167_v43 = vld [vmem:[%s9838_s4 + $0xe0] sm:$0xff]  }
 0x640   : > { %v3389_v46 = vadd.f32 %v6780_v44, %v3382_v45  ;;  %v8168_v44 = vld [vmem:[%s9838_s4 + $0xb8] sm:$0xff]   ;;  %v8169_v45 = vld [vmem:[%s9838_s4 + $0xe8] sm:$0xff]  }
 0x642   : > { %v3390_v47 = vpack.c.bf16 %v3389_v46, %v3389_v46 }
 0x644   : > { %7676 = vmatmul.mubr.msk.bf16.vlgmr.msra.gmra.mrb[92].mxu0 %vm676_vm1, %v3390_v47  ;;  %v8171_v47 = vld [vmem:[%s9840_s6 + $0x80] sm:$0xff]  }
 0x645   : > { %7695 = vmatprep.mubr.msk.bf16.mxu0 %vm8333_vm0, %v8332_v1  ;;  %7692 = vmatpush3.bf16.msra.mxu0 %v8142_v11 }
 0x646   : > { %7693 = vmatprep.subr.bf16.mxu0 %v8332_v1 }
 0x649   : > { %7694 = vmatpush3.bf16.msra.mxu0 %v8144_v13 }
 0x64a   : > { %7699 = vmatprep.subr.bf16.mxu0 %v8332_v1 }
 0x717   : > { %v3451_v51 = vpop.f32.mrb[92].mxu0 }
 0x718   : > { %v3452_v52 = vadd.f32 %v6781_v50, %v3451_v51  ;;  %v7677_v53 = vpop.f32.mrb[93].mxu0  ;;  %v8174_v50 = vld [vmem:[%s9838_s4 + $0xf0] sm:$0xff]   ;;  %v8175_v51 = vld [vmem:[%s9840_s6 + $0xa0] sm:$0xff]  }
 0x719   : > { %v3454_v55 = vpop.f32.mrb[94].mxu0  ;;  %v8177_v53 = vld [vmem:[%s9840_s6 + $0xa8] sm:$0xff]  }
 0x71a   : > { %v3457_v16 = vmax.f32 %v3452_v52, 0.0  ;;  %v7678_v56 = vpop.f32.mrb[95].mxu0  ;;  %v8176_v52 = vld [vmem:[%s9838_s4 + $0xf8] sm:$0xff]   ;;  %v8178_v55 = vld [vmem:[%s9840_s6 + $0x90] sm:$0xff]  }
 0x71b   : > { %v8180_v56 = vld [vmem:[%s9840_s6 + $0x98] sm:$0xff]  }
 0x71c   : > { %v3458_v57 = vpack.c.bf16 %v3457_v16, %v3457_v16  ;;  %v8179_v16 = vld [vmem:[%s9840_s6 + $0xc0] sm:$0xff]  }
 0x71e   : > { %7688 = vmatmul.mubr.msk.bf16.vlgmr.msra.gmra.mrb[100].mxu1 %vm3498_vm6, %v3458_v57  ;;  %v8181_v57 = vld [vmem:[%s9840_s6 + $0xc8] sm:$0xff]  }
 0x71f   : > { %7711 = vmatprep.mubr.msk.bf16.mxu1 %vm8333_vm0, %v8332_v1  ;;  %7708 = vmatpush3.bf16.msra.mxu1 %v8143_v12 }
 0x720   : > { %7709 = vmatprep.subr.bf16.mxu1 %v8332_v1 }
 0x723   : > { %7710 = vmatpush3.bf16.msra.mxu1 %v8145_v14 }
 0x724   : > { %7723 = vmatprep.subr.bf16.mxu1 %v8332_v1 }
 0x7f1   : > { %v3536_v60 = vpop.f32.mrb[100].mxu1 }
 0x7f2   : > { %v3537_v54 = vadd.f32 %v6785_v58, %v3536_v60  ;;  %v7689_v63 = vpop.f32.mrb[101].mxu1  ;;  %v8182_v58 = vld [vmem:[%s9840_s6 + $0xb0] sm:$0xff]   ;;  %v8183_v60 = vld [vmem:[%s9840_s6 + $0xe0] sm:$0xff]  }
 0x7f3   : > { %v3539_v0 = vpop.f32.mrb[102].mxu1  ;;  %v8185_v63 = vld [vmem:[%s9840_s6 + $0xe8] sm:$0xff]  }
 0x7f4   : > { %v7690_v2 = vpop.f32.mrb[103].mxu1  ;;  %v3542_v3 = vadd.f32 %v3537_v54, %v3389_v46  ;;  %v8170_v46 = vld [vmem:[%s9838_s4 + $0xd0] sm:$0xff]   ;;  %v8184_v54 = vld [vmem:[%s9840_s6 + $0xb8] sm:$0xff]  }
 0x7f5   : > { %v8186_v0 = vld [vmem:[%s9840_s6 + $0xd0] sm:$0xff]   ;;  %v8187_v2 = vld [vmem:[%s9840_s6 + $0xd8] sm:$0xff]  }
 0x7f6   : > { %v3545_v59 = vsel %vm676_vm1, %v3542_v3, 0.0 }
 0x7f7   : > { %3546 = vadd.xlane.f32.xlu0 %v3545_v59  ;;  %v8189_v59 = vld [vmem:[%s9840_s6 + $0xf8] sm:$0xff]  }
 0x884   : > { %v3547_v30 = vpop.xlane.xlu0 %3546 }
 0x885   : > { %v3548_v4 = vmul.f32 0.03125, %v3547_v30 }
 0x887   : > { %v3549_v9 = vsub.f32 %v3542_v3, %v3548_v4  ;;  %v8188_v3 = vld [vmem:[%s9840_s6 + $0xf0] sm:$0xff]  }
 0x889   : > { %v3550_v10 = vmul.f32 %v3549_v9, %v3549_v9 }
 0x88b   : > { %v3551_v5 = vsel %vm676_vm1, %v3550_v10, 0.0 }
 0x88c   : > { %3552 = vadd.xlane.f32.xlu1 %v3551_v5 }
 0x919   : > { %v3553_v17 = vpop.xlane.xlu1 %3552 }
 0x91a   : > { %v3554_v18 = vmul.f32 0.03125, %v3553_v17 }
 0x91c   : > { %v3555_v15 = vadd.f32 1e-05, %v3554_v18 }
 0x91e   : > { %8230 = vrsqrt.f32 %v3555_v15 }
 0x928   : > { %v8231_v61 = vpop.eup %8230 }
 0x929   : > { %v3557_v62 = vmul.f32 %v8231_v61, %v3549_v9 }
 0x92b   : > { %v3564_v23 = vmul.f32 %v6791_v20, %v3557_v62 }
 0x92d   : > { %v9158_v24 = vadd.f32 %v6792_v21, %v3564_v23 }
 0x92f   : > { %v9168_v28 = vpack.c.bf16 %v9158_v24, %v9158_v24 }
 0x931   : > { %7696 = vmatmul.mubr.msk.bf16.vlgmr.msra.gmra.mrb[96].mxu0 %vm676_vm1, %v9168_v28  ;;  %7712 = vmatmul.mubr.msk.bf16.vlgmr.msra.gmra.mrb[104].mxu1 %vm676_vm1, %v9168_v28 }
 0x932   : > { %7700 = vmatpush3.bf16.msra.mxu0 %v8146_v25  ;;  %7724 = vmatpush3.bf16.msra.mxu1 %v8147_v27 }
 0x933   : > { %7701 = vmatprep.subr.bf16.mxu0 %v8332_v1  ;;  %7725 = vmatprep.subr.bf16.mxu1 %v8332_v1 }
 0x934   : > { %7703 = vmatprep.mubr.msk.bf16.mxu0 %vm8333_vm0, %v8332_v1  ;;  %7727 = vmatprep.mubr.msk.bf16.mxu1 %vm8333_vm0, %v8332_v1 }
 0x936   : > { %7702 = vmatpush3.bf16.msra.mxu0 %v8148_v29  ;;  %7726 = vmatpush3.bf16.msra.mxu1 %v8149_v19 }
 0x937   : > { %7715 = vmatprep.subr.bf16.mxu0 %v8332_v1  ;;  %7739 = vmatprep.subr.bf16.mxu1 %v8332_v1 }
 0x939   : > { %7704 = vmatmul.mubr.msk.bf16.vlgmr.msra.gmra.mrb[100].mxu0 %vm676_vm1, %v9168_v28  ;;  %7728 = vmatmul.mubr.msk.bf16.vlgmr.msra.gmra.mrb[108].mxu1 %vm676_vm1, %v9168_v28 }
 0x93a   : > { %7716 = vmatpush3.bf16.msra.mxu0 %v8150_v31  ;;  %7740 = vmatpush3.bf16.msra.mxu1 %v8151_v32 }
 0x93b   : > { %7717 = vmatprep.subr.bf16.mxu0 %v8332_v1  ;;  %7741 = vmatprep.subr.bf16.mxu1 %v8332_v1 }
 0x93c   : > { %7719 = vmatprep.mubr.msk.bf16.mxu0 %vm8333_vm0, %v8332_v1  ;;  %7743 = vmatprep.mubr.msk.bf16.mxu1 %vm8333_vm0, %v8332_v1 }
 0x93e   : > { %7718 = vmatpush3.bf16.msra.mxu0 %v8152_v33  ;;  %7742 = vmatpush3.bf16.msra.mxu1 %v8153_v6  ;;  %v6905_v33 = vld [vmem:[%s9839_s5 + $0x8] ss:$0 sm:$0xff] }
 0x93f   : > { %7731 = vmatprep.subr.bf16.mxu0 %v8332_v1  ;;  %7755 = vmatprep.subr.bf16.mxu1 %v8332_v1 }
 0x941   : > { %7720 = vmatmul.mubr.msk.bf16.vlgmr.msra.gmra.mrb[104].mxu0 %vm676_vm1, %v9168_v28  ;;  %7744 = vmatmul.mubr.msk.bf16.vlgmr.msra.gmra.mrb[112].mxu1 %vm676_vm1, %v9168_v28 }
 0x942   : > { %7732 = vmatpush3.bf16.msra.mxu0 %v8154_v34  ;;  %7756 = vmatpush3.bf16.msra.mxu1 %v8155_v22 }
 0x943   : > { %7733 = vmatprep.subr.bf16.mxu0 %v8332_v1  ;;  %7757 = vmatprep.subr.bf16.mxu1 %v8332_v1 }
 0x944   : > { %7735 = vmatprep.mubr.msk.bf16.mxu0 %vm8333_vm0, %v8332_v1  ;;  %7759 = vmatprep.mubr.msk.bf16.mxu1 %vm8333_vm0, %v8332_v1 }
 0x946   : > { %7734 = vmatpush3.bf16.msra.mxu0 %v8156_v8  ;;  %7758 = vmatpush3.bf16.msra.mxu1 %v8157_v35 }
 0x947   : > { %7747 = vmatprep.subr.bf16.mxu0 %v8332_v1  ;;  %7771 = vmatprep.subr.bf16.mxu1 %v8332_v1 }
 0x949   : > { %7736 = vmatmul.mubr.msk.bf16.vlgmr.msra.gmra.mrb[108].mxu0 %vm676_vm1, %v9168_v28  ;;  %7760 = vmatmul.mubr.msk.bf16.vlgmr.msra.gmra.mrb[116].mxu1 %vm676_vm1, %v9168_v28 }
 0x94a   : > { %7748 = vmatpush3.bf16.msra.mxu0 %v8158_v36  ;;  %7772 = vmatpush3.bf16.msra.mxu1 %v8159_v37 }
 0x94b   : > { %7749 = vmatprep.subr.bf16.mxu0 %v8332_v1  ;;  %7773 = vmatprep.subr.bf16.mxu1 %v8332_v1 }
 0x94c   : > { %7751 = vmatprep.mubr.msk.bf16.mxu0 %vm8333_vm0, %v8332_v1  ;;  %7775 = vmatprep.mubr.msk.bf16.mxu1 %vm8333_vm0, %v8332_v1 }
 0x94e   : > { %7750 = vmatpush3.bf16.msra.mxu0 %v8160_v7  ;;  %7774 = vmatpush3.bf16.msra.mxu1 %v8161_v38 }
 0x94f   : > { %7763 = vmatprep.subr.bf16.mxu0 %v8332_v1  ;;  %7787 = vmatprep.subr.bf16.mxu1 %v8332_v1 }
 0x951   : > { %7752 = vmatmul.mubr.msk.bf16.vlgmr.msra.gmra.mrb[112].mxu0 %vm676_vm1, %v9168_v28  ;;  %7776 = vmatmul.mubr.msk.bf16.vlgmr.msra.gmra.mrb[120].mxu1 %vm676_vm1, %v9168_v28 }
 0x952   : > { %7764 = vmatpush3.bf16.msra.mxu0 %v8162_v39  ;;  %7788 = vmatpush3.bf16.msra.mxu1 %v8163_v40  ;;  %v6833_v40 = vld [vmem:[%s9875_s3 + $0x8] ss:$0 sm:$0xff] }
 0x953   : > { %7765 = vmatprep.subr.bf16.mxu0 %v8332_v1  ;;  %7789 = vmatprep.subr.bf16.mxu1 %v8332_v1 }
 0x954   : > { %7767 = vmatprep.mubr.msk.bf16.mxu0 %vm8333_vm0, %v8332_v1  ;;  %7791 = vmatprep.mubr.msk.bf16.mxu1 %vm8333_vm0, %v8332_v1 }
 0x956   : > { %7766 = vmatpush3.bf16.msra.mxu0 %v8164_v41  ;;  %7790 = vmatpush3.bf16.msra.mxu1 %v8165_v42  ;;  %v6907_v42 = vld [vmem:[%s9839_s5 + $0xa] ss:$0 sm:$0xff] }
 0x957   : > { %7779 = vmatprep.subr.bf16.mxu0 %v8332_v1  ;;  %7803 = vmatprep.subr.bf16.mxu1 %v8332_v1 }
 0x959   : > { %7768 = vmatmul.mubr.msk.bf16.vlgmr.msra.gmra.mrb[116].mxu0 %vm676_vm1, %v9168_v28  ;;  %7792 = vmatmul.mubr.msk.bf16.vlgmr.msra.gmra.mrb[124].mxu1 %vm676_vm1, %v9168_v28 }
 0x95a   : > { %7780 = vmatpush3.bf16.msra.mxu0 %v8166_v26  ;;  %7804 = vmatpush3.bf16.msra.mxu1 %v8167_v43 }
 0x95b   : > { %7781 = vmatprep.subr.bf16.mxu0 %v8332_v1  ;;  %7805 = vmatprep.subr.bf16.mxu1 %v8332_v1 }
 0x95c   : > { %7783 = vmatprep.mubr.msk.bf16.mxu0 %vm8333_vm0, %v8332_v1  ;;  %7807 = vmatprep.mubr.msk.bf16.mxu1 %vm8333_vm0, %v8332_v1 }
 0x95e   : > { %7782 = vmatpush3.bf16.msra.mxu0 %v8168_v44  ;;  %7806 = vmatpush3.bf16.msra.mxu1 %v8169_v45 }
 0x95f   : > { %7795 = vmatprep.subr.bf16.mxu0 %v8332_v1  ;;  %7819 = vmatprep.subr.bf16.mxu1 %v8332_v1 }
 0x961   : > { %7784 = vmatmul.mubr.msk.bf16.vlgmr.msra.gmra.mrb[120].mxu0 %vm676_vm1, %v9168_v28  ;;  %7808 = vmatmul.mubr.msk.bf16.vlgmr.msra.gmra.mrb[128].mxu1 %vm676_vm1, %v9168_v28 }
 0x962   : > { %7796 = vmatpush3.bf16.msra.mxu0 %v8170_v46  ;;  %7820 = vmatpush3.bf16.msra.mxu1 %v8171_v47 }
 0x963   : > { %7797 = vmatprep.subr.bf16.mxu0 %v8332_v1  ;;  %7821 = vmatprep.subr.bf16.mxu1 %v8332_v1 }
 0x964   : > { %7799 = vmatprep.mubr.msk.bf16.mxu0 %vm8333_vm0, %v8332_v1  ;;  %7823 = vmatprep.mubr.msk.bf16.mxu1 %vm8333_vm0, %v8332_v1 }
 0x966   : > { %7798 = vmatpush3.bf16.msra.mxu0 %v8172_v48  ;;  %7822 = vmatpush3.bf16.msra.mxu1 %v8173_v49 }
 0x967   : > { %7811 = vmatprep.subr.bf16.mxu0 %v8332_v1  ;;  %7835 = vmatprep.subr.bf16.mxu1 %v8332_v1 }
 0x969   : > { %7800 = vmatmul.mubr.msk.bf16.vlgmr.msra.gmra.mrb[124].mxu0 %vm676_vm1, %v9168_v28  ;;  %7824 = vmatmul.mubr.msk.bf16.vlgmr.msra.gmra.mrb[132].mxu1 %vm676_vm1, %v9168_v28 }
 0x96a   : > { %7812 = vmatpush3.bf16.msra.mxu0 %v8174_v50  ;;  %7836 = vmatpush3.bf16.msra.mxu1 %v8175_v51 }
 0x96b   : > { %7813 = vmatprep.subr.bf16.mxu0 %v8332_v1  ;;  %7837 = vmatprep.subr.bf16.mxu1 %v8332_v1 }
 0x96c   : > { %7815 = vmatprep.mubr.msk.bf16.mxu0 %vm8333_vm0, %v8332_v1  ;;  %7839 = vmatprep.mubr.msk.bf16.mxu1 %vm8333_vm0, %v8332_v1 }
 0x96e   : > { %7814 = vmatpush3.bf16.msra.mxu0 %v8176_v52  ;;  %7838 = vmatpush3.bf16.msra.mxu1 %v8177_v53 }
 0x96f   : > { %7827 = vmatprep.subr.bf16.mxu0 %v8332_v1  ;;  %7851 = vmatprep.subr.bf16.mxu1 %v8332_v1 }
 0x971   : > { %7816 = vmatmul.mubr.msk.bf16.vlgmr.msra.gmra.mrb[128].mxu0 %vm676_vm1, %v9168_v28  ;;  %7840 = vmatmul.mubr.msk.bf16.vlgmr.msra.gmra.mrb[136].mxu1 %vm676_vm1, %v9168_v28 }
 0x972   : > { %7828 = vmatpush3.bf16.msra.mxu0 %v8178_v55  ;;  %7852 = vmatpush3.bf16.msra.mxu1 %v8179_v16  ;;  %v6835_v55 = vld [vmem:[%s9875_s3 + $0xa] ss:$0 sm:$0xff] }
 0x973   : > { %7829 = vmatprep.subr.bf16.mxu0 %v8332_v1  ;;  %7853 = vmatprep.subr.bf16.mxu1 %v8332_v1 }
 0x974   : > { %7831 = vmatprep.mubr.msk.bf16.mxu0 %vm8333_vm0, %v8332_v1  ;;  %7855 = vmatprep.mubr.msk.bf16.mxu1 %vm8333_vm0, %v8332_v1 }
 0x976   : > { %7830 = vmatpush3.bf16.msra.mxu0 %v8180_v56  ;;  %7854 = vmatpush3.bf16.msra.mxu1 %v8181_v57  ;;  %v6906_v56 = vld [vmem:[%s9839_s5 + $0x9] ss:$0 sm:$0xff]  ;;  %v6909_v57 = vld [vmem:[%s9839_s5 + $0xc] ss:$0 sm:$0xff] }
 0x977   : > { %7843 = vmatprep.subr.bf16.mxu0 %v8332_v1  ;;  %7867 = vmatprep.subr.bf16.mxu1 %v8332_v1 }
 0x979   : > { %7832 = vmatmul.mubr.msk.bf16.vlgmr.msra.gmra.mrb[132].mxu0 %vm676_vm1, %v9168_v28  ;;  %7856 = vmatmul.mubr.msk.bf16.vlgmr.msra.gmra.mrb[140].mxu1 %vm676_vm1, %v9168_v28 }
 0x97a   : > { %7844 = vmatpush3.bf16.msra.mxu0 %v8182_v58  ;;  %7868 = vmatpush3.bf16.msra.mxu1 %v8183_v60 }
 0x97b   : > { %7845 = vmatprep.subr.bf16.mxu0 %v8332_v1  ;;  %7869 = vmatprep.subr.bf16.mxu1 %v8332_v1 }
 0x97c   : > { %7847 = vmatprep.mubr.msk.bf16.mxu0 %vm8333_vm0, %v8332_v1  ;;  %7871 = vmatprep.mubr.msk.bf16.mxu1 %vm8333_vm0, %v8332_v1 }
 0x97e   : > { %7846 = vmatpush3.bf16.msra.mxu0 %v8184_v54  ;;  %7870 = vmatpush3.bf16.msra.mxu1 %v8185_v63 }
 0x97f   : > { %7859 = vmatprep.subr.bf16.mxu0 %v8332_v1  ;;  %7883 = vmatprep.subr.bf16.mxu1 %v8332_v1 }
 0x981   : > { %7848 = vmatmul.mubr.msk.bf16.vlgmr.msra.gmra.mrb[136].mxu0 %vm676_vm1, %v9168_v28  ;;  %7872 = vmatmul.mubr.msk.bf16.vlgmr.msra.gmra.mrb[144].mxu1 %vm676_vm1, %v9168_v28 }
 0x982   : > { %7860 = vmatpush3.bf16.msra.mxu0 %v8186_v0  ;;  %7863 = vmatprep.mubr.msk.bf16.mxu0 %vm8333_vm0, %v8332_v1 }
 0x983   : > { %7861 = vmatprep.subr.bf16.mxu0 %v8332_v1  ;;  %7885 = vmatprep.mubr.msk.bf16.mxu1 %vm8333_vm0, %v8332_v1 }
 0x986   : > { %7862 = vmatpush3.bf16.msra.mxu0 %v8187_v2 }
 0x987   : > { %7875 = vmatprep.subr.bf16.mxu0 %v8332_v1 }
 0x989   : > { %7864 = vmatmul.mubr.msk.bf16.vlgmr.msra.gmra.mrb[140].mxu0 %vm676_vm1, %v9168_v28 }
 0x98a   : > { %7876 = vmatpush3.bf16.msra.mxu0 %v8188_v3  ;;  %7879 = vmatprep.mubr.msk.bf16.mxu0 %vm8333_vm0, %v8332_v1 }
 0x98b   : > { %7877 = vmatprep.subr.bf16.mxu0 %v8332_v1 }
 0x98e   : > { %7878 = vmatpush3.bf16.msra.mxu0 %v8189_v59 }
 0x98f   : > { %7889 = vmatprep.subr.bf16.mxu0 %v8332_v1 }
 0x991   : > { %7880 = vmatmul.mubr.msk.bf16.vlgmr.msra.gmra.mrb[144].mxu0 %vm676_vm1, %v9168_v28 }
 0x992   : > { %7891 = vmatprep.mubr.msk.bf16.mxu0 %vm8333_vm0, %v8332_v1 }
 0xa04   : > { %v3712_v30 = vpop.f32.mrb[96].mxu0  ;;  %v3816_v4 = vpop.f32.mrb[104].mxu1 }
 0xa05   : > { %v7697_v9 = vpop.f32.mrb[97].mxu0  ;;  %v7713_v10 = vpop.f32.mrb[105].mxu1  ;;  %v3713_v26 = vadd.f32 %v6833_v40, %v3712_v30  ;;  %v3817_v58 = vadd.f32 %v6835_v55, %v3816_v4  ;;  %v6837_v4 = vld [vmem:[%s9875_s3 + $0xc] ss:$0 sm:$0xff]  ;;  %v6910_v40 = vld [vmem:[%s9839_s5 + $0xd] ss:$0 sm:$0xff] }
 0xa06   : > { %v3715_v5 = vpop.f32.mrb[98].mxu0  ;;  %v3819_v11 = vpop.f32.mrb[106].mxu1 }
 0xa07   : > { %v7698_v12 = vpop.f32.mrb[99].mxu0  ;;  %v7714_v13 = vpop.f32.mrb[107].mxu1  ;;  %v5094_v50 = vpack.c.bf16 %v3713_v26, %v3713_v26  ;;  %v5096_v9 = vpack.c.bf16 %v3817_v58, %v3817_v58 }
 0xa08   : > { %v6834_v13 = vld [vmem:[%s9875_s3 + $0x9] ss:$0 sm:$0xff] }
 0xa0c   : > { %v9436_v14 = vpop.f32.mrb[100].mxu0  ;;  %v9438_v17 = vpop.f32.mrb[108].mxu1 }
 0xa0d   : > { %v7705_v18 = vpop.f32.mrb[101].mxu0  ;;  %v7729_v15 = vpop.f32.mrb[109].mxu1 }
 0xa0e   : > { %v3767_v61 = vpop.f32.mrb[102].mxu0  ;;  %v3923_v20 = vpop.f32.mrb[110].mxu1 }
 0xa0f   : > { %v7706_v62 = vpop.f32.mrb[103].mxu0  ;;  %v7730_v21 = vpop.f32.mrb[111].mxu1  ;;  %v6908_v61 = vld [vmem:[%s9839_s5 + $0xb] ss:$0 sm:$0xff]  ;;  %v6911_v20 = vld [vmem:[%s9839_s5 + $0xe] ss:$0 sm:$0xff] }
 0xa10   : > { %v3765_v62 = vadd.f32 %v6834_v13, %v9436_v14  ;;  %v3921_v21 = vadd.f32 %v6837_v4, %v9438_v17  ;;  %v6978_v4 = vld [vmem:[%s9841_s7 + $0x9] ss:$0 sm:$0xff] }
 0xa14   : > { %v9440_v23 = vpop.f32.mrb[104].mxu0  ;;  %v9442_v25 = vpop.f32.mrb[112].mxu1 }
 0xa15   : > { %v7721_v27 = vpop.f32.mrb[105].mxu0  ;;  %v7745_v28 = vpop.f32.mrb[113].mxu1 }
 0xa16   : > { %v3871_v29 = vpop.f32.mrb[106].mxu0  ;;  %v4027_v19 = vpop.f32.mrb[114].mxu1 }
 0xa17   : > { %v7722_v31 = vpop.f32.mrb[107].mxu0  ;;  %v7746_v32 = vpop.f32.mrb[115].mxu1 }
 0xa1c   : > { %v9447_v6 = vpop.f32.mrb[108].mxu0  ;;  %v4218_v34 = vpop.f32.mrb[116].mxu1 }
 0xa1d   : > { %v4219_v22 = vadd.f32 %v6905_v33, %v4218_v34  ;;  %v7737_v8 = vpop.f32.mrb[109].mxu0  ;;  %v7761_v35 = vpop.f32.mrb[117].mxu1 }
 0xa1e   : > { %v3975_v36 = vpop.f32.mrb[110].mxu0  ;;  %v4221_v37 = vpop.f32.mrb[118].mxu1  ;;  %v5098_v8 = vpack.c.bf16 %v3921_v21, %v3921_v21 }
 0xa1f   : > { %v5102_v7 = vpack.c.bf16 %v4219_v22, %v4219_v22  ;;  %v7738_v38 = vpop.f32.mrb[111].mxu0  ;;  %v7762_v39 = vpop.f32.mrb[119].mxu1  ;;  %v5095_v22 = vpack.c.bf16 %v3765_v62, %v3765_v62  ;;  %v6836_v37 = vld [vmem:[%s9875_s3 + $0xb] ss:$0 sm:$0xff] }
 0xa21   : > { %v5114_v41 = vsel %vm2108_vm2, %v5102_v7, 0  ;;  %v6839_v7 = vld [vmem:[%s9875_s3 + $0xe] ss:$0 sm:$0xff] }
 0xa22   : > { %7884 = vmatpush3.bf16.xpose.msra.mxu1 %v5114_v41  ;;  %v6977_v41 = vld [vmem:[%s9841_s7 + $0x8] ss:$0 sm:$0xff]  ;;  %v4025_v26 = vadd.f32 %v6839_v7, %v9442_v25 }
 0xa23   : > { %7895 = vmatprep.subr.bf16.mxu1 %v8332_v1 }
 0xa24   : > { %v9457_v43 = vpop.f32.mrb[112].mxu0  ;;  %v4322_v44 = vpop.f32.mrb[120].mxu1  ;;  %v5100_v25 = vpack.c.bf16 %v4025_v26, %v4025_v26 }
 0xa25   : > { %v4323_v45 = vadd.f32 %v6907_v42, %v4322_v44  ;;  %v7753_v46 = vpop.f32.mrb[113].mxu0  ;;  %v7777_v47 = vpop.f32.mrb[121].mxu1  ;;  %v3869_v42 = vadd.f32 %v6836_v37, %v9440_v23 }
 0xa26   : > { %v4079_v48 = vpop.f32.mrb[114].mxu0  ;;  %v4325_v49 = vpop.f32.mrb[122].mxu1 }
 0xa27   : > { %v5104_v51 = vpack.c.bf16 %v4323_v45, %v4323_v45  ;;  %v7754_v52 = vpop.f32.mrb[115].mxu0  ;;  %v7778_v53 = vpop.f32.mrb[123].mxu1 }
 0xa29   : > { %v5206_v16 = vsel %vm2108_vm2, %v5104_v51, 0  ;;  %7886 = vmatmul.mubr.msk.bf16.vlgmr.msra.gmra.mrb[148].mxu1 %vm2108_vm2, %v5094_v50  ;;  %v5097_v51 = vpack.c.bf16 %v3869_v42, %v3869_v42 }
 0xa2a   : > { %7896 = vmatpush3.bf16.xpose.msra.mxu1 %v5206_v16  ;;  %7897 = vmatprep.mubr.msk.bf16.mxu1 %vm8333_vm0, %v8332_v1 }
 0xa2b   : > { %7907 = vmatprep.subr.bf16.mxu1 %v8332_v1 }
 0xa2c   : > { %v4270_v60 = vpop.f32.mrb[116].mxu0  ;;  %v4426_v54 = vpop.f32.mrb[124].mxu1 }
 0xa2d   : > { %v4271_v63 = vadd.f32 %v6906_v56, %v4270_v60  ;;  %v4427_v0 = vadd.f32 %v6909_v57, %v4426_v54  ;;  %v7769_v2 = vpop.f32.mrb[117].mxu0  ;;  %v7793_v3 = vpop.f32.mrb[125].mxu1  ;;  %v6838_v56 = vld [vmem:[%s9875_s3 + $0xd] ss:$0 sm:$0xff]  ;;  %v6912_v60 = vld [vmem:[%s9839_s5 + $0xf] ss:$0 sm:$0xff] }
 0xa2e   : > { %v4273_v59 = vpop.f32.mrb[118].mxu0  ;;  %v4429_v30 = vpop.f32.mrb[126].mxu1  ;;  %v3973_v54 = vadd.f32 %v6838_v56, %v9447_v6 }
 0xa2f   : > { %v5103_v10 = vpack.c.bf16 %v4271_v63, %v4271_v63  ;;  %v5106_v5 = vpack.c.bf16 %v4427_v0, %v4427_v0  ;;  %v7770_v11 = vpop.f32.mrb[119].mxu0  ;;  %v7794_v12 = vpop.f32.mrb[127].mxu1 }
 0xa30   : > { %v6840_v12 = vld [vmem:[%s9875_s3 + $0xf] ss:$0 sm:$0xff]  ;;  %s9791_s3 = scalar_lea.hbm %s9852_s18, %s7076_s20 }
 0xa31   : > { %v5160_v18 = vsel %vm2108_vm2, %v5103_v10, 0  ;;  %v5298_v15 = vsel %vm2108_vm2, %v5106_v5, 0  ;;  %7898 = vmatmul.mubr.msk.bf16.vlgmr.msra.gmra.mrb[152].mxu1 %vm2108_vm2, %v5096_v9  ;;  %v5099_v10 = vpack.c.bf16 %v3973_v54, %v3973_v54 }
 0xa32   : > { %7890 = vmatpush3.bf16.xpose.msra.mxu0 %v5160_v18  ;;  %7908 = vmatpush3.bf16.xpose.msra.mxu1 %v5298_v15  ;;  %v4077_v18 = vadd.f32 %v6840_v12, %v9457_v43 }
 0xa33   : > { %7909 = vmatprep.mubr.msk.bf16.mxu1 %vm8333_vm0, %v8332_v1  ;;  %7901 = vmatprep.subr.bf16.mxu0 %v8332_v1 }
 0xa34   : > { %v4374_v27 = vpop.f32.mrb[120].mxu0  ;;  %v4530_v28 = vpop.f32.mrb[128].mxu1  ;;  %7919 = vmatprep.subr.bf16.mxu1 %v8332_v1 }
 0xa35   : > { %v4375_v29 = vadd.f32 %v6908_v61, %v4374_v27  ;;  %v4531_v19 = vadd.f32 %v6911_v20, %v4530_v28  ;;  %v7785_v31 = vpop.f32.mrb[121].mxu0  ;;  %v7809_v32 = vpop.f32.mrb[129].mxu1 }
 0xa36   : > { %v4377_v33 = vpop.f32.mrb[122].mxu0  ;;  %v4533_v34 = vpop.f32.mrb[130].mxu1 }
 0xa37   : > { %v5105_v14 = vpack.c.bf16 %v4375_v29, %v4375_v29  ;;  %v5108_v35 = vpack.c.bf16 %v4531_v19, %v4531_v19  ;;  %v7786_v17 = vpop.f32.mrb[123].mxu0  ;;  %v7810_v36 = vpop.f32.mrb[131].mxu1  ;;  %v5101_v29 = vpack.c.bf16 %v4077_v18, %v4077_v18 }
 0xa39   : > { %v5252_v38 = vsel %vm2108_vm2, %v5105_v14, 0  ;;  %v5390_v39 = vsel %vm2108_vm2, %v5108_v35, 0  ;;  %7892 = vmatmul.mubr.msk.bf16.vlgmr.msra.gmra.mrb[148].mxu0 %vm2108_vm2, %v5095_v22  ;;  %7910 = vmatmul.mubr.msk.bf16.vlgmr.msra.gmra.mrb[156].mxu1 %vm2108_vm2, %v5098_v8 }
 0xa3a   : > { %7902 = vmatpush3.bf16.xpose.msra.mxu0 %v5252_v38  ;;  %7920 = vmatpush3.bf16.xpose.msra.mxu1 %v5390_v39 }
 0xa3b   : > { %7903 = vmatprep.mubr.msk.bf16.mxu0 %vm8333_vm0, %v8332_v1  ;;  %7921 = vmatprep.mubr.msk.bf16.mxu1 %vm8333_vm0, %v8332_v1 }
 0xa3c   : > { %v4478_v44 = vpop.f32.mrb[124].mxu0  ;;  %v4724_v45 = vpop.f32.mrb[132].mxu1  ;;  %7913 = vmatprep.subr.bf16.mxu0 %v8332_v1  ;;  %7931 = vmatprep.subr.bf16.mxu1 %v8332_v1 }
 0xa3d   : > { %v4479_v46 = vadd.f32 %v6910_v40, %v4478_v44  ;;  %v4725_v47 = vadd.f32 %v6977_v41, %v4724_v45  ;;  %v7801_v48 = vpop.f32.mrb[125].mxu0  ;;  %v7825_v49 = vpop.f32.mrb[133].mxu1 }
 0xa3e   : > { %v4481_v50 = vpop.f32.mrb[126].mxu0  ;;  %v4727_v23 = vpop.f32.mrb[134].mxu1 }
 0xa3f   : > { %v5107_v52 = vpack.c.bf16 %v4479_v46, %v4479_v46  ;;  %v5574_v53 = vpack.c.bf16 %v4725_v47, %v4725_v47  ;;  %v7802_v55 = vpop.f32.mrb[127].mxu0  ;;  %v7826_v16 = vpop.f32.mrb[135].mxu1 }
 0xa41   : > { %v5344_v57 = vsel %vm2108_vm2, %v5107_v52, 0  ;;  %v5586_v58 = vsel %vm2585_vm3, %v5574_v53, 0  ;;  %7904 = vmatmul.mubr.msk.bf16.vlgmr.msra.gmra.mrb[152].mxu0 %vm2108_vm2, %v5097_v51  ;;  %7922 = vmatmul.mubr.msk.bf16.vlgmr.msra.gmra.mrb[160].mxu1 %vm2108_vm2, %v5100_v25 }
 0xa42   : > { %7914 = vmatpush3.bf16.xpose.msra.mxu0 %v5344_v57  ;;  %7932 = vmatpush3.bf16.msra.mxu1 %v5586_v58 }
 0xa43   : > { %7915 = vmatprep.mubr.msk.bf16.mxu0 %vm8333_vm0, %v8332_v1  ;;  %7925 = vmatprep.subr.bf16.mxu0 %v8332_v1 }
 0xa44   : > { %v4582_v63 = vpop.f32.mrb[128].mxu0  ;;  %v9532_v0 = vpop.f32.mrb[136].mxu1  ;;  %7933 = vmatprep.mubr.msk.bf16.mxu1 %vm8333_vm0, %v8332_v1  ;;  %7943 = vmatprep.subr.bf16.mxu1 %v8332_v1 }
 0xa45   : > { %v4583_v2 = vadd.f32 %v6912_v60, %v4582_v63  ;;  %v7817_v3 = vpop.f32.mrb[129].mxu0  ;;  %v7841_v59 = vpop.f32.mrb[137].mxu1 }
 0xa46   : > { %v4585_v30 = vpop.f32.mrb[130].mxu0  ;;  %v4831_v9 = vpop.f32.mrb[138].mxu1 }
 0xa47   : > { %v5109_v6 = vpack.c.bf16 %v4583_v2, %v4583_v2  ;;  %v7818_v5 = vpop.f32.mrb[131].mxu0  ;;  %v7842_v11 = vpop.f32.mrb[139].mxu1 }
 0xa49   : > { %v5436_v13 = vsel %vm2108_vm2, %v5109_v6, 0  ;;  %7916 = vmatmul.mubr.msk.bf16.vlgmr.msra.gmra.mrb[156].mxu0 %vm2108_vm2, %v5099_v10 }
 0xa4a   : > { %7926 = vmatpush3.bf16.xpose.msra.mxu0 %v5436_v13  ;;  %7927 = vmatprep.mubr.msk.bf16.mxu0 %vm8333_vm0, %v8332_v1 }
 0xa4b   : > { %7937 = vmatprep.subr.bf16.mxu0 %v8332_v1 }
 0xa4c   : > { %v4776_v15 = vpop.f32.mrb[132].mxu0  ;;  %v9549_v61 = vpop.f32.mrb[140].mxu1 }
 0xa4d   : > { %v4777_v20 = vadd.f32 %v6978_v4, %v4776_v15  ;;  %v7833_v62 = vpop.f32.mrb[133].mxu0  ;;  %v7857_v21 = vpop.f32.mrb[141].mxu1 }
 0xa4e   : > { %v4779_v27 = vpop.f32.mrb[134].mxu0  ;;  %v4935_v28 = vpop.f32.mrb[142].mxu1 }
 0xa4f   : > { %v5575_v19 = vpack.c.bf16 %v4777_v20, %v4777_v20  ;;  %v7834_v31 = vpop.f32.mrb[135].mxu0  ;;  %v7858_v32 = vpop.f32.mrb[143].mxu1 }
 0xa51   : > { %v5632_v33 = vsel %vm2585_vm3, %v5575_v19, 0  ;;  %7928 = vmatmul.mubr.msk.bf16.vlgmr.msra.gmra.mrb[160].mxu0 %vm2108_vm2, %v5101_v29 }
 0xa52   : > { %7938 = vmatpush3.bf16.msra.mxu0 %v5632_v33  ;;  %7939 = vmatprep.mubr.msk.bf16.mxu0 %vm8333_vm0, %v8332_v1 }
 0xa53   : > { %7949 = vmatprep.subr.bf16.mxu0 %v8332_v1 }
 0xa54   : > { %v9556_v43 = vpop.f32.mrb[136].mxu0  ;;  %v9558_v34 = vpop.f32.mrb[144].mxu1 }
 0xa55   : > { %v7849_v22 = vpop.f32.mrb[137].mxu0  ;;  %v7873_v8 = vpop.f32.mrb[145].mxu1 }
 0xa56   : > { %v4883_v14 = vpop.f32.mrb[138].mxu0  ;;  %v5039_v35 = vpop.f32.mrb[146].mxu1 }
 0xa57   : > { %v7850_v17 = vpop.f32.mrb[139].mxu0  ;;  %v7874_v36 = vpop.f32.mrb[147].mxu1 }
 0xa5c   : > { %v9560_v37 = vpop.f32.mrb[140].mxu0 }
 0xa5d   : > { %v7865_v7 = vpop.f32.mrb[141].mxu0 }
 0xa5e   : > { %v4987_v38 = vpop.f32.mrb[142].mxu0 }
 0xa5f   : > { %v7866_v39 = vpop.f32.mrb[143].mxu0 }
 0xa64   : > { %v9562_v40 = vpop.f32.mrb[144].mxu0 }
 0xa65   : > { %v7881_v41 = vpop.f32.mrb[145].mxu0 }
 0xa66   : > { %v5091_v42 = vpop.f32.mrb[146].mxu0 }
 0xa67   : > { %v7882_v26 = vpop.f32.mrb[147].mxu0 }
 0xafc   : > { %v5150_v44 = vpop.f32.mrb[148].mxu1 }
 0xafd   : > { %v7887_v45 = vpop.f32.mrb[149].mxu1  ;;  %v5478_v46 = vsel %vm2477_vm4, %v5150_v44, -inf }
 0xafe   : > { %5479 = vmax.xlane.f32.xlu0 %v5478_v46  ;;  %v5153_v47 = vpop.f32.mrb[150].mxu1 }
 0xaff   : > { %v7888_v48 = vpop.f32.mrb[151].mxu1 }
 0xb04   : > { %v5242_v49 = vpop.f32.mrb[152].mxu1 }
 0xb05   : > { %v7899_v50 = vpop.f32.mrb[153].mxu1  ;;  %v5484_v23 = vsel %vm2477_vm4, %v5242_v49, -inf }
 0xb06   : > { %5485 = vmax.xlane.f32.xlu0 %v5484_v23  ;;  %v5245_v51 = vpop.f32.mrb[154].mxu1 }
 0xb07   : > { %v7900_v25 = vpop.f32.mrb[155].mxu1 }
 0xb0c   : > { %v5196_v52 = vpop.f32.mrb[148].mxu0  ;;  %v5334_v53 = vpop.f32.mrb[156].mxu1 }
 0xb0d   : > { %v7893_v55 = vpop.f32.mrb[149].mxu0  ;;  %v7911_v16 = vpop.f32.mrb[157].mxu1  ;;  %v5481_v56 = vsel %vm2477_vm4, %v5196_v52, -inf  ;;  %v5490_v57 = vsel %vm2477_vm4, %v5334_v53, -inf }
 0xb0e   : > { %5482 = vmax.xlane.f32.xlu1 %v5481_v56  ;;  %v5199_v58 = vpop.f32.mrb[150].mxu0  ;;  %5491 = vmax.xlane.f32.xlu0 %v5490_v57  ;;  %v5337_v60 = vpop.f32.mrb[158].mxu1 }
 0xb0f   : > { %v7894_v54 = vpop.f32.mrb[151].mxu0  ;;  %v7912_v63 = vpop.f32.mrb[159].mxu1 }
 0xb14   : > { %v5288_v2 = vpop.f32.mrb[152].mxu0  ;;  %v5426_v3 = vpop.f32.mrb[160].mxu1 }
 0xb15   : > { %v7905_v59 = vpop.f32.mrb[153].mxu0  ;;  %v7923_v30 = vpop.f32.mrb[161].mxu1  ;;  %v5487_v9 = vsel %vm2477_vm4, %v5288_v2, -inf  ;;  %v5496_v10 = vsel %vm2477_vm4, %v5426_v3, -inf }
 0xb16   : > { %5488 = vmax.xlane.f32.xlu1 %v5487_v9  ;;  %v5291_v6 = vpop.f32.mrb[154].mxu0  ;;  %5497 = vmax.xlane.f32.xlu0 %v5496_v10  ;;  %v5429_v5 = vpop.f32.mrb[162].mxu1  ;;  %v6979_v10 = vld [vmem:[%s9841_s7 + $0xa] ss:$0 sm:$0xff] }
 0xb17   : > { %v7906_v11 = vpop.f32.mrb[155].mxu0  ;;  %v7924_v12 = vpop.f32.mrb[163].mxu1  ;;  %v4829_v6 = vadd.f32 %v6979_v10, %v9532_v0 }
 0xb19   : > { %v5576_v12 = vpack.c.bf16 %v4829_v6, %v4829_v6 }
 0xb1c   : > { %v5380_v13 = vpop.f32.mrb[156].mxu0 }
 0xb1d   : > { %v7917_v4 = vpop.f32.mrb[157].mxu0  ;;  %v5493_v18 = vsel %vm2477_vm4, %v5380_v13, -inf }
 0xb1e   : > { %5494 = vmax.xlane.f32.xlu1 %v5493_v18  ;;  %v5383_v15 = vpop.f32.mrb[158].mxu0  ;;  %v6981_v4 = vld [vmem:[%s9841_s7 + $0xc] ss:$0 sm:$0xff] }
 0xb1f   : > { %v7918_v20 = vpop.f32.mrb[159].mxu0  ;;  %v5678_v15 = vsel %vm2585_vm3, %v5576_v12, 0  ;;  %v7029_v12 = vld [vmem:[%s9842_s8 + $0x18] sm:$0x3] }
 0xb20   : > { %v4933_v20 = vadd.f32 %v6981_v4, %v9549_v61  ;;  %v6983_v61 = vld [vmem:[%s9841_s7 + $0xe] ss:$0 sm:$0xff] }
 0xb24   : > { %v5472_v62 = vpop.f32.mrb[160].mxu0 }
 0xb25   : > { %v7929_v21 = vpop.f32.mrb[161].mxu0  ;;  %v5499_v27 = vsel %vm2477_vm4, %v5472_v62, -inf }
 0xb26   : > { %5500 = vmax.xlane.f32.xlu1 %v5499_v27  ;;  %v5475_v28 = vpop.f32.mrb[162].mxu0  ;;  %v5578_v27 = vpack.c.bf16 %v4933_v20, %v4933_v20 }
 0xb27   : > { %v7930_v29 = vpop.f32.mrb[163].mxu0 }
 0xb28   : > { %v6980_v29 = vld [vmem:[%s9841_s7 + $0xb] ss:$0 sm:$0xff] }
 0xb8b   : > { %v5480_v19 = vpop.xlane.xlu0 %5479 }
 0xb8c   : > { %v5502_v31 = vsub.f32 %v5150_v44, %v5480_v19 }
 0xb8e   : > { %v5510_v32 = vmul.f32 1.442695, %v5502_v31  ;;  %v5770_v31 = vsel %vm2585_vm3, %v5578_v27, 0 }
 0xb90   : > { %8232 = vpow2.f32 %v5510_v32  ;;  %v4881_v32 = vadd.f32 %v6980_v29, %v9556_v43 }
 0xb93   : > { %v5486_v33 = vpop.xlane.xlu0 %5485 }
 0xb94   : > { %v5504_v22 = vsub.f32 %v5242_v49, %v5486_v33 }
 0xb96   : > { %v5514_v8 = vmul.f32 1.442695, %v5504_v22  ;;  %v5037_v22 = vadd.f32 %v6983_v61, %v9558_v34 }
 0xb98   : > { %8234 = vpow2.f32 %v5514_v8  ;;  %v5580_v43 = vpack.c.bf16 %v5037_v22, %v5037_v22 }
 0xb9a   : > { %v8233_v14 = vpop.eup %8232 }
 0xb9b   : > { %v5483_v35 = vpop.xlane.xlu1 %5482  ;;  %v5492_v17 = vpop.xlane.xlu0 %5491  ;;  %v5526_v36 = vsel %vm2477_vm4, %v8233_v14, 0.0 }
 0xb9c   : > { %v5503_v7 = vsub.f32 %v5196_v52, %v5483_v35  ;;  %v5506_v38 = vsub.f32 %v5334_v53, %v5492_v17  ;;  %5527 = vadd.xlane.f32.xlu0 %v5526_v36  ;;  %v5577_v17 = vpack.c.bf16 %v4881_v32, %v4881_v32 }
 0xb9e   : > { %v5512_v39 = vmul.f32 1.442695, %v5503_v7  ;;  %v5518_v41 = vmul.f32 1.442695, %v5506_v38  ;;  %v6982_v7 = vld [vmem:[%s9841_s7 + $0xd] ss:$0 sm:$0xff] }
 0xba0   : > { %8236 = vpow2.f32 %v5512_v39 }
 0xba1   : > { %8238 = vpow2.f32 %v5518_v41  ;;  %v5724_v41 = vsel %vm2585_vm3, %v5577_v17, 0  ;;  %v7030_v17 = vld [vmem:[%s9842_s8 + $0x1a] sm:$0x3] }
 0xba2   : > { %v8235_v42 = vpop.eup %8234 }
 0xba3   : > { %v5489_v26 = vpop.xlane.xlu1 %5488  ;;  %v5498_v44 = vpop.xlane.xlu0 %5497  ;;  %v5532_v45 = vsel %vm2477_vm4, %v8235_v42, 0.0 }
 0xba4   : > { %v5505_v46 = vsub.f32 %v5288_v2, %v5489_v26  ;;  %v5508_v47 = vsub.f32 %v5426_v3, %v5498_v44  ;;  %5533 = vadd.xlane.f32.xlu0 %v5532_v45  ;;  %v5862_v44 = vsel %vm2585_vm3, %v5580_v43, 0 }
 0xba6   : > { %v5516_v48 = vmul.f32 1.442695, %v5505_v46  ;;  %v5522_v49 = vmul.f32 1.442695, %v5508_v47 }
 0xba8   : > { %8240 = vpow2.f32 %v5516_v48  ;;  %v6984_v48 = vld [vmem:[%s9841_s7 + $0xf] ss:$0 sm:$0xff] }
 0xba9   : > { %8242 = vpow2.f32 %v5522_v49 }
 0xbaa   : > { %v9574_v50 = vpop.eup %8236 }
 0xbab   : > { %v9576_v23 = vpop.eup %8238  ;;  %v5495_v51 = vpop.xlane.xlu1 %5494  ;;  %v5529_v25 = vsel %vm2477_vm4, %v9574_v50, 0.0 }
 0xbac   : > { %v5507_v52 = vsub.f32 %v5380_v13, %v5495_v51  ;;  %5530 = vadd.xlane.f32.xlu1 %v5529_v25  ;;  %v5538_v53 = vsel %vm2477_vm4, %v9576_v23, 0.0  ;;  %v5089_v25 = vadd.f32 %v6984_v48, %v9562_v40 }
 0xbad   : > { %5539 = vadd.xlane.f32.xlu0 %v5538_v53 }
 0xbae   : > { %v5520_v55 = vmul.f32 1.442695, %v5507_v52 }
 0xbb0   : > { %8244 = vpow2.f32 %v5520_v55  ;;  %v5581_v55 = vpack.c.bf16 %v5089_v25, %v5089_v25 }
 0xbb2   : > { %v9582_v16 = vpop.eup %8240 }
 0xbb3   : > { %v9584_v56 = vpop.eup %8242  ;;  %v5501_v57 = vpop.xlane.xlu1 %5500  ;;  %v5535_v58 = vsel %vm2477_vm4, %v9582_v16, 0.0 }
 0xbb4   : > { %v5509_v60 = vsub.f32 %v5472_v62, %v5501_v57  ;;  %5536 = vadd.xlane.f32.xlu1 %v5535_v58  ;;  %v5544_v54 = vsel %vm2477_vm4, %v9584_v56, 0.0 }
 0xbb5   : > { %5545 = vadd.xlane.f32.xlu0 %v5544_v54  ;;  %v7025_v54 = vld [vmem:[%s9842_s8 + $0x10] sm:$0x3] }
 0xbb6   : > { %v5524_v63 = vmul.f32 1.442695, %v5509_v60 }
 0xbb8   : > { %8246 = vpow2.f32 %v5524_v63  ;;  %v5971_v63 = vsel %vm2970_vm5, %v7025_v54, 0 }
 0xbba   : > { %v9590_v2 = vpop.eup %8244 }
 0xbbb   : > { %v5541_v3 = vsel %vm2477_vm4, %v9590_v2, 0.0 }
 0xbbc   : > { %5542 = vadd.xlane.f32.xlu1 %v5541_v3 }
 0xbc2   : > { %v9594_v59 = vpop.eup %8246 }
 0xbc3   : > { %v5547_v30 = vsel %vm2477_vm4, %v9594_v59, 0.0 }
 0xbc4   : > { %5548 = vadd.xlane.f32.xlu1 %v5547_v30 }
 0xc29   : > { %v5528_v9 = vpop.xlane.xlu0 %5527 }
 0xc2a   : > { %8248 = vrcp.f32 %v5528_v9 }
 0xc31   : > { %v5534_v5 = vpop.xlane.xlu0 %5533 }
 0xc32   : > { %8250 = vrcp.f32 %v5534_v5 }
 0xc34   : > { %v8249_v11 = vpop.eup %8248 }
 0xc35   : > { %v5558_v13 = vmul.f32 %v8249_v11, %v8233_v14 }
 0xc37   : > { %v5566_v18 = vpack.c.bf16 %v5558_v13, %v5558_v13 }
 0xc39   : > { %v5531_v62 = vpop.xlane.xlu1 %5530  ;;  %7934 = vmatmul.mubr.msk.bf16.vlgmr.msra.gmra.mrb[164].mxu1 %vm2477_vm4, %v5566_v18 }
 0xc3a   : > { %8252 = vrcp.f32 %v5531_v62  ;;  %7944 = vmatpush3.bf16.msra.mxu1 %v5678_v15  ;;  %v5540_v0 = vpop.xlane.xlu0 %5539  ;;  %7945 = vmatprep.mubr.msk.bf16.mxu1 %vm8333_vm0, %v8332_v1  ;;  %v6155_v15 = vsel %vm2970_vm5, %v7029_v12, 0 }
 0xc3b   : > { %8254 = vrcp.f32 %v5540_v0  ;;  %7955 = vmatprep.subr.bf16.mxu1 %v8332_v1  ;;  %v7028_v0 = vld [vmem:[%s9842_s8 + $0x16] sm:$0x3] }
 0xc3c   : > { %v8251_v21 = vpop.eup %8250 }
 0xc3d   : > { %v5560_v28 = vmul.f32 %v8251_v21, %v8235_v42  ;;  %v4985_v42 = vadd.f32 %v6982_v7, %v9560_v37  ;;  %v7031_v21 = vld [vmem:[%s9842_s8 + $0x1c] sm:$0x3] }
 0xc3e   : > { %v6247_v22 = vsel %vm2970_vm5, %v7031_v21, 0 }
 0xc3f   : > { %v5568_v19 = vpack.c.bf16 %v5560_v28, %v5560_v28  ;;  %v5579_v46 = vpack.c.bf16 %v4985_v42, %v4985_v42 }
 0xc41   : > { %v5537_v33 = vpop.xlane.xlu1 %5536  ;;  %7946 = vmatmul.mubr.msk.bf16.vlgmr.msra.gmra.mrb[168].mxu1 %vm2477_vm4, %v5568_v19  ;;  %v5816_v51 = vsel %vm2585_vm3, %v5579_v46, 0  ;;  %v6109_v19 = vsel %vm2970_vm5, %v7028_v0, 0 }
 0xc42   : > { %8256 = vrcp.f32 %v5537_v33  ;;  %7956 = vmatpush3.bf16.msra.mxu1 %v5770_v31  ;;  %v5546_v8 = vpop.xlane.xlu0 %5545  ;;  %7957 = vmatprep.mubr.msk.bf16.mxu1 %vm8333_vm0, %v8332_v1 }
 0xc43   : > { %8258 = vrcp.f32 %v5546_v8  ;;  %7967 = vmatprep.subr.bf16.mxu1 %v8332_v1 }
 0xc44   : > { %v8253_v14 = vpop.eup %8252 }
 0xc45   : > { %v8255_v35 = vpop.eup %8254  ;;  %v5559_v36 = vmul.f32 %v8253_v14, %v9574_v50 }
 0xc46   : > { %v5562_v34 = vmul.f32 %v8255_v35, %v9576_v23 }
 0xc47   : > { %v5567_v38 = vpack.c.bf16 %v5559_v36, %v5559_v36 }
 0xc48   : > { %v5570_v39 = vpack.c.bf16 %v5562_v34, %v5562_v34 }
 0xc49   : > { %7940 = vmatmul.mubr.msk.bf16.vlgmr.msra.gmra.mrb[164].mxu0 %vm2477_vm4, %v5567_v38  ;;  %v5543_v26 = vpop.xlane.xlu1 %5542  ;;  %v6201_v38 = vsel %vm2970_vm5, %v7030_v17, 0 }
 0xc4a   : > { %7950 = vmatpush3.bf16.msra.mxu0 %v5724_v41  ;;  %8260 = vrcp.f32 %v5543_v26  ;;  %7958 = vmatmul.mubr.msk.bf16.vlgmr.msra.gmra.mrb[172].mxu1 %vm2477_vm4, %v5570_v39 }
 0xc4b   : > { %7968 = vmatpush3.bf16.msra.mxu1 %v5862_v44  ;;  %7951 = vmatprep.mubr.msk.bf16.mxu0 %vm8333_vm0, %v8332_v1 }
 0xc4c   : > { %v8257_v45 = vpop.eup %8256  ;;  %7961 = vmatprep.subr.bf16.mxu0 %v8332_v1  ;;  %7969 = vmatprep.mubr.msk.bf16.mxu1 %vm8333_vm0, %v8332_v1 }
 0xc4d   : > { %v8259_v37 = vpop.eup %8258  ;;  %v5561_v47 = vmul.f32 %v8257_v45, %v9582_v16  ;;  %7979 = vmatprep.subr.bf16.mxu1 %v8332_v1 }
 0xc4e   : > { %v5564_v49 = vmul.f32 %v8259_v37, %v9584_v56  ;;  %v5908_v56 = vsel %vm2585_vm3, %v5581_v55, 0  ;;  %v7032_v37 = vld [vmem:[%s9842_s8 + $0x1e] sm:$0x3] }
 0xc4f   : > { %v5569_v50 = vpack.c.bf16 %v5561_v47, %v5561_v47 }
 0xc50   : > { %v5572_v23 = vpack.c.bf16 %v5564_v49, %v5564_v49  ;;  %v6293_v49 = vsel %vm2970_vm5, %v7032_v37, 0 }
 0xc51   : > { %7952 = vmatmul.mubr.msk.bf16.vlgmr.msra.gmra.mrb[168].mxu0 %vm2477_vm4, %v5569_v50  ;;  %v5549_v52 = vpop.xlane.xlu1 %5548 }
 0xc52   : > { %7962 = vmatpush3.bf16.msra.mxu0 %v5816_v51  ;;  %8262 = vrcp.f32 %v5549_v52  ;;  %7970 = vmatmul.mubr.msk.bf16.vlgmr.msra.gmra.mrb[176].mxu1 %vm2477_vm4, %v5572_v23 }
 0xc53   : > { %7963 = vmatprep.mubr.msk.bf16.mxu0 %vm8333_vm0, %v8332_v1  ;;  %7973 = vmatprep.subr.bf16.mxu0 %v8332_v1 }
 0xc54   : > { %v8261_v53 = vpop.eup %8260  ;;  %7981 = vmatprep.mubr.msk.bf16.mxu1 %vm8333_vm0, %v8332_v1  ;;  %7980 = vmatpush3.bf16.msra.mxu1 %v5971_v63 }
 0xc55   : > { %v5563_v16 = vmul.f32 %v8261_v53, %v9590_v2  ;;  %7991 = vmatprep.subr.bf16.mxu1 %v8332_v1  ;;  %v7026_v2 = vld [vmem:[%s9842_s8 + $0x12] sm:$0x3] }
 0xc56   : > { %v6017_v3 = vsel %vm2970_vm5, %v7026_v2, 0 }
 0xc57   : > { %v5571_v40 = vpack.c.bf16 %v5563_v16, %v5563_v16 }
 0xc59   : > { %7964 = vmatmul.mubr.msk.bf16.vlgmr.msra.gmra.mrb[172].mxu0 %vm2477_vm4, %v5571_v40 }
 0xc5a   : > { %7974 = vmatpush3.bf16.msra.mxu0 %v5908_v56  ;;  %7975 = vmatprep.mubr.msk.bf16.mxu0 %vm8333_vm0, %v8332_v1 }
 0xc5b   : > { %7985 = vmatprep.subr.bf16.mxu0 %v8332_v1 }
 0xc5c   : > { %v8263_v57 = vpop.eup %8262 }
 0xc5d   : > { %v5565_v58 = vmul.f32 %v8263_v57, %v9594_v59  ;;  %v7027_v59 = vld [vmem:[%s9842_s8 + $0x14] sm:$0x3] }
 0xc5e   : > { %v6063_v6 = vsel %vm2970_vm5, %v7027_v59, 0 }
 0xc5f   : > { %v5573_v60 = vpack.c.bf16 %v5565_v58, %v5565_v58 }
 0xc61   : > { %7976 = vmatmul.mubr.msk.bf16.vlgmr.msra.gmra.mrb[176].mxu0 %vm2477_vm4, %v5573_v60 }
 0xc62   : > { %7987 = vmatprep.mubr.msk.bf16.mxu0 %vm8333_vm0, %v8332_v1  ;;  %7986 = vmatpush3.bf16.msra.mxu0 %v6017_v3 }
 0xc63   : > { %7997 = vmatprep.subr.bf16.mxu0 %v8332_v1 }
 0xd0c   : > { %v5622_v30 = vpop.f32.mrb[164].mxu1 }
 0xd0d   : > { %v5950_v9 = vpack.c.bf16 %v5622_v30, %v5622_v30  ;;  %v7935_v10 = vpop.f32.mrb[165].mxu1 }
 0xd0e   : > { %v5625_v5 = vpop.f32.mrb[166].mxu1 }
 0xd0f   : > { %v7936_v11 = vpop.f32.mrb[167].mxu1  ;;  %7982 = vmatmul.mubr.msk.bf16.vlgmr.msra.gmra.mrb[180].mxu1 %vm2108_vm2, %v5950_v9 }
 0xd10   : > { %7992 = vmatpush3.bf16.msra.mxu1 %v6063_v6  ;;  %7993 = vmatprep.mubr.msk.bf16.mxu1 %vm8333_vm0, %v8332_v1 }
 0xd11   : > { %8003 = vmatprep.subr.bf16.mxu1 %v8332_v1 }
 0xd14   : > { %v5714_v13 = vpop.f32.mrb[168].mxu1 }
 0xd15   : > { %v5952_v4 = vpack.c.bf16 %v5714_v13, %v5714_v13  ;;  %v7947_v18 = vpop.f32.mrb[169].mxu1 }
 0xd16   : > { %v5717_v20 = vpop.f32.mrb[170].mxu1 }
 0xd17   : > { %v7948_v62 = vpop.f32.mrb[171].mxu1  ;;  %7994 = vmatmul.mubr.msk.bf16.vlgmr.msra.gmra.mrb[184].mxu1 %vm2108_vm2, %v5952_v4 }
 0xd18   : > { %8004 = vmatpush3.bf16.msra.mxu1 %v6155_v15  ;;  %8005 = vmatprep.mubr.msk.bf16.mxu1 %vm8333_vm0, %v8332_v1 }
 0xd19   : > { %8015 = vmatprep.subr.bf16.mxu1 %v8332_v1 }
 0xd1c   : > { %v5668_v27 = vpop.f32.mrb[164].mxu0 }
 0xd1d   : > { %v5951_v28 = vpack.c.bf16 %v5668_v27, %v5668_v27  ;;  %v5806_v29 = vpop.f32.mrb[172].mxu1  ;;  %v7941_v61 = vpop.f32.mrb[165].mxu0 }
 0xd1e   : > { %v5954_v31 = vpack.c.bf16 %v5806_v29, %v5806_v29  ;;  %v7959_v32 = vpop.f32.mrb[173].mxu1  ;;  %v5671_v33 = vpop.f32.mrb[166].mxu0 }
 0xd1f   : > { %v5809_v8 = vpop.f32.mrb[174].mxu1  ;;  %v7942_v14 = vpop.f32.mrb[167].mxu0  ;;  %7988 = vmatmul.mubr.msk.bf16.vlgmr.msra.gmra.mrb[180].mxu0 %vm2108_vm2, %v5951_v28 }
 0xd20   : > { %v7960_v35 = vpop.f32.mrb[175].mxu1  ;;  %8006 = vmatmul.mubr.msk.bf16.vlgmr.msra.gmra.mrb[188].mxu1 %vm2108_vm2, %v5954_v31  ;;  %7998 = vmatpush3.bf16.msra.mxu0 %v6109_v19 }
 0xd21   : > { %8016 = vmatpush3.bf16.msra.mxu1 %v6247_v22  ;;  %7999 = vmatprep.mubr.msk.bf16.mxu0 %vm8333_vm0, %v8332_v1 }
 0xd22   : > { %8017 = vmatprep.mubr.msk.bf16.mxu1 %vm8333_vm0, %v8332_v1  ;;  %8009 = vmatprep.subr.bf16.mxu0 %v8332_v1 }
 0xd23   : > { %8027 = vmatprep.subr.bf16.mxu1 %v8332_v1 }
 0xd24   : > { %v5760_v36 = vpop.f32.mrb[168].mxu0 }
 0xd25   : > { %v5953_v43 = vpack.c.bf16 %v5760_v36, %v5760_v36  ;;  %v5898_v7 = vpop.f32.mrb[176].mxu1  ;;  %v7953_v34 = vpop.f32.mrb[169].mxu0 }
 0xd26   : > { %v5956_v39 = vpack.c.bf16 %v5898_v7, %v5898_v7  ;;  %v7971_v41 = vpop.f32.mrb[177].mxu1  ;;  %v5763_v42 = vpop.f32.mrb[170].mxu0 }
 0xd27   : > { %v5901_v26 = vpop.f32.mrb[178].mxu1  ;;  %v7954_v44 = vpop.f32.mrb[171].mxu0  ;;  %8000 = vmatmul.mubr.msk.bf16.vlgmr.msra.gmra.mrb[184].mxu0 %vm2108_vm2, %v5953_v43 }
 0xd28   : > { %v7972_v45 = vpop.f32.mrb[179].mxu1  ;;  %8018 = vmatmul.mubr.msk.bf16.vlgmr.msra.gmra.mrb[192].mxu1 %vm2108_vm2, %v5956_v39  ;;  %8010 = vmatpush3.bf16.msra.mxu0 %v6201_v38  ;;  %v7042_v38 = vld [vmem:[%s9843_s9 + $0x1] ss:$0 sm:$0xff] }
 0xd29   : > { %8011 = vmatprep.mubr.msk.bf16.mxu0 %vm8333_vm0, %v8332_v1  ;;  %8021 = vmatprep.subr.bf16.mxu0 %v8332_v1 }
 0xd2a   : > { %8031 = vmatprep.mubr.msk.bf16.mxu1 %vm8333_vm0, %v8332_v1 }
 0xd2c   : > { %v5852_v46 = vpop.f32.mrb[172].mxu0 }
 0xd2d   : > { %v5955_v47 = vpack.c.bf16 %v5852_v46, %v5852_v46  ;;  %v7965_v48 = vpop.f32.mrb[173].mxu0 }
 0xd2e   : > { %v5855_v50 = vpop.f32.mrb[174].mxu0 }
 0xd2f   : > { %v7966_v23 = vpop.f32.mrb[175].mxu0  ;;  %8012 = vmatmul.mubr.msk.bf16.vlgmr.msra.gmra.mrb[188].mxu0 %vm2108_vm2, %v5955_v47 }
 0xd30   : > { %8022 = vmatpush3.bf16.msra.mxu0 %v6293_v49  ;;  %8023 = vmatprep.mubr.msk.bf16.mxu0 %vm8333_vm0, %v8332_v1  ;;  %v8190_v23 = vld [vmem:[%s9844_s10 + $0x10] sm:$0xff]  }
 0xd31   : > { %8035 = vmatprep.subr.bf16.mxu0 %v8332_v1  ;;  %8028 = vmatpush3.bf16.msra.mxu1 %v8190_v23 }
 0xd32   : > { %8029 = vmatprep.subr.bf16.mxu1 %v8332_v1 }
 0xd34   : > { %v5944_v51 = vpop.f32.mrb[176].mxu0 }
 0xd35   : > { %v5957_v25 = vpack.c.bf16 %v5944_v51, %v5944_v51  ;;  %v7977_v52 = vpop.f32.mrb[177].mxu0  ;;  %v8191_v51 = vld [vmem:[%s9844_s10 + $0x18] sm:$0xff]  }
 0xd36   : > { %v5947_v53 = vpop.f32.mrb[178].mxu0  ;;  %8030 = vmatpush3.bf16.msra.mxu1 %v8191_v51 }
 0xd37   : > { %v7978_v55 = vpop.f32.mrb[179].mxu0  ;;  %8024 = vmatmul.mubr.msk.bf16.vlgmr.msra.gmra.mrb[192].mxu0 %vm2108_vm2, %v5957_v25  ;;  %v8193_v25 = vld [vmem:[%s9846_s12 + $0x28] sm:$0xff]  }
 0xd38   : > { %8043 = vmatprep.mubr.msk.bf16.mxu0 %vm8333_vm0, %v8332_v1 }
 0xde2   : > { %v6007_v16 = vpop.f32.mrb[180].mxu1 }
 0xde3   : > { %v7983_v40 = vpop.f32.mrb[181].mxu1  ;;  %v6335_v3 = vsel %vm676_vm1, %v6007_v16, 0.0 }
 0xde4   : > { %v6010_v56 = vpop.f32.mrb[182].mxu1  ;;  %v7045_v40 = vld [vmem:[%s9848_s14 + $0x1] ss:$0 sm:$0xff] }
 0xde5   : > { %v7984_v57 = vpop.f32.mrb[183].mxu1 }
 0xde6   : > { %v7046_v57 = vld [vmem:[%s9849_s15 + $0x1] ss:$0 sm:$0xff] }
 0xdea   : > { %v6099_v58 = vpop.f32.mrb[184].mxu1 }
 0xdeb   : > { %v7995_v60 = vpop.f32.mrb[185].mxu1  ;;  %v6338_v11 = vsel %vm676_vm1, %v6099_v58, 0.0 }
 0xdec   : > { %v6102_v54 = vpop.f32.mrb[186].mxu1 }
 0xded   : > { %v7996_v63 = vpop.f32.mrb[187].mxu1 }
 0xdee   : > { %v8194_v63 = vld [vmem:[%s9846_s12 + $0x30] sm:$0xff]  }
 0xdf2   : > { %v6053_v2 = vpop.f32.mrb[180].mxu0 }
 0xdf3   : > { %v6336_v59 = vsel %vm676_vm1, %v6053_v2, 0.0  ;;  %v6191_v30 = vpop.f32.mrb[188].mxu1  ;;  %v7989_v9 = vpop.f32.mrb[181].mxu0  ;;  %v8195_v2 = vld [vmem:[%s9846_s12 + $0x38] sm:$0xff]  }
 0xdf4   : > { %v6337_v10 = vadd.f32 %v6336_v59, %v6335_v3  ;;  %v8007_v6 = vpop.f32.mrb[189].mxu1  ;;  %v6056_v5 = vpop.f32.mrb[182].mxu0  ;;  %v6342_v29 = vsel %vm676_vm1, %v6191_v30, 0.0  ;;  %v7052_v3 = vld [vmem:[%s9845_s11 + $0x1] ss:$0 sm:$0xff] }
 0xdf5   : > { %v6194_v12 = vpop.f32.mrb[190].mxu1  ;;  %v7990_v13 = vpop.f32.mrb[183].mxu0 }
 0xdf6   : > { %v8008_v4 = vpop.f32.mrb[191].mxu1  ;;  %v6339_v18 = vadd.f32 %v6338_v11, %v6337_v10 }
 0xdfa   : > { %v6145_v15 = vpop.f32.mrb[184].mxu0 }
 0xdfb   : > { %v6340_v20 = vsel %vm676_vm1, %v6145_v15, 0.0  ;;  %v6283_v62 = vpop.f32.mrb[192].mxu1  ;;  %v8001_v0 = vpop.f32.mrb[185].mxu0 }
 0xdfc   : > { %v6341_v21 = vadd.f32 %v6340_v20, %v6339_v18  ;;  %v8019_v27 = vpop.f32.mrb[193].mxu1  ;;  %v6148_v28 = vpop.f32.mrb[186].mxu0  ;;  %v6346_v17 = vsel %vm676_vm1, %v6283_v62, 0.0 }
 0xdfd   : > { %v6286_v61 = vpop.f32.mrb[194].mxu1  ;;  %v8002_v19 = vpop.f32.mrb[187].mxu0 }
 0xdfe   : > { %v8020_v31 = vpop.f32.mrb[195].mxu1  ;;  %v6343_v32 = vadd.f32 %v6342_v29, %v6341_v21 }
 0xe02   : > { %v6237_v33 = vpop.f32.mrb[188].mxu0 }
 0xe03   : > { %v6344_v22 = vsel %vm676_vm1, %v6237_v33, 0.0  ;;  %v8013_v8 = vpop.f32.mrb[189].mxu0  ;;  %v7073_v33 = vld [vmem:[%s9850_s16 + $0x1] ss:$0 sm:$0xff] }
 0xe04   : > { %v6345_v14 = vadd.f32 %v6344_v22, %v6343_v32  ;;  %v6240_v35 = vpop.f32.mrb[190].mxu0  ;;  %v7074_v8 = vld [vmem:[%s9851_s17 + $0x1] ss:$0 sm:$0xff] }
 0xe05   : > { %v8014_v36 = vpop.f32.mrb[191].mxu0 }
 0xe06   : > { %v6347_v43 = vadd.f32 %v6346_v17, %v6345_v14 }
 0xe0a   : > { %v6329_v7 = vpop.f32.mrb[192].mxu0 }
 0xe0b   : > { %v6348_v34 = vsel %vm676_vm1, %v6329_v7, 0.0  ;;  %v8025_v39 = vpop.f32.mrb[193].mxu0 }
 0xe0c   : > { %v6349_v41 = vadd.f32 %v6348_v34, %v6347_v43  ;;  %v6332_v42 = vpop.f32.mrb[194].mxu0 }
 0xe0d   : > { %v8026_v26 = vpop.f32.mrb[195].mxu0 }
 0xe0e   : > { %v6358_v44 = vadd.f32 %v7042_v38, %v6349_v41 }
 0xe10   : > { %v6359_v45 = vadd.f32 %v6358_v44, %v9158_v24  ;;  %v8192_v24 = vld [vmem:[%s9846_s12 + $0x20] sm:$0xff]  }
 0xe11   : > { %8036 = vmatpush3.bf16.msra.mxu0 %v8192_v24 }
 0xe12   : > { %v6364_v37 = vsel %vm676_vm1, %v6359_v45, 0.0  ;;  %8037 = vmatprep.subr.bf16.mxu0 %v8332_v1 }
 0xe13   : > { %6365 = vadd.xlane.f32.xlu0 %v6364_v37 }
 0xe15   : > { %8038 = vmatpush3.bf16.msra.mxu0 %v8193_v25 }
 0xe16   : > { %8039 = vmatprep.subr.bf16.mxu0 %v8332_v1 }
 0xe19   : > { %8040 = vmatpush3.bf16.msra.mxu0 %v8194_v63 }
 0xe1a   : > { %8041 = vmatprep.subr.bf16.mxu0 %v8332_v1  ;;  %v7065_v1 = vld [vmem:[%s9847_s13 + $0x1] ss:$0 sm:$0xff] }
 0xe1d   : > { %8042 = vmatpush3.bf16.msra.mxu0 %v8195_v2 }
 0xea0   : > { %v6366_v46 = vpop.xlane.xlu0 %6365 }
 0xea1   : > { %v6367_v47 = vmul.f32 0.03125, %v6366_v46 }
 0xea3   : > { %v6368_v48 = vsub.f32 %v6359_v45, %v6367_v47 }
 0xea5   : > { %v6369_v49 = vmul.f32 %v6368_v48, %v6368_v48 }
 0xea7   : > { %v6370_v50 = vsel %vm676_vm1, %v6369_v49, 0.0 }
 0xea8   : > { %6371 = vadd.xlane.f32.xlu1 %v6370_v50 }
 0xf35   : > { %v6372_v52 = vpop.xlane.xlu1 %6371 }
 0xf36   : > { %v6373_v53 = vmul.f32 0.03125, %v6372_v52 }
 0xf38   : > { %v6374_v55 = vadd.f32 1e-05, %v6373_v53 }
 0xf3a   : > { %8264 = vrsqrt.f32 %v6374_v55 }
 0xf44   : > { %v8265_v16 = vpop.eup %8264 }
 0xf45   : > { %v6376_v56 = vmul.f32 %v8265_v16, %v6368_v48 }
 0xf47   : > { %v6383_v58 = vmul.f32 %v7045_v40, %v6376_v56 }
 0xf49   : > { %v6390_v60 = vadd.f32 %v7046_v57, %v6383_v58 }
 0xf4b   : > { %v6391_v54 = vpack.c.bf16 %v6390_v60, %v6390_v60 }
 0xf4d   : > { %8032 = vmatmul.mubr.msk.bf16.vlgmr.msra.gmra.mrb[196].mxu1 %vm676_vm1, %v6391_v54 }
0x1020   : > { %v6454_v59 = vpop.f32.mrb[196].mxu1 }
0x1021   : > { %v6455_v30 = vadd.f32 %v7052_v3, %v6454_v59  ;;  %v8033_v9 = vpop.f32.mrb[197].mxu1 }
0x1022   : > { %v6457_v10 = vpop.f32.mrb[198].mxu1 }
0x1023   : > { %v6460_v6 = vmax.f32 %v6455_v30, 0.0  ;;  %v8034_v5 = vpop.f32.mrb[199].mxu1 }
0x1025   : > { %v6461_v11 = vpack.c.bf16 %v6460_v6, %v6460_v6 }
0x1027   : > { %8044 = vmatmul.mubr.msk.bf16.vlgmr.msra.gmra.mrb[196].mxu0 %vm3498_vm6, %v6461_v11 }
0x10fa   : > { %v6540_v12 = vpop.f32.mrb[196].mxu0 }
0x10fb   : > { %v6541_v13 = vadd.f32 %v7065_v1, %v6540_v12  ;;  %v8045_v4 = vpop.f32.mrb[197].mxu0 }
0x10fc   : > { %v6543_v18 = vpop.f32.mrb[198].mxu0 }
0x10fd   : > { %v8046_v15 = vpop.f32.mrb[199].mxu0  ;;  %v6546_v20 = vadd.f32 %v6541_v13, %v6390_v60 }
0x10ff   : > { %v6551_v62 = vsel %vm676_vm1, %v6546_v20, 0.0 }
0x1100   : > { %6552 = vadd.xlane.f32.xlu0 %v6551_v62 }
0x118d   : > { %v6553_v0 = vpop.xlane.xlu0 %6552 }
0x118e   : > { %v6554_v21 = vmul.f32 0.03125, %v6553_v0 }
0x1190   : > { %v6555_v27 = vsub.f32 %v6546_v20, %v6554_v21 }
0x1192   : > { %v6556_v28 = vmul.f32 %v6555_v27, %v6555_v27 }
0x1194   : > { %v6557_v29 = vsel %vm676_vm1, %v6556_v28, 0.0 }
0x1195   : > { %6558 = vadd.xlane.f32.xlu1 %v6557_v29 }
0x1222   : > { %v6559_v61 = vpop.xlane.xlu1 %6558 }
0x1223   : > { %v6560_v19 = vmul.f32 0.03125, %v6559_v61 }
0x1225   : > { %v6561_v31 = vadd.f32 1e-05, %v6560_v19 }
0x1227   : > { %8266 = vrsqrt.f32 %v6561_v31 }
0x1231   : > { %v8267_v32 = vpop.eup %8266 }
0x1232   : > { %v6563_v22 = vmul.f32 %v8267_v32, %v6555_v27 }
0x1234   : > { %v6570_v14 = vmul.f32 %v7073_v33, %v6563_v22 }
0x1236   : > { %v6577_v35 = vadd.f32 %v7074_v8, %v6570_v14 }
0x1238   : > { %6578 = vst.msk [vmem:[%s566_s27] sm:$0xff] %vm676_vm1, %v6577_v35 }
0x1239   : > { %8281 = shalt.err (!%p8278_p3)
}
0x123a   : > { %s8282_s23 = scalar_lea.hbm %s9791_s3, 128  ;;  %s8286_s27 = scalar_lea.hbm %s9852_s18, 256 }
0x123b   : > { %p8283_p4 = scmp.ne.s32.totalorder %s9791_s3, %s8282_s23  ;;  %p8287_p9 = scmp.lt.u32.totalorder %s9791_s3, %s9852_s18 }
0x123c   : > { %p8288_p10 = scmp.lt.u32.totalorder %s8286_s27, %s8282_s23  ;;  %p8290_p12 = scmp.lt.u32.totalorder %s8282_s23, %s9791_s3 }
0x123d   : > { %p8284_p7 = pnand %p8283_p4, %p8468_p5 }
0x123e   : > { %p8289_p11 = por %p8288_p10, %p8287_p9 }
0x123f   : > { %p8285_p8 = pneg %p8284_p7 }
0x1240   : > { %p8291_p13 = por %p8290_p12, %p8289_p11 }
0x1242   : > { %p8292_p0 = pnand %p8291_p13, %p8285_p8 }
0x1244   : > { %8295 = shalt.err (!%p8292_p0)
}
0x1245   : > { %8047 = dma.vmem_to_hbm [thread:$0]  (%p8468_p5), %s9793_s29, 128, %s9791_s3, %s6580_s21  }
0x1246 PF: > { %s9876_s24 = sld [smem:[#allocation7_spill]]  ;;  %s9877_s0 = sld [smem:[#allocation5_spill]] }
0x124c   : > { %p8053_p1 = scmp.ge.s32.totalorder %s9876_s24, 2  ;;  %s6605_s25 = sand.u32 1, %s9877_s0  }
0x124d   : > { %s6606_s19 = scalar_lea.sflag [#allocation3], %s6605_s25 }
0x124e   : > { %p8050_p2 = pnand %p8053_p1, %p8472_p6 }
0x1250   : > { %8313 = dma.done.wait (!%p8050_p2), %s6606_s19, 128  }
0x1251   : > { %8315 = vsyncadd (!%p8050_p2), %s6606_s19, 4294967168  ;;  %s9879_s30 = sld [smem:[#allocation8_spill]]  ;;  %s9880_s23 = sld [smem:[#allocation6_spill]] }
0x1252   : > { %s9881_s29 = sld [smem:[#allocation9_spill]]  ;;  %s9882_s27 = smov %s8322_s28 }
0x1257   : > { %p28_p3 = scmp.ge.s32.totalorder %s9879_s30, 4   ;;  %s9883_s28 = smov %s9880_s23 }
0x1259   :  { %30 = sbr.rel (!%p28_p3) target bundleno = 8 (0x8), region = 143 }
0x1260   :  { %6611 = vsyncpa [#allocation3], 1 }
0x1261   :  { %6613 = vsyncpa [#allocation3 + $0x1], 1 }

</bundles_post_ra>
